<compile_context>
chip_gen: v7x
topology: tpu7x:2x2x1
jax: 0.10.0
libtpu: 0.0.40
codegen_flags: <defaults>
</compile_context>

<pallas_src>
import functools

import jax
import jax.numpy as jnp
from jax import lax
from jax.experimental import pallas as pl
from jax.experimental.pallas import tpu as pltpu

_LANES = 128   # packed output width / lane-fold width
_NQ = 22       # number of per-batch accumulated scalars


def _floor_mult(x, m):
    return (x // m) * m


def _ceil_div(a, b):
    return -(-a // b)


def _make_kernel(bt, nt, ch, n_split, num_k, n_true, needs_mask):
    """Builds the reduction kernel for one tiling configuration."""
    nchunks = nt // ch

    def kernel(src_ref, corr_ref, w_ref, anc_s_ref, anc_c_ref, out_ref, acc_ref):
        # src_ref, corr_ref : (bt, 3, nt) f32 blocks
        # w_ref             : (bt, nt)    f32 block (dense sublanes)
        # anc_*_ref         : (bt, 3)     f32 per-batch anchors (first point)
        # out_ref           : (bt, 128)   f32 packed sums (written at last k)
        # acc_ref           : (_NQ*bt, 128) f32 per-lane partial sums (scratch)
        k = pl.program_id(1)

        @pl.when(k == 0)
        def _init():
            acc_ref[...] = jnp.zeros_like(acc_ref)

        # Per-batch anchors, (bt, 1) each; broadcast over lanes inside the chunks.
        a_s = [anc_s_ref[:, a:a + 1] for a in range(3)]
        a_c = [anc_c_ref[:, a:a + 1] for a in range(3)]

        if needs_mask:
            if n_split > 1:
                tile = (pl.program_id(0) % n_split) * num_k + k
            else:
                tile = k

        def fold_add(q, x):
            # Fold (bt, ch) -> (bt, 128) with vreg-column adds, accumulate into
            # the q-th (bt, 128) slab of the scratch (static, sublane-aligned rows).
            part = x[:, 0:_LANES]
            for j in range(1, ch // _LANES):
                part = part + x[:, j * _LANES:(j + 1) * _LANES]
            r0 = q * bt
            acc_ref[r0:r0 + bt, :] = acc_ref[r0:r0 + bt, :] + part

        for j in range(nchunks):
            c0, c1 = j * ch, (j + 1) * ch
            w = w_ref[:, c0:c1]                                  # (bt, ch) dense
            s = [src_ref[:, a, c0:c1] for a in range(3)]         # dense planes
            c = [corr_ref[:, a, c0:c1] for a in range(3)]

            if needs_mask:
                col = tile * nt + c0 + lax.broadcasted_iota(jnp.int32, (bt, ch), 1)
                valid = col < n_true
                w = jnp.where(valid, w, 0.0)
                s = [jnp.where(valid, s[a] - a_s[a], 0.0) for a in range(3)]
                c = [jnp.where(valid, c[a] - a_c[a], 0.0) for a in range(3)]
            else:
                s = [s[a] - a_s[a] for a in range(3)]
                c = [c[a] - a_c[a] for a in range(3)]

            ws = [w * s[a] for a in range(3)]

            # Quantity layout (anchored frame):
            #   0..8  : S'[a,d] = sum w*(s_a-as_a)*(c_d-ac_d)   (row-major a,d)
            #   9..11 : wsrc'   = sum w*(s - as)
            #   12..14: wcorr'  = sum w*(c - ac)
            #   15..17: ssrc'   = sum (s - as)
            #   18..20: scorr'  = sum (c - ac)
            #   21    : sw      = sum w
            q = 0
            for a in range(3):
                for d in range(3):
                    fold_add(q, ws[a] * c[d])
                    q += 1
            for a in range(3):
                fold_add(q, ws[a])
                q += 1
            for d in range(3):
                fold_add(q, w * c[d])
                q += 1
            for a in range(3):
                fold_add(q, s[a])
                q += 1
            for d in range(3):
                fold_add(q, c[d])
                q += 1
            fold_add(q, w)

        # Cross-lane (XLU) reductions + 22-way lane packing only once per batch
        # tile, on the final reduction step.
        @pl.when(k == num_k - 1)
        def _finalize():
            lane = lax.broadcasted_iota(jnp.int32, (bt, _LANES), 1)
            packed = jnp.zeros((bt, _LANES), jnp.float32)
            for q in range(_NQ):
                red = jnp.sum(acc_ref[q * bt:(q + 1) * bt, :], axis=-1, keepdims=True)
                packed = packed + jnp.where(lane == q, red, 0.0)
            out_ref[...] = packed

    return kernel


@functools.lru_cache(maxsize=1)
def _pick_config():
    """Chip-dependent tile caps / VMEM budget (safe defaults if unknown)."""
    try:
        kind = jax.devices()[0].device_kind.lower()
    except Exception:  # pragma: no cover - no devices / init failure
        kind = ""
    big_vmem = ("v5" in kind) or ("v6" in kind)   # 128 MiB VMEM generations
    if big_vmem:
        return dict(bt_max=64, nt_max=4096, vmem_limit_bytes=80 * 1024 * 1024,
                    n_buffers=3)
    # Conservative plan (covers v7x: 64 MiB VMEM / 2 TensorCores).
    return dict(bt_max=64, nt_max=2048, vmem_limit_bytes=48 * 1024 * 1024,
                n_buffers=3)


@functools.partial(jax.jit,
                   static_argnames=("bt_max", "nt_max", "vmem_limit_bytes",
                                    "n_buffers"))
def _weight_svd_forward(src, src_corr, weights, *, bt_max, nt_max,
                        vmem_limit_bytes, n_buffers):
    src = src.astype(jnp.float32)
    src_corr = src_corr.astype(jnp.float32)
    weights = weights.astype(jnp.float32)
    B, three, N = src.shape
    assert three == 3

    # Tiny-shape alignment pads only (no full-size pad copies for normal inputs;
    # ragged tiles are masked inside the kernel instead).
    b_eff, n_eff = B, N
    if B < 8:
        pad = 8 - B
        src = jnp.pad(src, ((0, pad), (0, 0), (0, 0)))
        src_corr = jnp.pad(src_corr, ((0, pad), (0, 0), (0, 0)))
        weights = jnp.pad(weights, ((0, pad), (0, 0)))
        b_eff = 8
    if N < _LANES:
        pad = _LANES - N
        src = jnp.pad(src, ((0, 0), (0, 0), (0, pad)))
        src_corr = jnp.pad(src_corr, ((0, 0), (0, 0), (0, pad)))
        weights = jnp.pad(weights, ((0, 0), (0, pad)))
        n_eff = _LANES

    bt = min(bt_max, _floor_mult(b_eff, 8))
    nt = min(nt_max, _floor_mult(n_eff, _LANES))
    num_b_tiles = _ceil_div(b_eff, bt)
    num_n_tiles = _ceil_div(n_eff, nt)

    # Give v7x's second TensorCore work when there is only one batch tile.
    n_split = 2 if (num_b_tiles == 1 and num_n_tiles >= 2
                    and num_n_tiles % 2 == 0) else 1
    num_k = num_n_tiles // n_split
    needs_mask = (num_n_tiles * nt) != N          # mask against the TRUE N
    ch = 512 if nt % 512 == 0 else (256 if nt % 256 == 0 else _LANES)

    # Per-batch anchors (first point) for numerically robust single-pass sums.
    anc_s = src[:, :, 0]        # (b_eff, 3)
    anc_c = src_corr[:, :, 0]

    grid = (num_b_tiles * n_split, num_k)
    if n_split == 1:
        src_map = lambda p, k: (p, 0, k)
        w_map = lambda p, k: (p, k)
        anc_map = lambda p, k: (p, 0)
    else:
        src_map = lambda p, k: (p // n_split, 0, (p % n_split) * num_k + k)
        w_map = lambda p, k: (p // n_split, (p % n_split) * num_k + k)
        anc_map = lambda p, k: (p // n_split, 0)
    out_map = lambda p, k: (p, 0)

    def _big_spec(shape, imap):
        # Deeper buffering on the two big streams (helps hide DMA jitter on v7x);
        # fall back gracefully if pipeline_mode is unavailable.
        if num_k >= n_buffers:
            try:
                return pl.BlockSpec(shape, imap, pipeline_mode=pl.Buffered(n_buffers))
            except (TypeError, AttributeError):
                pass
        return pl.BlockSpec(shape, imap)

    kernel = _make_kernel(bt, nt, ch, n_split, num_k, N, needs_mask)
    out_rows = grid[0] * bt

    sums = pl.pallas_call(
        kernel,
        out_shape=jax.ShapeDtypeStruct((out_rows, _LANES), jnp.float32),
        grid_spec=pltpu.PrefetchScalarGridSpec(
            num_scalar_prefetch=0,
            grid=grid,
            in_specs=[
                _big_spec((bt, 3, nt), src_map),
                _big_spec((bt, 3, nt), src_map),
                pl.BlockSpec((bt, nt), w_map),
                pl.BlockSpec((bt, 3), anc_map),
                pl.BlockSpec((bt, 3), anc_map),
            ],
            out_specs=pl.BlockSpec((bt, _LANES), out_map),
            scratch_shapes=[pltpu.VMEM((_NQ * bt, _LANES), jnp.float32)],
        ),
        compiler_params=pltpu.CompilerParams(
            dimension_semantics=("parallel", "arbitrary"),
            vmem_limit_bytes=vmem_limit_bytes,
        ),
        cost_estimate=pl.CostEstimate(
            flops=44 * B * N,
            transcendentals=0,
            bytes_accessed=(7 * B * N + 2 * out_rows * _LANES) * 4,
        ),
    )(src, src_corr, weights, anc_s, anc_c)

    # Combine N-split partials, drop padded / ragged batch rows.
    sums = sums.reshape(num_b_tiles, n_split, bt, _LANES).sum(axis=1)
    sums = sums.reshape(num_b_tiles * bt, _LANES)[:B]

    S = sums[:, 0:9].reshape(B, 3, 3)       # sum w*(s-as)(c-ac)^T
    wsrc = sums[:, 9:12]                    # sum w*(s-as)
    wcorr = sums[:, 12:15]                  # sum w*(c-ac)
    ssrc = sums[:, 15:18]                   # sum (s-as)
    scorr = sums[:, 18:21]                  # sum (c-ac)
    sw = sums[:, 21]                        # sum w

    inv_n = 1.0 / N
    m_s = ssrc * inv_n                      # anchored unweighted means
    m_c = scorr * inv_n
    # H = sum_n w (src - mean_src)(corr - mean_corr)^T, expanded in anchored sums
    # (translation-invariant, so the anchor drops out analytically).
    H = (S
         - wsrc[:, :, None] * m_c[:, None, :]
         - m_s[:, :, None] * wcorr[:, None, :]
         + sw[:, None, None] * (m_s[:, :, None] * m_c[:, None, :]))

    # TODO(synk): 3x3 SVD / determinant have no Pallas TPU primitive; this tiny
    # epilogue stays in plain JAX (a closed-form quaternion solve could replace it).
    u, _, vh = jnp.linalg.svd(H)            # H = u @ diag(s) @ vh ; torch v = vh^T
    v = jnp.swapaxes(vh, -1, -2)
    ut = jnp.swapaxes(u, -1, -2)
    r = jnp.matmul(v, ut)
    det = jnp.linalg.det(r)
    sign = jnp.where(det < 0, -1.0, 1.0)    # (B,)
    # reflect = diag(1, 1, -1): negate last column of v when det(r) < 0.
    col_scale = jnp.stack([jnp.ones_like(sign), jnp.ones_like(sign), sign], axis=-1)
    v = v * col_scale[:, None, :]
    R = jnp.matmul(v, ut)

    # t = -R @ sum_n(w*src) + sum_n(w*src_corr); undo the anchoring.
    wsum_src = wsrc + anc_s[:B] * sw[:, None]
    wsum_corr = wcorr + anc_c[:B] * sw[:, None]
    t = jnp.matmul(-R, wsum_src[:, :, None]) + wsum_corr[:, :, None]
    return R, t.reshape(B, 3)


def weight_svd_head(src, src_corr, weights):
    """JAX/Pallas equivalent of WeightSVDHead.forward.  Returns (R, t)."""
    return _weight_svd_forward(src, src_corr, weights, **_pick_config())


def _reference(src, src_corr, weights):
    """Plain-JAX re-implementation of the torch forward (for testing)."""
    src_c = src - src.mean(axis=2, keepdims=True)
    corr_c = src_corr - src_corr.mean(axis=2, keepdims=True)
    H = jnp.einsum("bdn,ben->bde", src_c * weights[:, None, :], corr_c)
    u, _, vh = jnp.linalg.svd(H)
    v = jnp.swapaxes(vh, -1, -2)
    ut = jnp.swapaxes(u, -1, -2)
    sign = jnp.where(jnp.linalg.det(jnp.matmul(v, ut)) < 0, -1.0, 1.0)
    scale = jnp.stack([jnp.ones_like(sign), jnp.ones_like(sign), sign], -1)
    R = jnp.matmul(v * scale[:, None, :], ut)
    t = (jnp.matmul(-R, (weights[:, None, :] * src).sum(-1, keepdims=True))
         + (weights[:, None, :] * src_corr).sum(-1, keepdims=True))
    return R, t.reshape(src.shape[0], 3)


if __name__ == "__main__":
    key = jax.random.PRNGKey(0)
    # (small baseline) / (ragged N + ragged B, masked path) / (multi-tile, N-split)
    cases = [(2, 128), (5, 1000), (2, 32768)]
    for B, N in cases:
        key, k1, k2, k3 = jax.random.split(key, 4)
        src = jax.random.normal(k1, (B, 3, N), dtype=jnp.float32) + 3.0
        src_corr = jax.random.normal(k2, (B, 3, N), dtype=jnp.float32) - 2.0
        weights = jax.nn.softmax(
            jax.random.normal(k3, (B, N), dtype=jnp.float32), axis=-1)

        R, t = weight_svd_head(src, src_corr, weights)
        jax.block_until_ready((R, t))
        assert R.shape == (B, 3, 3) and t.shape == (B, 3)

        R_ref, t_ref = _reference(src, src_corr, weights)
        assert bool(jnp.allclose(R, R_ref, rtol=1e-3, atol=2e-3)), \
            f"R mismatch B={B} N={N}"
        assert bool(jnp.allclose(t, t_ref, rtol=1e-3, atol=2e-3)), \
            f"t mismatch B={B} N={N}"

    print("KERNEL_OK")
</pallas_src>

<mosaic_0001>
module attributes {stable_mosaic.version = 11 : i64} {
  func.func @kernel(%arg0: i32, %arg1: i32, %arg2: memref<8x3x128xf32, #tpu.memory_space<vmem>>, %arg3: memref<8x3x128xf32, #tpu.memory_space<vmem>>, %arg4: memref<8x128xf32, #tpu.memory_space<vmem>>, %arg5: memref<8x3xf32, #tpu.memory_space<vmem>>, %arg6: memref<8x3xf32, #tpu.memory_space<vmem>>, %arg7: memref<8x128xf32, #tpu.memory_space<vmem>>, %arg8: memref<176x128xf32, #tpu.memory_space<vmem>>) attributes {dimension_semantics = [#tpu.dimension_semantics<parallel>, #tpu.dimension_semantics<arbitrary>], iteration_bounds = array<i64: 1, 1>, scalar_prefetch = 0 : i64, scratch_operands = 1 : i64, tpu.core_type = #tpu.core_type<tc>, window_params = [{transform_indices = @transform_0, window_bounds = array<i64: 8, 3, 128>}, {transform_indices = @transform_1, window_bounds = array<i64: 8, 3, 128>}, {transform_indices = @transform_2, window_bounds = array<i64: 8, 128>}, {transform_indices = @transform_3, window_bounds = array<i64: 8, 3>}, {transform_indices = @transform_4, window_bounds = array<i64: 8, 3>}, {transform_indices = @transform_5, window_bounds = array<i64: 8, 128>}]} {
    %c0_i32 = arith.constant 0 : i32
    %0 = arith.cmpi eq, %arg1, %c0_i32 : i32
    %1 = arith.extui %0 : i1 to i32
    %c0_i32_0 = arith.constant 0 : i32
    %2 = arith.cmpi ne, %1, %c0_i32_0 : i32
    scf.if %2 {
      %cst = arith.constant 0.000000e+00 : f32
      %118 = vector.broadcast %cst : f32 to vector<176x128xf32>
      %c0_99 = arith.constant 0 : index
      %c0_100 = arith.constant 0 : index
      %119 = vector.load %arg8[%c0_99, %c0_100] : memref<176x128xf32, #tpu.memory_space<vmem>>, vector<176x128xf32>
      tpu.vector_store %arg8[%c0_99, %c0_100], %118 {strides = array<i32>} : memref<176x128xf32, #tpu.memory_space<vmem>>, vector<176x128xf32>,
    } else {
    }
    %c0 = arith.constant 0 : index
    %c0_1 = arith.constant 0 : index
    %3 = vector.load %arg5[%c0, %c0_1] : memref<8x3xf32, #tpu.memory_space<vmem>>, vector<8x1xf32>
    %c0_2 = arith.constant 0 : index
    %c1 = arith.constant 1 : index
    %4 = vector.load %arg5[%c0_2, %c1] : memref<8x3xf32, #tpu.memory_space<vmem>>, vector<8x1xf32>
    %c0_3 = arith.constant 0 : index
    %c2 = arith.constant 2 : index
    %5 = vector.load %arg5[%c0_3, %c2] : memref<8x3xf32, #tpu.memory_space<vmem>>, vector<8x1xf32>
    %c0_4 = arith.constant 0 : index
    %c0_5 = arith.constant 0 : index
    %6 = vector.load %arg6[%c0_4, %c0_5] : memref<8x3xf32, #tpu.memory_space<vmem>>, vector<8x1xf32>
    %c0_6 = arith.constant 0 : index
    %c1_7 = arith.constant 1 : index
    %7 = vector.load %arg6[%c0_6, %c1_7] : memref<8x3xf32, #tpu.memory_space<vmem>>, vector<8x1xf32>
    %c0_8 = arith.constant 0 : index
    %c2_9 = arith.constant 2 : index
    %8 = vector.load %arg6[%c0_8, %c2_9] : memref<8x3xf32, #tpu.memory_space<vmem>>, vector<8x1xf32>
    %c0_10 = arith.constant 0 : index
    %c0_11 = arith.constant 0 : index
    %9 = vector.load %arg4[%c0_10, %c0_11] : memref<8x128xf32, #tpu.memory_space<vmem>>, vector<8x128xf32>
    %c0_12 = arith.constant 0 : index
    %c0_13 = arith.constant 0 : index
    %c0_14 = arith.constant 0 : index
    %10 = vector.load %arg2[%c0_12, %c0_13, %c0_14] : memref<8x3x128xf32, #tpu.memory_space<vmem>>, vector<8x1x128xf32>
    %11 = vector.shape_cast %10 : vector<8x1x128xf32> to vector<8x128xf32>
    %c0_15 = arith.constant 0 : index
    %c1_16 = arith.constant 1 : index
    %c0_17 = arith.constant 0 : index
    %12 = vector.load %arg2[%c0_15, %c1_16, %c0_17] : memref<8x3x128xf32, #tpu.memory_space<vmem>>, vector<8x1x128xf32>
    %13 = vector.shape_cast %12 : vector<8x1x128xf32> to vector<8x128xf32>
    %c0_18 = arith.constant 0 : index
    %c2_19 = arith.constant 2 : index
    %c0_20 = arith.constant 0 : index
    %14 = vector.load %arg2[%c0_18, %c2_19, %c0_20] : memref<8x3x128xf32, #tpu.memory_space<vmem>>, vector<8x1x128xf32>
    %15 = vector.shape_cast %14 : vector<8x1x128xf32> to vector<8x128xf32>
    %c0_21 = arith.constant 0 : index
    %c0_22 = arith.constant 0 : index
    %c0_23 = arith.constant 0 : index
    %16 = vector.load %arg3[%c0_21, %c0_22, %c0_23] : memref<8x3x128xf32, #tpu.memory_space<vmem>>, vector<8x1x128xf32>
    %17 = vector.shape_cast %16 : vector<8x1x128xf32> to vector<8x128xf32>
    %c0_24 = arith.constant 0 : index
    %c1_25 = arith.constant 1 : index
    %c0_26 = arith.constant 0 : index
    %18 = vector.load %arg3[%c0_24, %c1_25, %c0_26] : memref<8x3x128xf32, #tpu.memory_space<vmem>>, vector<8x1x128xf32>
    %19 = vector.shape_cast %18 : vector<8x1x128xf32> to vector<8x128xf32>
    %c0_27 = arith.constant 0 : index
    %c2_28 = arith.constant 2 : index
    %c0_29 = arith.constant 0 : index
    %20 = vector.load %arg3[%c0_27, %c2_28, %c0_29] : memref<8x3x128xf32, #tpu.memory_space<vmem>>, vector<8x1x128xf32>
    %21 = vector.shape_cast %20 : vector<8x1x128xf32> to vector<8x128xf32>
    %22 = vector.broadcast %3 : vector<8x1xf32> to vector<8x128xf32>
    %23 = arith.subf %11, %22 : vector<8x128xf32>
    %24 = vector.broadcast %4 : vector<8x1xf32> to vector<8x128xf32>
    %25 = arith.subf %13, %24 : vector<8x128xf32>
    %26 = vector.broadcast %5 : vector<8x1xf32> to vector<8x128xf32>
    %27 = arith.subf %15, %26 : vector<8x128xf32>
    %28 = vector.broadcast %6 : vector<8x1xf32> to vector<8x128xf32>
    %29 = arith.subf %17, %28 : vector<8x128xf32>
    %30 = vector.broadcast %7 : vector<8x1xf32> to vector<8x128xf32>
    %31 = arith.subf %19, %30 : vector<8x128xf32>
    %32 = vector.broadcast %8 : vector<8x1xf32> to vector<8x128xf32>
    %33 = arith.subf %21, %32 : vector<8x128xf32>
    %34 = arith.mulf %9, %23 : vector<8x128xf32>
    %35 = arith.mulf %9, %25 : vector<8x128xf32>
    %36 = arith.mulf %9, %27 : vector<8x128xf32>
    %37 = arith.mulf %34, %29 : vector<8x128xf32>
    %c0_30 = arith.constant 0 : index
    %c0_31 = arith.constant 0 : index
    %38 = vector.load %arg8[%c0_30, %c0_31] : memref<176x128xf32, #tpu.memory_space<vmem>>, vector<8x128xf32>
    %39 = arith.addf %38, %37 : vector<8x128xf32>
    %c0_32 = arith.constant 0 : index
    %c0_33 = arith.constant 0 : index
    %40 = vector.load %arg8[%c0_32, %c0_33] : memref<176x128xf32, #tpu.memory_space<vmem>>, vector<8x128xf32>
    tpu.vector_store %arg8[%c0_32, %c0_33], %39 {strides = array<i32>} : memref<176x128xf32, #tpu.memory_space<vmem>>, vector<8x128xf32>,
    %41 = arith.mulf %34, %31 : vector<8x128xf32>
    %c8 = arith.constant 8 : index
    %c0_34 = arith.constant 0 : index
    %42 = vector.load %arg8[%c8, %c0_34] : memref<176x128xf32, #tpu.memory_space<vmem>>, vector<8x128xf32>
    %43 = arith.addf %42, %41 : vector<8x128xf32>
    %c8_35 = arith.constant 8 : index
    %c0_36 = arith.constant 0 : index
    %44 = vector.load %arg8[%c8_35, %c0_36] : memref<176x128xf32, #tpu.memory_space<vmem>>, vector<8x128xf32>
    tpu.vector_store %arg8[%c8_35, %c0_36], %43 {strides = array<i32>} : memref<176x128xf32, #tpu.memory_space<vmem>>, vector<8x128xf32>,
    %45 = arith.mulf %34, %33 : vector<8x128xf32>
    %c16 = arith.constant 16 : index
    %c0_37 = arith.constant 0 : index
    %46 = vector.load %arg8[%c16, %c0_37] : memref<176x128xf32, #tpu.memory_space<vmem>>, vector<8x128xf32>
    %47 = arith.addf %46, %45 : vector<8x128xf32>
    %c16_38 = arith.constant 16 : index
    %c0_39 = arith.constant 0 : index
    %48 = vector.load %arg8[%c16_38, %c0_39] : memref<176x128xf32, #tpu.memory_space<vmem>>, vector<8x128xf32>
    tpu.vector_store %arg8[%c16_38, %c0_39], %47 {strides = array<i32>} : memref<176x128xf32, #tpu.memory_space<vmem>>, vector<8x128xf32>,
    %49 = arith.mulf %35, %29 : vector<8x128xf32>
    %c24 = arith.constant 24 : index
    %c0_40 = arith.constant 0 : index
    %50 = vector.load %arg8[%c24, %c0_40] : memref<176x128xf32, #tpu.memory_space<vmem>>, vector<8x128xf32>
    %51 = arith.addf %50, %49 : vector<8x128xf32>
    %c24_41 = arith.constant 24 : index
    %c0_42 = arith.constant 0 : index
    %52 = vector.load %arg8[%c24_41, %c0_42] : memref<176x128xf32, #tpu.memory_space<vmem>>, vector<8x128xf32>
    tpu.vector_store %arg8[%c24_41, %c0_42], %51 {strides = array<i32>} : memref<176x128xf32, #tpu.memory_space<vmem>>, vector<8x128xf32>,
    %53 = arith.mulf %35, %31 : vector<8x128xf32>
    %c32 = arith.constant 32 : index
    %c0_43 = arith.constant 0 : index
    %54 = vector.load %arg8[%c32, %c0_43] : memref<176x128xf32, #tpu.memory_space<vmem>>, vector<8x128xf32>
    %55 = arith.addf %54, %53 : vector<8x128xf32>
    %c32_44 = arith.constant 32 : index
    %c0_45 = arith.constant 0 : index
    %56 = vector.load %arg8[%c32_44, %c0_45] : memref<176x128xf32, #tpu.memory_space<vmem>>, vector<8x128xf32>
    tpu.vector_store %arg8[%c32_44, %c0_45], %55 {strides = array<i32>} : memref<176x128xf32, #tpu.memory_space<vmem>>, vector<8x128xf32>,
    %57 = arith.mulf %35, %33 : vector<8x128xf32>
    %c40 = arith.constant 40 : index
    %c0_46 = arith.constant 0 : index
    %58 = vector.load %arg8[%c40, %c0_46] : memref<176x128xf32, #tpu.memory_space<vmem>>, vector<8x128xf32>
    %59 = arith.addf %58, %57 : vector<8x128xf32>
    %c40_47 = arith.constant 40 : index
    %c0_48 = arith.constant 0 : index
    %60 = vector.load %arg8[%c40_47, %c0_48] : memref<176x128xf32, #tpu.memory_space<vmem>>, vector<8x128xf32>
    tpu.vector_store %arg8[%c40_47, %c0_48], %59 {strides = array<i32>} : memref<176x128xf32, #tpu.memory_space<vmem>>, vector<8x128xf32>,
    %61 = arith.mulf %36, %29 : vector<8x128xf32>
    %c48 = arith.constant 48 : index
    %c0_49 = arith.constant 0 : index
    %62 = vector.load %arg8[%c48, %c0_49] : memref<176x128xf32, #tpu.memory_space<vmem>>, vector<8x128xf32>
    %63 = arith.addf %62, %61 : vector<8x128xf32>
    %c48_50 = arith.constant 48 : index
    %c0_51 = arith.constant 0 : index
    %64 = vector.load %arg8[%c48_50, %c0_51] : memref<176x128xf32, #tpu.memory_space<vmem>>, vector<8x128xf32>
    tpu.vector_store %arg8[%c48_50, %c0_51], %63 {strides = array<i32>} : memref<176x128xf32, #tpu.memory_space<vmem>>, vector<8x128xf32>,
    %65 = arith.mulf %36, %31 : vector<8x128xf32>
    %c56 = arith.constant 56 : index
    %c0_52 = arith.constant 0 : index
    %66 = vector.load %arg8[%c56, %c0_52] : memref<176x128xf32, #tpu.memory_space<vmem>>, vector<8x128xf32>
    %67 = arith.addf %66, %65 : vector<8x128xf32>
    %c56_53 = arith.constant 56 : index
    %c0_54 = arith.constant 0 : index
    %68 = vector.load %arg8[%c56_53, %c0_54] : memref<176x128xf32, #tpu.memory_space<vmem>>, vector<8x128xf32>
    tpu.vector_store %arg8[%c56_53, %c0_54], %67 {strides = array<i32>} : memref<176x128xf32, #tpu.memory_space<vmem>>, vector<8x128xf32>,
    %69 = arith.mulf %36, %33 : vector<8x128xf32>
    %c64 = arith.constant 64 : index
    %c0_55 = arith.constant 0 : index
    %70 = vector.load %arg8[%c64, %c0_55] : memref<176x128xf32, #tpu.memory_space<vmem>>, vector<8x128xf32>
    %71 = arith.addf %70, %69 : vector<8x128xf32>
    %c64_56 = arith.constant 64 : index
    %c0_57 = arith.constant 0 : index
    %72 = vector.load %arg8[%c64_56, %c0_57] : memref<176x128xf32, #tpu.memory_space<vmem>>, vector<8x128xf32>
    tpu.vector_store %arg8[%c64_56, %c0_57], %71 {strides = array<i32>} : memref<176x128xf32, #tpu.memory_space<vmem>>, vector<8x128xf32>,
    %c72 = arith.constant 72 : index
    %c0_58 = arith.constant 0 : index
    %73 = vector.load %arg8[%c72, %c0_58] : memref<176x128xf32, #tpu.memory_space<vmem>>, vector<8x128xf32>
    %74 = arith.addf %73, %34 : vector<8x128xf32>
    %c72_59 = arith.constant 72 : index
    %c0_60 = arith.constant 0 : index
    %75 = vector.load %arg8[%c72_59, %c0_60] : memref<176x128xf32, #tpu.memory_space<vmem>>, vector<8x128xf32>
    tpu.vector_store %arg8[%c72_59, %c0_60], %74 {strides = array<i32>} : memref<176x128xf32, #tpu.memory_space<vmem>>, vector<8x128xf32>,
    %c80 = arith.constant 80 : index
    %c0_61 = arith.constant 0 : index
    %76 = vector.load %arg8[%c80, %c0_61] : memref<176x128xf32, #tpu.memory_space<vmem>>, vector<8x128xf32>
    %77 = arith.addf %76, %35 : vector<8x128xf32>
    %c80_62 = arith.constant 80 : index
    %c0_63 = arith.constant 0 : index
    %78 = vector.load %arg8[%c80_62, %c0_63] : memref<176x128xf32, #tpu.memory_space<vmem>>, vector<8x128xf32>
    tpu.vector_store %arg8[%c80_62, %c0_63], %77 {strides = array<i32>} : memref<176x128xf32, #tpu.memory_space<vmem>>, vector<8x128xf32>,
    %c88 = arith.constant 88 : index
    %c0_64 = arith.constant 0 : index
    %79 = vector.load %arg8[%c88, %c0_64] : memref<176x128xf32, #tpu.memory_space<vmem>>, vector<8x128xf32>
    %80 = arith.addf %79, %36 : vector<8x128xf32>
    %c88_65 = arith.constant 88 : index
    %c0_66 = arith.constant 0 : index
    %81 = vector.load %arg8[%c88_65, %c0_66] : memref<176x128xf32, #tpu.memory_space<vmem>>, vector<8x128xf32>
    tpu.vector_store %arg8[%c88_65, %c0_66], %80 {strides = array<i32>} : memref<176x128xf32, #tpu.memory_space<vmem>>, vector<8x128xf32>,
    %82 = arith.mulf %9, %29 : vector<8x128xf32>
    %c96 = arith.constant 96 : index
    %c0_67 = arith.constant 0 : index
    %83 = vector.load %arg8[%c96, %c0_67] : memref<176x128xf32, #tpu.memory_space<vmem>>, vector<8x128xf32>
    %84 = arith.addf %83, %82 : vector<8x128xf32>
    %c96_68 = arith.constant 96 : index
    %c0_69 = arith.constant 0 : index
    %85 = vector.load %arg8[%c96_68, %c0_69] : memref<176x128xf32, #tpu.memory_space<vmem>>, vector<8x128xf32>
    tpu.vector_store %arg8[%c96_68, %c0_69], %84 {strides = array<i32>} : memref<176x128xf32, #tpu.memory_space<vmem>>, vector<8x128xf32>,
    %86 = arith.mulf %9, %31 : vector<8x128xf32>
    %c104 = arith.constant 104 : index
    %c0_70 = arith.constant 0 : index
    %87 = vector.load %arg8[%c104, %c0_70] : memref<176x128xf32, #tpu.memory_space<vmem>>, vector<8x128xf32>
    %88 = arith.addf %87, %86 : vector<8x128xf32>
    %c104_71 = arith.constant 104 : index
    %c0_72 = arith.constant 0 : index
    %89 = vector.load %arg8[%c104_71, %c0_72] : memref<176x128xf32, #tpu.memory_space<vmem>>, vector<8x128xf32>
    tpu.vector_store %arg8[%c104_71, %c0_72], %88 {strides = array<i32>} : memref<176x128xf32, #tpu.memory_space<vmem>>, vector<8x128xf32>,
    %90 = arith.mulf %9, %33 : vector<8x128xf32>
    %c112 = arith.constant 112 : index
    %c0_73 = arith.constant 0 : index
    %91 = vector.load %arg8[%c112, %c0_73] : memref<176x128xf32, #tpu.memory_space<vmem>>, vector<8x128xf32>
    %92 = arith.addf %91, %90 : vector<8x128xf32>
    %c112_74 = arith.constant 112 : index
    %c0_75 = arith.constant 0 : index
    %93 = vector.load %arg8[%c112_74, %c0_75] : memref<176x128xf32, #tpu.memory_space<vmem>>, vector<8x128xf32>
    tpu.vector_store %arg8[%c112_74, %c0_75], %92 {strides = array<i32>} : memref<176x128xf32, #tpu.memory_space<vmem>>, vector<8x128xf32>,
    %c120 = arith.constant 120 : index
    %c0_76 = arith.constant 0 : index
    %94 = vector.load %arg8[%c120, %c0_76] : memref<176x128xf32, #tpu.memory_space<vmem>>, vector<8x128xf32>
    %95 = arith.addf %94, %23 : vector<8x128xf32>
    %c120_77 = arith.constant 120 : index
    %c0_78 = arith.constant 0 : index
    %96 = vector.load %arg8[%c120_77, %c0_78] : memref<176x128xf32, #tpu.memory_space<vmem>>, vector<8x128xf32>
    tpu.vector_store %arg8[%c120_77, %c0_78], %95 {strides = array<i32>} : memref<176x128xf32, #tpu.memory_space<vmem>>, vector<8x128xf32>,
    %c128 = arith.constant 128 : index
    %c0_79 = arith.constant 0 : index
    %97 = vector.load %arg8[%c128, %c0_79] : memref<176x128xf32, #tpu.memory_space<vmem>>, vector<8x128xf32>
    %98 = arith.addf %97, %25 : vector<8x128xf32>
    %c128_80 = arith.constant 128 : index
    %c0_81 = arith.constant 0 : index
    %99 = vector.load %arg8[%c128_80, %c0_81] : memref<176x128xf32, #tpu.memory_space<vmem>>, vector<8x128xf32>
    tpu.vector_store %arg8[%c128_80, %c0_81], %98 {strides = array<i32>} : memref<176x128xf32, #tpu.memory_space<vmem>>, vector<8x128xf32>,
    %c136 = arith.constant 136 : index
    %c0_82 = arith.constant 0 : index
    %100 = vector.load %arg8[%c136, %c0_82] : memref<176x128xf32, #tpu.memory_space<vmem>>, vector<8x128xf32>
    %101 = arith.addf %100, %27 : vector<8x128xf32>
    %c136_83 = arith.constant 136 : index
    %c0_84 = arith.constant 0 : index
    %102 = vector.load %arg8[%c136_83, %c0_84] : memref<176x128xf32, #tpu.memory_space<vmem>>, vector<8x128xf32>
    tpu.vector_store %arg8[%c136_83, %c0_84], %101 {strides = array<i32>} : memref<176x128xf32, #tpu.memory_space<vmem>>, vector<8x128xf32>,
    %c144 = arith.constant 144 : index
    %c0_85 = arith.constant 0 : index
    %103 = vector.load %arg8[%c144, %c0_85] : memref<176x128xf32, #tpu.memory_space<vmem>>, vector<8x128xf32>
    %104 = arith.addf %103, %29 : vector<8x128xf32>
    %c144_86 = arith.constant 144 : index
    %c0_87 = arith.constant 0 : index
    %105 = vector.load %arg8[%c144_86, %c0_87] : memref<176x128xf32, #tpu.memory_space<vmem>>, vector<8x128xf32>
    tpu.vector_store %arg8[%c144_86, %c0_87], %104 {strides = array<i32>} : memref<176x128xf32, #tpu.memory_space<vmem>>, vector<8x128xf32>,
    %c152 = arith.constant 152 : index
    %c0_88 = arith.constant 0 : index
    %106 = vector.load %arg8[%c152, %c0_88] : memref<176x128xf32, #tpu.memory_space<vmem>>, vector<8x128xf32>
    %107 = arith.addf %106, %31 : vector<8x128xf32>
    %c152_89 = arith.constant 152 : index
    %c0_90 = arith.constant 0 : index
    %108 = vector.load %arg8[%c152_89, %c0_90] : memref<176x128xf32, #tpu.memory_space<vmem>>, vector<8x128xf32>
    tpu.vector_store %arg8[%c152_89, %c0_90], %107 {strides = array<i32>} : memref<176x128xf32, #tpu.memory_space<vmem>>, vector<8x128xf32>,
    %c160 = arith.constant 160 : index
    %c0_91 = arith.constant 0 : index
    %109 = vector.load %arg8[%c160, %c0_91] : memref<176x128xf32, #tpu.memory_space<vmem>>, vector<8x128xf32>
    %110 = arith.addf %109, %33 : vector<8x128xf32>
    %c160_92 = arith.constant 160 : index
    %c0_93 = arith.constant 0 : index
    %111 = vector.load %arg8[%c160_92, %c0_93] : memref<176x128xf32, #tpu.memory_space<vmem>>, vector<8x128xf32>
    tpu.vector_store %arg8[%c160_92, %c0_93], %110 {strides = array<i32>} : memref<176x128xf32, #tpu.memory_space<vmem>>, vector<8x128xf32>,
    %c168 = arith.constant 168 : index
    %c0_94 = arith.constant 0 : index
    %112 = vector.load %arg8[%c168, %c0_94] : memref<176x128xf32, #tpu.memory_space<vmem>>, vector<8x128xf32>
    %113 = arith.addf %112, %9 : vector<8x128xf32>
    %c168_95 = arith.constant 168 : index
    %c0_96 = arith.constant 0 : index
    %114 = vector.load %arg8[%c168_95, %c0_96] : memref<176x128xf32, #tpu.memory_space<vmem>>, vector<8x128xf32>
    tpu.vector_store %arg8[%c168_95, %c0_96], %113 {strides = array<i32>} : memref<176x128xf32, #tpu.memory_space<vmem>>, vector<8x128xf32>,
    %c0_i32_97 = arith.constant 0 : i32
    %115 = arith.cmpi eq, %arg1, %c0_i32_97 : i32
    %116 = arith.extui %115 : i1 to i32
    %c0_i32_98 = arith.constant 0 : i32
    %117 = arith.cmpi ne, %116, %c0_i32_98 : i32
    scf.if %117 {
      %118 = tpu.iota {dimensions = array<i32: 1>} : vector<8x128xi32>
      %cst = arith.constant 0.000000e+00 : f32
      %119 = vector.broadcast %cst : f32 to vector<8x128xf32>
      %c0_99 = arith.constant 0 : index
      %c0_100 = arith.constant 0 : index
      %120 = vector.load %arg8[%c0_99, %c0_100] : memref<176x128xf32, #tpu.memory_space<vmem>>, vector<8x128xf32>
      %cst_101 = arith.constant dense<0.000000e+00> : vector<8xf32>
      %121 = vector.multi_reduction <add>, %120, %cst_101 [1] : vector<8x128xf32> to vector<8xf32>
      %122 = vector.shape_cast %121 : vector<8xf32> to vector<8x1xf32>
      %c0_i32_102 = arith.constant 0 : i32
      %123 = vector.broadcast %c0_i32_102 : i32 to vector<8x128xi32>
      %124 = arith.cmpi eq, %118, %123 : vector<8x128xi32>
      %cst_103 = arith.constant 0.000000e+00 : f32
      %125 = vector.shape_cast %122 : vector<8x1xf32> to vector<8x1xf32>
      %126 = vector.broadcast %125 : vector<8x1xf32> to vector<8x128xf32>
      %127 = vector.broadcast %cst_103 : f32 to vector<8x128xf32>
      %128 = arith.select %124, %126, %127 : vector<8x128xi1>, vector<8x128xf32>
      %129 = arith.addf %119, %128 : vector<8x128xf32>
      %c8_104 = arith.constant 8 : index
      %c0_105 = arith.constant 0 : index
      %130 = vector.load %arg8[%c8_104, %c0_105] : memref<176x128xf32, #tpu.memory_space<vmem>>, vector<8x128xf32>
      %cst_106 = arith.constant dense<0.000000e+00> : vector<8xf32>
      %131 = vector.multi_reduction <add>, %130, %cst_106 [1] : vector<8x128xf32> to vector<8xf32>
      %132 = vector.shape_cast %131 : vector<8xf32> to vector<8x1xf32>
      %c1_i32 = arith.constant 1 : i32
      %133 = vector.broadcast %c1_i32 : i32 to vector<8x128xi32>
      %134 = arith.cmpi eq, %118, %133 : vector<8x128xi32>
      %cst_107 = arith.constant 0.000000e+00 : f32
      %135 = vector.shape_cast %132 : vector<8x1xf32> to vector<8x1xf32>
      %136 = vector.broadcast %135 : vector<8x1xf32> to vector<8x128xf32>
      %137 = vector.broadcast %cst_107 : f32 to vector<8x128xf32>
      %138 = arith.select %134, %136, %137 : vector<8x128xi1>, vector<8x128xf32>
      %139 = arith.addf %129, %138 : vector<8x128xf32>
      %c16_108 = arith.constant 16 : index
      %c0_109 = arith.constant 0 : index
      %140 = vector.load %arg8[%c16_108, %c0_109] : memref<176x128xf32, #tpu.memory_space<vmem>>, vector<8x128xf32>
      %cst_110 = arith.constant dense<0.000000e+00> : vector<8xf32>
      %141 = vector.multi_reduction <add>, %140, %cst_110 [1] : vector<8x128xf32> to vector<8xf32>
      %142 = vector.shape_cast %141 : vector<8xf32> to vector<8x1xf32>
      %c2_i32 = arith.constant 2 : i32
      %143 = vector.broadcast %c2_i32 : i32 to vector<8x128xi32>
      %144 = arith.cmpi eq, %118, %143 : vector<8x128xi32>
      %cst_111 = arith.constant 0.000000e+00 : f32
      %145 = vector.shape_cast %142 : vector<8x1xf32> to vector<8x1xf32>
      %146 = vector.broadcast %145 : vector<8x1xf32> to vector<8x128xf32>
      %147 = vector.broadcast %cst_111 : f32 to vector<8x128xf32>
      %148 = arith.select %144, %146, %147 : vector<8x128xi1>, vector<8x128xf32>
      %149 = arith.addf %139, %148 : vector<8x128xf32>
      %c24_112 = arith.constant 24 : index
      %c0_113 = arith.constant 0 : index
      %150 = vector.load %arg8[%c24_112, %c0_113] : memref<176x128xf32, #tpu.memory_space<vmem>>, vector<8x128xf32>
      %cst_114 = arith.constant dense<0.000000e+00> : vector<8xf32>
      %151 = vector.multi_reduction <add>, %150, %cst_114 [1] : vector<8x128xf32> to vector<8xf32>
      %152 = vector.shape_cast %151 : vector<8xf32> to vector<8x1xf32>
      %c3_i32 = arith.constant 3 : i32
      %153 = vector.broadcast %c3_i32 : i32 to vector<8x128xi32>
      %154 = arith.cmpi eq, %118, %153 : vector<8x128xi32>
      %cst_115 = arith.constant 0.000000e+00 : f32
      %155 = vector.shape_cast %152 : vector<8x1xf32> to vector<8x1xf32>
      %156 = vector.broadcast %155 : vector<8x1xf32> to vector<8x128xf32>
      %157 = vector.broadcast %cst_115 : f32 to vector<8x128xf32>
      %158 = arith.select %154, %156, %157 : vector<8x128xi1>, vector<8x128xf32>
      %159 = arith.addf %149, %158 : vector<8x128xf32>
      %c32_116 = arith.constant 32 : index
      %c0_117 = arith.constant 0 : index
      %160 = vector.load %arg8[%c32_116, %c0_117] : memref<176x128xf32, #tpu.memory_space<vmem>>, vector<8x128xf32>
      %cst_118 = arith.constant dense<0.000000e+00> : vector<8xf32>
      %161 = vector.multi_reduction <add>, %160, %cst_118 [1] : vector<8x128xf32> to vector<8xf32>
      %162 = vector.shape_cast %161 : vector<8xf32> to vector<8x1xf32>
      %c4_i32 = arith.constant 4 : i32
      %163 = vector.broadcast %c4_i32 : i32 to vector<8x128xi32>
      %164 = arith.cmpi eq, %118, %163 : vector<8x128xi32>
      %cst_119 = arith.constant 0.000000e+00 : f32
      %165 = vector.shape_cast %162 : vector<8x1xf32> to vector<8x1xf32>
      %166 = vector.broadcast %165 : vector<8x1xf32> to vector<8x128xf32>
      %167 = vector.broadcast %cst_119 : f32 to vector<8x128xf32>
      %168 = arith.select %164, %166, %167 : vector<8x128xi1>, vector<8x128xf32>
      %169 = arith.addf %159, %168 : vector<8x128xf32>
      %c40_120 = arith.constant 40 : index
      %c0_121 = arith.constant 0 : index
      %170 = vector.load %arg8[%c40_120, %c0_121] : memref<176x128xf32, #tpu.memory_space<vmem>>, vector<8x128xf32>
      %cst_122 = arith.constant dense<0.000000e+00> : vector<8xf32>
      %171 = vector.multi_reduction <add>, %170, %cst_122 [1] : vector<8x128xf32> to vector<8xf32>
      %172 = vector.shape_cast %171 : vector<8xf32> to vector<8x1xf32>
      %c5_i32 = arith.constant 5 : i32
      %173 = vector.broadcast %c5_i32 : i32 to vector<8x128xi32>
      %174 = arith.cmpi eq, %118, %173 : vector<8x128xi32>
      %cst_123 = arith.constant 0.000000e+00 : f32
      %175 = vector.shape_cast %172 : vector<8x1xf32> to vector<8x1xf32>
      %176 = vector.broadcast %175 : vector<8x1xf32> to vector<8x128xf32>
      %177 = vector.broadcast %cst_123 : f32 to vector<8x128xf32>
      %178 = arith.select %174, %176, %177 : vector<8x128xi1>, vector<8x128xf32>
      %179 = arith.addf %169, %178 : vector<8x128xf32>
      %c48_124 = arith.constant 48 : index
      %c0_125 = arith.constant 0 : index
      %180 = vector.load %arg8[%c48_124, %c0_125] : memref<176x128xf32, #tpu.memory_space<vmem>>, vector<8x128xf32>
      %cst_126 = arith.constant dense<0.000000e+00> : vector<8xf32>
      %181 = vector.multi_reduction <add>, %180, %cst_126 [1] : vector<8x128xf32> to vector<8xf32>
      %182 = vector.shape_cast %181 : vector<8xf32> to vector<8x1xf32>
      %c6_i32 = arith.constant 6 : i32
      %183 = vector.broadcast %c6_i32 : i32 to vector<8x128xi32>
      %184 = arith.cmpi eq, %118, %183 : vector<8x128xi32>
      %cst_127 = arith.constant 0.000000e+00 : f32
      %185 = vector.shape_cast %182 : vector<8x1xf32> to vector<8x1xf32>
      %186 = vector.broadcast %185 : vector<8x1xf32> to vector<8x128xf32>
      %187 = vector.broadcast %cst_127 : f32 to vector<8x128xf32>
      %188 = arith.select %184, %186, %187 : vector<8x128xi1>, vector<8x128xf32>
      %189 = arith.addf %179, %188 : vector<8x128xf32>
      %c56_128 = arith.constant 56 : index
      %c0_129 = arith.constant 0 : index
      %190 = vector.load %arg8[%c56_128, %c0_129] : memref<176x128xf32, #tpu.memory_space<vmem>>, vector<8x128xf32>
      %cst_130 = arith.constant dense<0.000000e+00> : vector<8xf32>
      %191 = vector.multi_reduction <add>, %190, %cst_130 [1] : vector<8x128xf32> to vector<8xf32>
      %192 = vector.shape_cast %191 : vector<8xf32> to vector<8x1xf32>
      %c7_i32 = arith.constant 7 : i32
      %193 = vector.broadcast %c7_i32 : i32 to vector<8x128xi32>
      %194 = arith.cmpi eq, %118, %193 : vector<8x128xi32>
      %cst_131 = arith.constant 0.000000e+00 : f32
      %195 = vector.shape_cast %192 : vector<8x1xf32> to vector<8x1xf32>
      %196 = vector.broadcast %195 : vector<8x1xf32> to vector<8x128xf32>
      %197 = vector.broadcast %cst_131 : f32 to vector<8x128xf32>
      %198 = arith.select %194, %196, %197 : vector<8x128xi1>, vector<8x128xf32>
      %199 = arith.addf %189, %198 : vector<8x128xf32>
      %c64_132 = arith.constant 64 : index
      %c0_133 = arith.constant 0 : index
      %200 = vector.load %arg8[%c64_132, %c0_133] : memref<176x128xf32, #tpu.memory_space<vmem>>, vector<8x128xf32>
      %cst_134 = arith.constant dense<0.000000e+00> : vector<8xf32>
      %201 = vector.multi_reduction <add>, %200, %cst_134 [1] : vector<8x128xf32> to vector<8xf32>
      %202 = vector.shape_cast %201 : vector<8xf32> to vector<8x1xf32>
      %c8_i32 = arith.constant 8 : i32
      %203 = vector.broadcast %c8_i32 : i32 to vector<8x128xi32>
      %204 = arith.cmpi eq, %118, %203 : vector<8x128xi32>
      %cst_135 = arith.constant 0.000000e+00 : f32
      %205 = vector.shape_cast %202 : vector<8x1xf32> to vector<8x1xf32>
      %206 = vector.broadcast %205 : vector<8x1xf32> to vector<8x128xf32>
      %207 = vector.broadcast %cst_135 : f32 to vector<8x128xf32>
      %208 = arith.select %204, %206, %207 : vector<8x128xi1>, vector<8x128xf32>
      %209 = arith.addf %199, %208 : vector<8x128xf32>
      %c72_136 = arith.constant 72 : index
      %c0_137 = arith.constant 0 : index
      %210 = vector.load %arg8[%c72_136, %c0_137] : memref<176x128xf32, #tpu.memory_space<vmem>>, vector<8x128xf32>
      %cst_138 = arith.constant dense<0.000000e+00> : vector<8xf32>
      %211 = vector.multi_reduction <add>, %210, %cst_138 [1] : vector<8x128xf32> to vector<8xf32>
      %212 = vector.shape_cast %211 : vector<8xf32> to vector<8x1xf32>
      %c9_i32 = arith.constant 9 : i32
      %213 = vector.broadcast %c9_i32 : i32 to vector<8x128xi32>
      %214 = arith.cmpi eq, %118, %213 : vector<8x128xi32>
      %cst_139 = arith.constant 0.000000e+00 : f32
      %215 = vector.shape_cast %212 : vector<8x1xf32> to vector<8x1xf32>
      %216 = vector.broadcast %215 : vector<8x1xf32> to vector<8x128xf32>
      %217 = vector.broadcast %cst_139 : f32 to vector<8x128xf32>
      %218 = arith.select %214, %216, %217 : vector<8x128xi1>, vector<8x128xf32>
      %219 = arith.addf %209, %218 : vector<8x128xf32>
      %c80_140 = arith.constant 80 : index
      %c0_141 = arith.constant 0 : index
      %220 = vector.load %arg8[%c80_140, %c0_141] : memref<176x128xf32, #tpu.memory_space<vmem>>, vector<8x128xf32>
      %cst_142 = arith.constant dense<0.000000e+00> : vector<8xf32>
      %221 = vector.multi_reduction <add>, %220, %cst_142 [1] : vector<8x128xf32> to vector<8xf32>
      %222 = vector.shape_cast %221 : vector<8xf32> to vector<8x1xf32>
      %c10_i32 = arith.constant 10 : i32
      %223 = vector.broadcast %c10_i32 : i32 to vector<8x128xi32>
      %224 = arith.cmpi eq, %118, %223 : vector<8x128xi32>
      %cst_143 = arith.constant 0.000000e+00 : f32
      %225 = vector.shape_cast %222 : vector<8x1xf32> to vector<8x1xf32>
      %226 = vector.broadcast %225 : vector<8x1xf32> to vector<8x128xf32>
      %227 = vector.broadcast %cst_143 : f32 to vector<8x128xf32>
      %228 = arith.select %224, %226, %227 : vector<8x128xi1>, vector<8x128xf32>
      %229 = arith.addf %219, %228 : vector<8x128xf32>
      %c88_144 = arith.constant 88 : index
      %c0_145 = arith.constant 0 : index
      %230 = vector.load %arg8[%c88_144, %c0_145] : memref<176x128xf32, #tpu.memory_space<vmem>>, vector<8x128xf32>
      %cst_146 = arith.constant dense<0.000000e+00> : vector<8xf32>
      %231 = vector.multi_reduction <add>, %230, %cst_146 [1] : vector<8x128xf32> to vector<8xf32>
      %232 = vector.shape_cast %231 : vector<8xf32> to vector<8x1xf32>
      %c11_i32 = arith.constant 11 : i32
      %233 = vector.broadcast %c11_i32 : i32 to vector<8x128xi32>
      %234 = arith.cmpi eq, %118, %233 : vector<8x128xi32>
      %cst_147 = arith.constant 0.000000e+00 : f32
      %235 = vector.shape_cast %232 : vector<8x1xf32> to vector<8x1xf32>
      %236 = vector.broadcast %235 : vector<8x1xf32> to vector<8x128xf32>
      %237 = vector.broadcast %cst_147 : f32 to vector<8x128xf32>
      %238 = arith.select %234, %236, %237 : vector<8x128xi1>, vector<8x128xf32>
      %239 = arith.addf %229, %238 : vector<8x128xf32>
      %c96_148 = arith.constant 96 : index
      %c0_149 = arith.constant 0 : index
      %240 = vector.load %arg8[%c96_148, %c0_149] : memref<176x128xf32, #tpu.memory_space<vmem>>, vector<8x128xf32>
      %cst_150 = arith.constant dense<0.000000e+00> : vector<8xf32>
      %241 = vector.multi_reduction <add>, %240, %cst_150 [1] : vector<8x128xf32> to vector<8xf32>
      %242 = vector.shape_cast %241 : vector<8xf32> to vector<8x1xf32>
      %c12_i32 = arith.constant 12 : i32
      %243 = vector.broadcast %c12_i32 : i32 to vector<8x128xi32>
      %244 = arith.cmpi eq, %118, %243 : vector<8x128xi32>
      %cst_151 = arith.constant 0.000000e+00 : f32
      %245 = vector.shape_cast %242 : vector<8x1xf32> to vector<8x1xf32>
      %246 = vector.broadcast %245 : vector<8x1xf32> to vector<8x128xf32>
      %247 = vector.broadcast %cst_151 : f32 to vector<8x128xf32>
      %248 = arith.select %244, %246, %247 : vector<8x128xi1>, vector<8x128xf32>
      %249 = arith.addf %239, %248 : vector<8x128xf32>
      %c104_152 = arith.constant 104 : index
      %c0_153 = arith.constant 0 : index
      %250 = vector.load %arg8[%c104_152, %c0_153] : memref<176x128xf32, #tpu.memory_space<vmem>>, vector<8x128xf32>
      %cst_154 = arith.constant dense<0.000000e+00> : vector<8xf32>
      %251 = vector.multi_reduction <add>, %250, %cst_154 [1] : vector<8x128xf32> to vector<8xf32>
      %252 = vector.shape_cast %251 : vector<8xf32> to vector<8x1xf32>
      %c13_i32 = arith.constant 13 : i32
      %253 = vector.broadcast %c13_i32 : i32 to vector<8x128xi32>
      %254 = arith.cmpi eq, %118, %253 : vector<8x128xi32>
      %cst_155 = arith.constant 0.000000e+00 : f32
      %255 = vector.shape_cast %252 : vector<8x1xf32> to vector<8x1xf32>
      %256 = vector.broadcast %255 : vector<8x1xf32> to vector<8x128xf32>
      %257 = vector.broadcast %cst_155 : f32 to vector<8x128xf32>
      %258 = arith.select %254, %256, %257 : vector<8x128xi1>, vector<8x128xf32>
      %259 = arith.addf %249, %258 : vector<8x128xf32>
      %c112_156 = arith.constant 112 : index
      %c0_157 = arith.constant 0 : index
      %260 = vector.load %arg8[%c112_156, %c0_157] : memref<176x128xf32, #tpu.memory_space<vmem>>, vector<8x128xf32>
      %cst_158 = arith.constant dense<0.000000e+00> : vector<8xf32>
      %261 = vector.multi_reduction <add>, %260, %cst_158 [1] : vector<8x128xf32> to vector<8xf32>
      %262 = vector.shape_cast %261 : vector<8xf32> to vector<8x1xf32>
      %c14_i32 = arith.constant 14 : i32
      %263 = vector.broadcast %c14_i32 : i32 to vector<8x128xi32>
      %264 = arith.cmpi eq, %118, %263 : vector<8x128xi32>
      %cst_159 = arith.constant 0.000000e+00 : f32
      %265 = vector.shape_cast %262 : vector<8x1xf32> to vector<8x1xf32>
      %266 = vector.broadcast %265 : vector<8x1xf32> to vector<8x128xf32>
      %267 = vector.broadcast %cst_159 : f32 to vector<8x128xf32>
      %268 = arith.select %264, %266, %267 : vector<8x128xi1>, vector<8x128xf32>
      %269 = arith.addf %259, %268 : vector<8x128xf32>
      %c120_160 = arith.constant 120 : index
      %c0_161 = arith.constant 0 : index
      %270 = vector.load %arg8[%c120_160, %c0_161] : memref<176x128xf32, #tpu.memory_space<vmem>>, vector<8x128xf32>
      %cst_162 = arith.constant dense<0.000000e+00> : vector<8xf32>
      %271 = vector.multi_reduction <add>, %270, %cst_162 [1] : vector<8x128xf32> to vector<8xf32>
      %272 = vector.shape_cast %271 : vector<8xf32> to vector<8x1xf32>
      %c15_i32 = arith.constant 15 : i32
      %273 = vector.broadcast %c15_i32 : i32 to vector<8x128xi32>
      %274 = arith.cmpi eq, %118, %273 : vector<8x128xi32>
      %cst_163 = arith.constant 0.000000e+00 : f32
      %275 = vector.shape_cast %272 : vector<8x1xf32> to vector<8x1xf32>
      %276 = vector.broadcast %275 : vector<8x1xf32> to vector<8x128xf32>
      %277 = vector.broadcast %cst_163 : f32 to vector<8x128xf32>
      %278 = arith.select %274, %276, %277 : vector<8x128xi1>, vector<8x128xf32>
      %279 = arith.addf %269, %278 : vector<8x128xf32>
      %c128_164 = arith.constant 128 : index
      %c0_165 = arith.constant 0 : index
      %280 = vector.load %arg8[%c128_164, %c0_165] : memref<176x128xf32, #tpu.memory_space<vmem>>, vector<8x128xf32>
      %cst_166 = arith.constant dense<0.000000e+00> : vector<8xf32>
      %281 = vector.multi_reduction <add>, %280, %cst_166 [1] : vector<8x128xf32> to vector<8xf32>
      %282 = vector.shape_cast %281 : vector<8xf32> to vector<8x1xf32>
      %c16_i32 = arith.constant 16 : i32
      %283 = vector.broadcast %c16_i32 : i32 to vector<8x128xi32>
      %284 = arith.cmpi eq, %118, %283 : vector<8x128xi32>
      %cst_167 = arith.constant 0.000000e+00 : f32
      %285 = vector.shape_cast %282 : vector<8x1xf32> to vector<8x1xf32>
      %286 = vector.broadcast %285 : vector<8x1xf32> to vector<8x128xf32>
      %287 = vector.broadcast %cst_167 : f32 to vector<8x128xf32>
      %288 = arith.select %284, %286, %287 : vector<8x128xi1>, vector<8x128xf32>
      %289 = arith.addf %279, %288 : vector<8x128xf32>
      %c136_168 = arith.constant 136 : index
      %c0_169 = arith.constant 0 : index
      %290 = vector.load %arg8[%c136_168, %c0_169] : memref<176x128xf32, #tpu.memory_space<vmem>>, vector<8x128xf32>
      %cst_170 = arith.constant dense<0.000000e+00> : vector<8xf32>
      %291 = vector.multi_reduction <add>, %290, %cst_170 [1] : vector<8x128xf32> to vector<8xf32>
      %292 = vector.shape_cast %291 : vector<8xf32> to vector<8x1xf32>
      %c17_i32 = arith.constant 17 : i32
      %293 = vector.broadcast %c17_i32 : i32 to vector<8x128xi32>
      %294 = arith.cmpi eq, %118, %293 : vector<8x128xi32>
      %cst_171 = arith.constant 0.000000e+00 : f32
      %295 = vector.shape_cast %292 : vector<8x1xf32> to vector<8x1xf32>
      %296 = vector.broadcast %295 : vector<8x1xf32> to vector<8x128xf32>
      %297 = vector.broadcast %cst_171 : f32 to vector<8x128xf32>
      %298 = arith.select %294, %296, %297 : vector<8x128xi1>, vector<8x128xf32>
      %299 = arith.addf %289, %298 : vector<8x128xf32>
      %c144_172 = arith.constant 144 : index
      %c0_173 = arith.constant 0 : index
      %300 = vector.load %arg8[%c144_172, %c0_173] : memref<176x128xf32, #tpu.memory_space<vmem>>, vector<8x128xf32>
      %cst_174 = arith.constant dense<0.000000e+00> : vector<8xf32>
      %301 = vector.multi_reduction <add>, %300, %cst_174 [1] : vector<8x128xf32> to vector<8xf32>
      %302 = vector.shape_cast %301 : vector<8xf32> to vector<8x1xf32>
      %c18_i32 = arith.constant 18 : i32
      %303 = vector.broadcast %c18_i32 : i32 to vector<8x128xi32>
      %304 = arith.cmpi eq, %118, %303 : vector<8x128xi32>
      %cst_175 = arith.constant 0.000000e+00 : f32
      %305 = vector.shape_cast %302 : vector<8x1xf32> to vector<8x1xf32>
      %306 = vector.broadcast %305 : vector<8x1xf32> to vector<8x128xf32>
      %307 = vector.broadcast %cst_175 : f32 to vector<8x128xf32>
      %308 = arith.select %304, %306, %307 : vector<8x128xi1>, vector<8x128xf32>
      %309 = arith.addf %299, %308 : vector<8x128xf32>
      %c152_176 = arith.constant 152 : index
      %c0_177 = arith.constant 0 : index
      %310 = vector.load %arg8[%c152_176, %c0_177] : memref<176x128xf32, #tpu.memory_space<vmem>>, vector<8x128xf32>
      %cst_178 = arith.constant dense<0.000000e+00> : vector<8xf32>
      %311 = vector.multi_reduction <add>, %310, %cst_178 [1] : vector<8x128xf32> to vector<8xf32>
      %312 = vector.shape_cast %311 : vector<8xf32> to vector<8x1xf32>
      %c19_i32 = arith.constant 19 : i32
      %313 = vector.broadcast %c19_i32 : i32 to vector<8x128xi32>
      %314 = arith.cmpi eq, %118, %313 : vector<8x128xi32>
      %cst_179 = arith.constant 0.000000e+00 : f32
      %315 = vector.shape_cast %312 : vector<8x1xf32> to vector<8x1xf32>
      %316 = vector.broadcast %315 : vector<8x1xf32> to vector<8x128xf32>
      %317 = vector.broadcast %cst_179 : f32 to vector<8x128xf32>
      %318 = arith.select %314, %316, %317 : vector<8x128xi1>, vector<8x128xf32>
      %319 = arith.addf %309, %318 : vector<8x128xf32>
      %c160_180 = arith.constant 160 : index
      %c0_181 = arith.constant 0 : index
      %320 = vector.load %arg8[%c160_180, %c0_181] : memref<176x128xf32, #tpu.memory_space<vmem>>, vector<8x128xf32>
      %cst_182 = arith.constant dense<0.000000e+00> : vector<8xf32>
      %321 = vector.multi_reduction <add>, %320, %cst_182 [1] : vector<8x128xf32> to vector<8xf32>
      %322 = vector.shape_cast %321 : vector<8xf32> to vector<8x1xf32>
      %c20_i32 = arith.constant 20 : i32
      %323 = vector.broadcast %c20_i32 : i32 to vector<8x128xi32>
      %324 = arith.cmpi eq, %118, %323 : vector<8x128xi32>
      %cst_183 = arith.constant 0.000000e+00 : f32
      %325 = vector.shape_cast %322 : vector<8x1xf32> to vector<8x1xf32>
      %326 = vector.broadcast %325 : vector<8x1xf32> to vector<8x128xf32>
      %327 = vector.broadcast %cst_183 : f32 to vector<8x128xf32>
      %328 = arith.select %324, %326, %327 : vector<8x128xi1>, vector<8x128xf32>
      %329 = arith.addf %319, %328 : vector<8x128xf32>
      %c168_184 = arith.constant 168 : index
      %c0_185 = arith.constant 0 : index
      %330 = vector.load %arg8[%c168_184, %c0_185] : memref<176x128xf32, #tpu.memory_space<vmem>>, vector<8x128xf32>
      %cst_186 = arith.constant dense<0.000000e+00> : vector<8xf32>
      %331 = vector.multi_reduction <add>, %330, %cst_186 [1] : vector<8x128xf32> to vector<8xf32>
      %332 = vector.shape_cast %331 : vector<8xf32> to vector<8x1xf32>
      %c21_i32 = arith.constant 21 : i32
      %333 = vector.broadcast %c21_i32 : i32 to vector<8x128xi32>
      %334 = arith.cmpi eq, %118, %333 : vector<8x128xi32>
      %cst_187 = arith.constant 0.000000e+00 : f32
      %335 = vector.shape_cast %332 : vector<8x1xf32> to vector<8x1xf32>
      %336 = vector.broadcast %335 : vector<8x1xf32> to vector<8x128xf32>
      %337 = vector.broadcast %cst_187 : f32 to vector<8x128xf32>
      %338 = arith.select %334, %336, %337 : vector<8x128xi1>, vector<8x128xf32>
      %339 = arith.addf %329, %338 : vector<8x128xf32>
      %c0_188 = arith.constant 0 : index
      %c0_189 = arith.constant 0 : index
      %340 = vector.load %arg7[%c0_188, %c0_189] : memref<8x128xf32, #tpu.memory_space<vmem>>, vector<8x128xf32>
      tpu.vector_store %arg7[%c0_188, %c0_189], %339 {strides = array<i32>} : memref<8x128xf32, #tpu.memory_space<vmem>>, vector<8x128xf32>,
    } else {
    }
    return
  }
  func.func @transform_0(%arg0: i32, %arg1: i32) -> (i32, i32, i32) {
    %c0_i32 = arith.constant 0 : i32
    %c0_i32_0 = arith.constant 0 : i32
    return %arg0, %c0_i32, %arg1 : i32, i32, i32
  }
  func.func @transform_1(%arg0: i32, %arg1: i32) -> (i32, i32, i32) {
    %c0_i32 = arith.constant 0 : i32
    %c0_i32_0 = arith.constant 0 : i32
    return %arg0, %c0_i32, %arg1 : i32, i32, i32
  }
  func.func @transform_2(%arg0: i32, %arg1: i32) -> (i32, i32) {
    %c0_i32 = arith.constant 0 : i32
    return %arg0, %arg1 : i32, i32
  }
  func.func @transform_3(%arg0: i32, %arg1: i32) -> (i32, i32) {
    %c0_i32 = arith.constant 0 : i32
    %c0_i32_0 = arith.constant 0 : i32
    return %arg0, %c0_i32 : i32, i32
  }
  func.func @transform_4(%arg0: i32, %arg1: i32) -> (i32, i32) {
    %c0_i32 = arith.constant 0 : i32
    %c0_i32_0 = arith.constant 0 : i32
    return %arg0, %c0_i32 : i32, i32
  }
  func.func @transform_5(%arg0: i32, %arg1: i32) -> (i32, i32) {
    %c0_i32 = arith.constant 0 : i32
    %c0_i32_0 = arith.constant 0 : i32
    return %arg0, %c0_i32 : i32, i32
  }
}

</mosaic_0001>

<bundles_post_ra>
// kernel: custom-call.57
= control target key start
LH: loop header
LB: loop body
LE: loop exit
PB: predicated region body
PF: predicated region fallthrough
CT: control target
= control target key end

     0   :  { %s645_s9 = smov 0   ;;  %s647_s10 = smov 0   ;;  %s795_s0 = inlined_call_operand.vmem [shape: f32[2,6,3], index: 0, kind: input, shape index: {}]   ;;  %s796_s1 = inlined_call_operand.vmem [shape: f32[2,6,3], index: 1, kind: output, shape index: {0}]   ;;  %s797_s2 = inlined_call_operand.vmem [shape: f32[2,3], index: 2, kind: output, shape index: {1}]  }
   0x1   :  { %s649_s11 = smov 0   ;;  %s651_s12 = smov 0  }
   0x2   :  { %s653_s13 = smov 0  }
   0x3 LB: > { %s28_s14 = sadd.s32 1, %s618_s12  ;;  %s500_s15 = sadd.s32 4294967295, %s622_s13   ;;  %s622_s13 = sphi %s653_s13, %s9_s13   ;;  %s618_s12 = sphi %s651_s12, %s804_s12   ;;  %s614_s11 = sphi %s649_s11, %s803_s11   ;;  %s610_s10 = sphi %s647_s10, %s802_s10   ;;  %s606_s9 = sphi %s645_s9, %s801_s9  }
   0x4   : > { %p30_p0 = scmp.ge.s32.totalorder %s28_s14, 2  ;;  %s33_s16 = ssub.s32 0, %s618_s12 }
   0x5   : > { %s502_s17 = smin.u32 %s618_s12, %s33_s16  ;;  %p57_p1 = scmp.ne.s32.totalorder %s610_s10, %s606_s9 }
   0x6   : > { %s806_s14 = smov (%p30_p0, %s28_s14), 0  ;;  %s35_s18 = sshrl.u32 %s502_s17, 3 }
   0x7   : > { %s39_s19 = ssub.s32 0, %s806_s14  ;;  %p58_p2 = scmp.eq.s32.totalorder %s500_s15, 1 }
   0x8   : > { %s503_s20 = smin.u32 %s39_s19, %s806_s14  ;;  %s47_s24 = sadd.s32 1, %s610_s10 }
   0x9   : > { %s41_s21 = sshrl.u32 %s503_s20, 3  ;;  %p680_p3 = por %p58_p2, %p57_p1 }
   0xa   : > { %s44_s23 = ssub.s32 %s35_s18, %s41_s21  ;;  %p505_p5 = scmp.ge.s32.totalorder %s622_s13, 2 }
   0xb   : > { %p45_p4 = scmp.eq.s32.totalorder %s44_s23, 0  ;;  %s82_s26 = sand.u32 (!%p505_p5), 1, %s622_s13  }
   0xc   : > { %80 = sbr.rel (%p505_p5) target bundleno = 19 (0x13), region = 16  ;;  %s507_s27 = sshll.u32 (!%p505_p5), %s618_s12, 3 }
   0xd   : > { %s686_s25 = scalar_select %p45_p4, %s610_s10, %s47_s24  }
   0xe   : > { %s506_s28 = sshll.u32 (!%p505_p5), %s82_s26, 3  ;;  %s88_s3 = scalar_lea.vmem (!%p505_p5), %s795_s0, %s507_s27 }
   0xf   : > { %v116_v0 = vld [vmem:[%s88_s3] sm:$0xff] (!%p505_p5)  ;;  %s84_s4 = scalar_lea.vmem (!%p505_p5), [#allocation0], %s506_s28 }
  0x10   : > { %117 = vst [vmem:[%s84_s4] sm:$0xff] (!%p505_p5), %v116_v0 }
  0x13 PF: > { %p508_p6 = scmp.ge.s32.totalorder %s622_s13, 1  ;;  %p122_p7 = scmp.lt.s32.totalorder %s622_s13, 3 }
  0x15   : > { %p123_p8 = pnand %p508_p6, %p122_p7 }
  0x17   : > { %126 = sbr.rel (%p123_p8) target bundleno = 330 (0x14a), region = 54 }
  0x1e   : > { %s129_s5 = sand.u32 1, %s500_s15   ;;  %s143_s6 = sand.u32 1, %s606_s9   ;;  %v628_v2 = vmov 0.0  }
  0x1f   : > { %s509_s7 = sshll.u32 %s129_s5, 3  ;;  %s697_s8 = sshll.u32 %s143_s6, 1 }
  0x20   : > { %s152_s16 = sand.u32 7, %s614_s11   ;;  %s131_s17 = scalar_lea.vmem [#allocation0], %s509_s7 }
  0x21   : > { %v154_v1 = vld [vmem:[%s131_s17] sm:$0xff]  ;;  %s700_s18 = scalar_lea.vmem [#allocation1], %s509_s7  ;;  %s703_s19 = scalar_lea.vmem [#allocation2], %s152_s16 }
  0x22   : > { %155 = vst [vmem:[%s700_s18] sm:$0xff] %v154_v1  ;;  %156 = vst [vmem:[%s703_s19] sm:$0x1] %v628_v2  ;;  %s145_s15 = scalar_lea.vmem [#allocation3], %s697_s8  ;;  %s707_s20 = smov 0  }
  0x23 LB: >> { %v164_v3 = vlaneseq  ;;  %v716_v5 = vstv %s626_s20  ;;  %s191_s9 = scalar_lea.vmem %s700_s18, %s626_s20 [#allocation1]  ;;  %s249_s21 = scalar_lea.vmem [#allocation4], %s626_s20  ;;  %v629_v59 = vmov 1.0   ;;  %s626_s20 = sphi %s707_s20, %s162_s20  }
  0x24   : >> { %s266_s23 = smov [#allocation4] }
  0x25   : >> { %v713_v4 = vshrl.u32 %v164_v3, 7  ;;  %v243_v48 = vand.u32 127, %v164_v3 }
  0x27   : >> { %vm168_vm0 = vcmp.gt.s32.totalorder %v713_v4, %v716_v5  ;;  %vm169_vm1 = vcmp.lt.s32.totalorder %v713_v4, 6  ;;  %v230_v4 = vmov %v713_v4  ;;  %vm734_vm12 = vcmp.eq.s32.totalorder %v243_v48, %v716_v5 }
  0x28   : >> { %vm170_vm2 = vmand %vm168_vm0, %vm169_vm1  ;;  %vm234_vm9 = vcmp.gt.s32.totalorder %v230_v4, %v716_v5  ;;  %vm235_vm10 = vcmp.lt.s32.totalorder %v230_v4, 6  ;;  %v269_v4 = vmov %v713_v4  ;;  %vm295_vm15 = vcmp.gt.s32.totalorder %v243_v48, %v716_v5 }
  0x29   : >> { %v163_v6 = vld [vmem:[%s700_s18] sm:$0xff]  ;;  %v192_v15 = vld [vmem:[%s191_s9] ss:$0 sm:$0xff]  ;;  %s227_s18 = smov %s700_s18  ;;  %vm236_vm11 = vmand %vm234_vm9, %vm235_vm10  ;;  %vm274_vm13 = vcmp.lt.s32.totalorder %v269_v4, 6  ;;  %v286_v4 = vmov %v713_v4 }
  0x2a   : >> { %v171_v7 = vsel %vm170_vm2, %v163_v6, 0.0  ;;  %v193_v16 = vand.u32 2147483647, %v192_v15  ;;  %vm218_vm8 = vcmp.lt.f32.partialorder %v192_v15, 0.0  ;;  %v231_v45 = vld [vmem:[%s227_s18] sm:$0xff]  ;;  %s265_s18 = smov %s700_s18  ;;  %vm303_vm14 = vcmp.ge.s32.totalorder %v286_v4, %v716_v5 }
  0x2b   : >> { %v172_v8 = vmul.f32 %v171_v7, %v171_v7  ;;  %v237_v49 = vsel %vm236_vm11, %v231_v45, 0.0  ;;  %v262_v60 = vld [vmem:[%s703_s19] ss:$0 sm:$0xff]  ;;  %vm304_vm0 = vmand %vm734_vm12, %vm303_vm14 }
  0x2c   : >> { %v194_v21 = vmax.f32 %v193_v16, 0.0  ;;  %v272_v63 = vld [vmem:[%s265_s18] sm:$0xff]  ;;  %s282_s18 = smov %s265_s18 }
  0x2d   : >> { %v173_v9 = vrot.slane %v172_v8, 4  ;;  %s307_s24 = scalar_lea.vmem %s282_s18, %s626_s20  ;;  %s162_s20 = sadd.s32 1, %s626_s20  }
  0x2e   : >> { %p159_p9 = scmp.ge.s32.totalorder %s162_s20, 3  }
  0x2f   : >> { %v174_v10 = vadd.f32 %v173_v9, %v172_v8  ;;  %s515_s26 = sshll.u32 (%p159_p9), %s614_s11, 3 }
  0x30   : > { %s332_s29 = scalar_lea.vmem (%p159_p9), %s796_s1, %s515_s26 }
  0x31   : >> { %v175_v11 = vrot.slane %v174_v10, 2 }
  0x33   : >> { %v176_v12 = vadd.f32 %v175_v11, %v174_v10 }
  0x35   : >> { %v177_v13 = vrot.slane %v176_v12, 1 }
  0x37   : >> { %v178_v14 = vadd.f32 %v177_v13, %v176_v12  ;;  %v293_v13 = vld [vmem:[%s282_s18] sm:$0xff] }
  0x39   : >> { %570 = vrsqrt.f32 %v178_v14  ;;  %vm181_vm3 = vcmp.eq.f32.partialorder %v178_v14, inf  ;;  %v184_v18 = vand.u32 2147483648, %v178_v14  ;;  %vm183_vm4 = vcmp.eq.f32.partialorder %v178_v14, 0.0 }
  0x43   : >> { %v571_v17 = vpop.eup %570 }
  0x44   : >> { %v180_v19 = vmul.f32 %v571_v17, %v178_v14 }
  0x46   : >> { %v182_v20 = vsel %vm181_vm3, %v178_v14, %v180_v19 }
  0x47   : >> { %v185_v22 = vsel %vm183_vm4, %v184_v18, %v182_v20 }
  0x48   : >> { %v195_v23 = vand.u32 2147483647, %v185_v22 }
  0x4a   : >> { %v196_v24 = vmax.f32 %v194_v21, %v195_v23 }
  0x4c   : >> { %572 = vrcp.f32 %v196_v24  ;;  %vm208_vm7 = vcmp.eq.f32.partialorder %v196_v24, 0.0 }
  0x56   : >> { %v573_v25 = vpop.eup %572 }
  0x57   : >> { %v198_v26 = vmul.f32 %v573_v25, %v193_v16  ;;  %v201_v27 = vmul.f32 0.0, %v573_v25  ;;  %v205_v28 = vmul.f32 %v573_v25, %v195_v23 }
  0x59   : >> { %v199_v29 = vmul.f32 %v198_v26, %v198_v26  ;;  %v202_v30 = vmul.f32 %v201_v27, %v201_v27  ;;  %v206_v31 = vmul.f32 %v205_v28, %v205_v28 }
  0x5b   : >> { %v203_v32 = vadd.f32 %v202_v30, %v199_v29 }
  0x5d   : >> { %v207_v33 = vadd.f32 %v206_v31, %v203_v32 }
  0x5f   : >> { %574 = vrsqrt.f32 %v207_v33  ;;  %vm211_vm5 = vcmp.eq.f32.partialorder %v207_v33, inf  ;;  %v214_v35 = vand.u32 2147483648, %v207_v33  ;;  %vm213_vm6 = vcmp.eq.f32.partialorder %v207_v33, 0.0 }
  0x69   : >> { %v575_v34 = vpop.eup %574 }
  0x6a   : >> { %v210_v36 = vmul.f32 %v575_v34, %v207_v33 }
  0x6c   : >> { %v212_v37 = vsel %vm211_vm5, %v207_v33, %v210_v36 }
  0x6d   : >> { %v215_v38 = vsel %vm213_vm6, %v214_v35, %v212_v37 }
  0x6e   : >> { %v216_v39 = vmul.f32 %v215_v38, %v196_v24 }
  0x70   : >> { %v217_v40 = vsel %vm208_vm7, 0.0, %v216_v39 }
  0x71   : >> { %v219_v41 = vxor.u32 2147483648, %v217_v40 }
  0x73   : >> { %v220_v42 = vsel %vm218_vm8, %v217_v40, %v219_v41 }
  0x74   : >> { %v726_v43 = vsel %vm183_vm4, %v192_v15, %v220_v42  ;;  %576 = vrcp.f32 %v220_v42  ;;  %v221_v46 = vsub.f32 %v220_v42, %v192_v15 }
  0x75   : >> { %v226_v44 = vsub.f32 %v192_v15, %v726_v43 }
  0x77   : >> { %578 = vrcp.f32 %v226_v44 }
  0x7e   : >> { %v577_v47 = vpop.eup %576 }
  0x7f   : >> { %v223_v50 = vmul.f32 %v577_v47, %v221_v46 }
  0x81   : >> { %v579_v51 = vpop.eup %578  ;;  %v225_v55 = vsel %vm183_vm4, 0.0, %v223_v50 }
  0x82   : >> { %v239_v52 = vmul.f32 %v579_v51, %v237_v49  ;;  %v255_v57 = vsel %vm734_vm12, %v225_v55, 0.0 }
  0x84   : >> { %v240_v54 = vsel %vm183_vm4, 0.0, %v239_v52 }
  0x85   : >> { %v245_v56 = vsel %vm734_vm12, %v240_v54, 0.0 }
  0x86   : >> { %246 = vadd.xlane.f32.xlu0 %v245_v56 }
  0x8a   : >> { %256 = vadd.xlane.f32.xlu0 %v255_v57 }
 0x113   : >> { %v247_v58 = vpop.xlane.xlu0 %246 }
 0x114   : >> { %248 = vst [vmem:[#allocation4] sm:$0xff] %v247_v58 }
 0x115   : >> { %250 = vst [vmem:[%s249_s21] sm:$0x1] %v629_v59 }
 0x117   : >> { %v257_v61 = vpop.xlane.xlu0 %256 }
 0x118   : >> { %v263_v62 = vsel %vm734_vm12, %v257_v61, %v262_v60 }
 0x119   : >> { %264 = vst [vmem:[%s703_s19] sm:$0x1] %v263_v62 }
 0x11c   : >> { %v271_v0 = vld [vmem:[%s266_s23] sm:$0xff]  ;;  %s283_s23 = smov %s266_s23 }
 0x11d   : >> { %v273_v1 = vmul.f32 %v272_v63, %v271_v0  ;;  %v291_v12 = vld [vmem:[%s283_s23] sm:$0xff] }
 0x11f   : >> { %v275_v2 = vsel %vm274_vm13, %v273_v1, 0.0 }
 0x120   : >> { %v276_v3 = vrot.slane %v275_v2, 4  ;;  %v318_v4 = vld [vmem:[#allocation2] sm:$0x3] (%p159_p9) }
 0x121   : > { %320 = vst [vmem:[%s145_s15] sm:$0x3] (%p159_p9), %v318_v4 }
 0x122   : >> { %v277_v6 = vadd.f32 %v276_v3, %v275_v2 }
 0x124   : >> { %v278_v7 = vrot.slane %v277_v6, 2 }
 0x126   : >> { %v279_v8 = vadd.f32 %v278_v7, %v277_v6 }
 0x128   : >> { %v280_v9 = vrot.slane %v279_v8, 1 }
 0x12a   : >> { %v281_v10 = vadd.f32 %v280_v9, %v279_v8 }
 0x12c   : >> { %v287_v11 = vmul.f32 %v281_v10, %v257_v61 }
 0x12e   : >> { %v292_v14 = vmul.f32 %v291_v12, %v287_v11 }
 0x130   : >> { %v296_v15 = vsub.f32 %v293_v13, %v292_v14 }
 0x132   : >> { %v297_v16 = vsel %vm295_vm15, %v296_v15, %v293_v13 }
 0x133   : >> { %v305_v17 = vsel %vm304_vm0, %v291_v12, %v297_v16 }
 0x134   : >> { %306 = vst [vmem:[%s282_s18] sm:$0xff] %v305_v17 }
 0x137   : > { %161 = sbr.rel (!%p159_p9) target bundleno = 35 (0x23), region = 175 }
 0x13b   : >> { %v308_v18 = vld [vmem:[%s307_s24] ss:$0 sm:$0xff] }
 0x13c   : >> { %v313_v19 = vsel %vm734_vm12, %v726_v43, %v308_v18 }
 0x13d   : >> { %314 = vst [vmem:[%s307_s24] sm:$0x1] %v313_v19 }
 0x13e   : > { %p368_p10 = scmp.lt.s32.totalorder (%p680_p3), %s614_s11, 0  ;;  %s369_s30 = ssub.s32 (%p680_p3), 0, %s614_s11  ;;  %v391_v20 = vld [vmem:[%s145_s15] sm:$0x3] (%p680_p3) }
 0x13f   : > { %367 = sbr.rel (!%p680_p3) target bundleno = 330 (0x14a), region = 99  ;;  %s516_s3 = smin.u32 (%p680_p3), %s614_s11, %s369_s30 }
 0x140   : > { %s371_s4 = sshrl.u32 (%p680_p3), %s516_s3, 3 }
 0x141   : > { %s372_s5 = ssub.s32 (%p680_p3), 0, %s371_s4 }
 0x144   : > { %v360_v5 = vld [vmem:[%s700_s18] sm:$0xff] }
 0x145   : > { %361 = vst [vmem:[%s332_s29] sm:$0xff] %v360_v5 }
 0x146   : > { %s808_s5 = smov (!%p368_p10, %s372_s5), %s371_s4 }
 0x147   : > { %s517_s6 = sshll.u32 %s808_s5, 1 }
 0x148   : > { %s375_s17 = scalar_lea.vmem %s797_s2, %s517_s6 }
 0x149   : > { %392 = vst [vmem:[%s375_s17] sm:$0x3] %v391_v20 }
 0x14a PF: > { %s9_s13 = sadd.s32 1, %s622_s13   ;;  %s801_s9 = smov %s610_s10 }
 0x14b   : > { %p6_p11 = scmp.ge.s32.totalorder %s9_s13, 4   ;;  %s802_s10 = smov %s686_s25 }
 0x14c   : > { %s803_s11 = smov %s618_s12  ;;  %s804_s12 = smov %s806_s14 }
 0x14d   :  { %8 = sbr.rel (!%p6_p11) target bundleno = 3 (0x3), region = 186 }

// kernel: custom-call.58
= control target key start
LH: loop header
LB: loop body
LE: loop exit
PB: predicated region body
PF: predicated region fallthrough
CT: control target
= control target key end

     0   :  { %s236_s6 = smov 0   ;;  %s263_s0 = inlined_call_operand.vmem [shape: f32[2,3,3], index: 0, kind: input, shape index: {}]   ;;  %s264_s1 = inlined_call_operand.vmem [shape: f32[2,3,3], index: 1, kind: output, shape index: {}]  }
   0x1 LB: > { %s198_s7 = sadd.s32 4294967295, %s224_s6   ;;  %p200_p0 = scmp.ge.s32.totalorder %s224_s6, 2  ;;  %s224_s6 = sphi %s236_s6, %s7_s6  }
   0x2   : > { %s23_s8 = sand.u32 (!%p200_p0), 1, %s224_s6   ;;  %s202_s9 = sshll.u32 (!%p200_p0), %s224_s6, 2 }
   0x3   : > { %21 = sbr.rel (%p200_p0) target bundleno = 10 (0xa), region = 16  ;;  %s201_s10 = sshll.u32 (!%p200_p0), %s23_s8, 2 }
   0x4   : > { %s27_s13 = scalar_lea.vmem (!%p200_p0), %s263_s0, %s202_s9  ;;  %s25_s14 = scalar_lea.vmem (!%p200_p0), [#allocation1], %s201_s10 }
   0x5   : > { %v43_v0 = vld [vmem:[%s27_s13] sm:$0xf] (!%p200_p0) }
   0x6   : > { %44 = vst [vmem:[%s25_s14] sm:$0xf] (!%p200_p0), %v43_v0 }
   0xa PF: > { %p203_p1 = scmp.ge.s32.totalorder %s224_s6, 1  ;;  %p60_p2 = scmp.lt.s32.totalorder %s224_s6, 3 }
   0xc   : > { %p61_p3 = pnand %p203_p1, %p60_p2 }
   0xd   : > { %s252_s15 = sand.u32 (!%p61_p3), 1, %s198_s7   ;;  %v82_v1 = vlaneseq (!%p61_p3)  ;;  %vm96_vm1 = vcmask (!%p61_p3), 23552   ;;  %s207_s19 = sshll.u32 (!%p61_p3), %s198_s7, 2 }
   0xe   : > { %64 = sbr.rel (%p61_p3) target bundleno = 334 (0x14e), region = 50  ;;  %s204_s16 = sshll.u32 (!%p61_p3), %s252_s15, 2 }
   0xf   : > { %s73_s17 = scalar_lea.vmem (!%p61_p3), [#allocation1], %s204_s16  ;;  %v83_v3 = vand.u32 (!%p61_p3), 127, %v82_v1  ;;  %v85_v4 = vshrl.u32 (!%p61_p3), %v82_v1, 7  ;;  %s77_s18 = scalar_lea.vmem (!%p61_p3), [#allocation3], %s204_s16 }
  0x10   : > { %v80_v2 = vld [vmem:[%s73_s17] sm:$0xf] (!%p61_p3)  ;;  %s128_s22 = scalar_lea.vmem (!%p61_p3), %s264_s1, %s207_s19 }
  0x11   : > { %81 = vst [vmem:[#allocation0] sm:$0xf] (!%p61_p3), %v80_v2  ;;  %vm91_vm0 = vcmp.eq.s32.totalorder (!%p61_p3), %v83_v3, 0  ;;  %vm87_vm2 = vcmp.eq.s32.totalorder (!%p61_p3), %v83_v3, %v85_v4  ;;  %vm100_vm3 = vcmp.eq.s32.totalorder (!%p61_p3), %v83_v3, 1  ;;  %vm111_vm4 = vcmp.eq.s32.totalorder (!%p61_p3), %v83_v3, 2 }
  0x18   : > { %v88_v5 = vld [vmem:[#allocation0] sm:$0xff] }
  0x19   : > { %v95_v6 = vld [vmem:[#allocation0 + $0x1] ss:$0 sm:$0xff]  ;;  %v92_v7 = vsel %vm91_vm0, %v88_v5, 1.0  ;;  %v106_v11 = vld [vmem:[#allocation0 + $0x2] ss:$0 sm:$0xff] }
  0x1a   : > { %v97_v8 = vsel %vm96_vm1, %v95_v6, 0.0  ;;  %v93_v9 = vsel %vm87_vm2, %v92_v7, 0.0  ;;  %v108_v12 = vsel %vm96_vm1, %v106_v11, 0.0 }
  0x1b   : > { %v101_v10 = vmul.f32 %v97_v8, %v93_v9 }
  0x1d   : > { %102 = vadd.xlane.f32.xlu0 %v101_v10 }
  0xaa   : > { %v103_v13 = vpop.xlane.xlu0 %102 }
  0xab   : > { %v104_v14 = vsel %vm100_vm3, %v103_v13, %v93_v9 }
  0xac   : > { %v112_v15 = vmul.f32 %v108_v12, %v104_v14 }
  0xae   : > { %113 = vadd.xlane.f32.xlu0 %v112_v15 }
 0x13b   : > { %v114_v16 = vpop.xlane.xlu0 %113 }
 0x13c   : > { %v115_v17 = vsel %vm111_vm4, %v114_v16, %v104_v14 }
 0x13d   : > { %116 = vst [vmem:[#allocation2] sm:$0xff] %v115_v17 }
 0x144   : > { %v120_v18 = vld [vmem:[#allocation2] sm:$0xf] }
 0x145   : > { %122 = vst [vmem:[%s77_s18] sm:$0xf] %v120_v18 }
 0x14c   : > { %v144_v19 = vld [vmem:[%s77_s18] sm:$0xf] }
 0x14d   : > { %145 = vst [vmem:[%s128_s22] sm:$0xf] %v144_v19 }
 0x14e PF: > { %s7_s6 = sadd.s32 1, %s224_s6  }
 0x14f   : > { %p4_p4 = scmp.ge.s32.totalorder %s7_s6, 4  }
 0x151   :  { %6 = sbr.rel (!%p4_p4) target bundleno = 1 (0x1), region = 112 }

// kernel: custom-call.50
= control target key start
LH: loop header
LB: loop body
LE: loop exit
PB: predicated region body
PF: predicated region fallthrough
CT: control target
= control target key end

     0   :  { %s6_s0 = inlined_call_operand.hbm [shape: pred[2], index: 0, kind: output, shape index: {}]  }

// kernel: custom-call.55
= control target key start
LH: loop header
LB: loop body
LE: loop exit
PB: predicated region body
PF: predicated region fallthrough
CT: control target
= control target key end

     0   :  { %s343_s6 = smov 0   ;;  %s345_s7 = smov 0   ;;  %s390_s0 = inlined_call_operand.vmem [shape: f32[2,3,3], index: 0, kind: input, shape index: {}]   ;;  %s391_s1 = inlined_call_operand.vmem [shape: f32[2,3,3], index: 1, kind: output, shape index: {}]  }
   0x1   :  { %s347_s8 = smov 0  }
   0x2 LB: > { %s265_s9 = sadd.s32 4294967295, %s330_s8   ;;  %s26_s10 = sadd.s32 1, %s326_s7  ;;  %s330_s8 = sphi %s347_s8, %s7_s8   ;;  %s326_s7 = sphi %s345_s7, %s393_s7   ;;  %s322_s6 = sphi %s343_s6, %s392_s6  }
   0x3   : > { %p28_p0 = scmp.ge.s32.totalorder %s26_s10, 2  ;;  %p267_p1 = scmp.ge.s32.totalorder %s330_s8, 2 }
   0x4   : > { %s42_s11 = sand.u32 (!%p267_p1), 1, %s330_s8   ;;  %s269_s12 = sshll.u32 (!%p267_p1), %s326_s7, 2 }
   0x5   : > { %s395_s10 = smov (%p28_p0, %s26_s10), 0  ;;  %40 = sbr.rel (%p267_p1) target bundleno = 12 (0xc), region = 16 }
   0x6   : > { %s268_s13 = sshll.u32 (!%p267_p1), %s42_s11, 2  ;;  %s48_s16 = scalar_lea.vmem (!%p267_p1), %s390_s0, %s269_s12 }
   0x7   : > { %v64_v0 = vld [vmem:[%s48_s16] sm:$0xf] (!%p267_p1)  ;;  %s44_s17 = scalar_lea.vmem (!%p267_p1), [#allocation1], %s268_s13 }
   0x8   : > { %65 = vst [vmem:[%s44_s17] sm:$0xf] (!%p267_p1), %v64_v0 }
   0xc PF: > { %p270_p2 = scmp.ge.s32.totalorder %s330_s8, 1  ;;  %p81_p3 = scmp.lt.s32.totalorder %s330_s8, 3 }
   0xe   : > { %p82_p4 = pnand %p270_p2, %p81_p3 }
   0xf   : > { %v332_v1 = vmov (!%p82_p4), 0.0   ;;  %s370_s18 = sand.u32 (!%p82_p4), 1, %s265_s9   ;;  %vm104_vm0 = vcmask (!%p82_p4), 7168   ;;  %vm122_vm1 = vcmask (!%p82_p4), 15368   ;;  %vm139_vm2 = vcmask (!%p82_p4), 1047553   ;;  %s274_s22 = sshll.u32 (!%p82_p4), %s322_s6, 2 }
  0x10   : > { %85 = sbr.rel (%p82_p4) target bundleno = 541 (0x21d), region = 50  ;;  %103 = vst [vmem:[#allocation2] sm:$0xff] (!%p82_p4), %v332_v1  ;;  %s271_s19 = sshll.u32 (!%p82_p4), %s370_s18, 2  ;;  %vm140_vm3 = vmand (!%p82_p4), %vm122_vm1, %vm139_vm2  ;;  %vm144_vm4 = vcmask (!%p82_p4), 23568   ;;  %vm161_vm5 = vcmask (!%p82_p4), 1047554  }
  0x11   : > { %s94_s20 = scalar_lea.vmem (!%p82_p4), [#allocation1], %s271_s19  ;;  %vm162_vm6 = vmand (!%p82_p4), %vm144_vm4, %vm161_vm5  ;;  %s98_s21 = scalar_lea.vmem (!%p82_p4), [#allocation3], %s271_s19 }
  0x12   : > { %v101_v5 = vld [vmem:[%s94_s20] sm:$0xf] (!%p82_p4)  ;;  %s179_s25 = scalar_lea.vmem (!%p82_p4), %s391_s1, %s274_s22 }
  0x13   : > { %102 = vst [vmem:[#allocation0] sm:$0xf] (!%p82_p4), %v101_v5 }
  0x17   : > { %v105_v2 = vld [vmem:[#allocation2] ss:$0 sm:$0xff] }
  0x18   : > { %v107_v3 = vmul.f32 %v105_v2, %v105_v2  ;;  %v114_v4 = vmul.f32 0.0, %v105_v2 }
  0x1a   : > { %108 = vadd.xlane.f32.xlu0 %v107_v3  ;;  %v106_v6 = vld [vmem:[#allocation0] ss:$0 sm:$0xff]  ;;  %v126_v18 = vld [vmem:[#allocation0 + $0x1] ss:$0 sm:$0xff]  ;;  %v148_v30 = vld [vmem:[#allocation0 + $0x2] ss:$0 sm:$0xff] }
  0x1b   : > { %v112_v10 = vld [vmem:[#allocation0] sm:$0xff] }
  0x1e   : > { %115 = vadd.xlane.f32.xlu0 %v114_v4 }
  0xa7   : > { %v109_v7 = vpop.xlane.xlu0 %108 }
  0xa8   : > { %v110_v8 = vsub.f32 %v106_v6, %v109_v7 }
  0xaa   : > { %302 = vrsqrt.f32 %v110_v8 }
  0xab   : > { %v116_v9 = vpop.xlane.xlu0 %115 }
  0xac   : > { %v117_v11 = vsub.f32 %v112_v10, %v116_v9 }
  0xb4   : > { %v303_v12 = vpop.eup %302 }
  0xb5   : > { %v118_v13 = vmul.f32 %v303_v12, %v117_v11 }
  0xb7   : > { %v119_v14 = vsel %vm104_vm0, %v118_v13, 0.0 }
  0xb8   : > { %121 = vst [vmem:[#allocation2] sm:$0xff] %v119_v14 }
  0xbf   : > { %v124_v15 = vld [vmem:[#allocation2 + $0x1] ss:$0 sm:$0xff] }
  0xc0   : > { %v127_v16 = vmul.f32 %v124_v15, %v124_v15  ;;  %v134_v17 = vmul.f32 %v124_v15, %v119_v14 }
  0xc2   : > { %128 = vadd.xlane.f32.xlu1 %v127_v16 }
  0xc6   : > { %135 = vadd.xlane.f32.xlu1 %v134_v17 }
 0x14f   : > { %v129_v19 = vpop.xlane.xlu1 %128 }
 0x150   : > { %v130_v20 = vsub.f32 %v126_v18, %v129_v19 }
 0x152   : > { %304 = vrsqrt.f32 %v130_v20 }
 0x153   : > { %v136_v21 = vpop.xlane.xlu1 %135 }
 0x154   : > { %v137_v22 = vsub.f32 %v112_v10, %v136_v21 }
 0x15c   : > { %v305_v23 = vpop.eup %304 }
 0x15d   : > { %v138_v24 = vmul.f32 %v305_v23, %v137_v22 }
 0x15f   : > { %v141_v25 = vsel %vm140_vm3, %v138_v24, 0.0 }
 0x160   : > { %v142_v26 = vadd.f32 %v141_v25, %v119_v14 }
 0x162   : > { %143 = vst [vmem:[#allocation2] sm:$0xff] %v142_v26 }
 0x169   : > { %v146_v27 = vld [vmem:[#allocation2 + $0x2] ss:$0 sm:$0xff] }
 0x16a   : > { %v156_v28 = vmul.f32 %v146_v27, %v142_v26  ;;  %v149_v29 = vmul.f32 %v146_v27, %v146_v27 }
 0x16c   : > { %157 = vadd.xlane.f32.xlu1 %v156_v28  ;;  %150 = vadd.xlane.f32.xlu0 %v149_v29 }
 0x1f9   : > { %v151_v31 = vpop.xlane.xlu0 %150  ;;  %v158_v33 = vpop.xlane.xlu1 %157 }
 0x1fa   : > { %v152_v32 = vsub.f32 %v148_v30, %v151_v31  ;;  %v159_v34 = vsub.f32 %v112_v10, %v158_v33 }
 0x1fc   : > { %306 = vrsqrt.f32 %v152_v32 }
 0x206   : > { %v307_v35 = vpop.eup %306 }
 0x207   : > { %v160_v36 = vmul.f32 %v307_v35, %v159_v34 }
 0x209   : > { %v163_v37 = vsel %vm162_vm6, %v160_v36, 0.0 }
 0x20a   : > { %v164_v38 = vadd.f32 %v163_v37, %v142_v26 }
 0x20c   : > { %165 = vst [vmem:[#allocation2] sm:$0xff] %v164_v38 }
 0x213   : > { %v169_v39 = vld [vmem:[#allocation2] sm:$0xf] }
 0x214   : > { %171 = vst [vmem:[%s98_s21] sm:$0xf] %v169_v39 }
 0x21b   : > { %v195_v40 = vld [vmem:[%s98_s21] sm:$0xf] }
 0x21c   : > { %196 = vst [vmem:[%s179_s25] sm:$0xf] %v195_v40 }
 0x21d PF: > { %s7_s8 = sadd.s32 1, %s330_s8   ;;  %s392_s6 = smov %s326_s7 }
 0x21e   : > { %p4_p5 = scmp.ge.s32.totalorder %s7_s8, 4   ;;  %s393_s7 = smov %s395_s10 }
 0x220   :  { %6 = sbr.rel (!%p4_p5) target bundleno = 2 (0x2), region = 114 }

// kernel: custom-call.56
= control target key start
LH: loop header
LB: loop body
LE: loop exit
PB: predicated region body
PF: predicated region fallthrough
CT: control target
= control target key end

     0   :  { %s343_s6 = smov 0   ;;  %s345_s7 = smov 0   ;;  %s390_s0 = inlined_call_operand.vmem [shape: f32[2,1,3,3], index: 0, kind: input, shape index: {}]   ;;  %s391_s1 = inlined_call_operand.vmem [shape: f32[2,1,3,3], index: 1, kind: output, shape index: {}]  }
   0x1   :  { %s347_s8 = smov 0  }
   0x2 LB: > { %s269_s9 = sadd.s32 4294967295, %s330_s8   ;;  %s33_s10 = sadd.s32 1, %s326_s7  ;;  %s330_s8 = sphi %s347_s8, %s7_s8   ;;  %s326_s7 = sphi %s345_s7, %s393_s7   ;;  %s322_s6 = sphi %s343_s6, %s392_s6  }
   0x3   : > { %p35_p0 = scmp.ge.s32.totalorder %s33_s10, 2  ;;  %p271_p1 = scmp.ge.s32.totalorder %s330_s8, 2 }
   0x4   : > { %s49_s11 = sand.u32 (!%p271_p1), 1, %s330_s8   ;;  %s273_s12 = sshll.u32 (!%p271_p1), %s326_s7, 2 }
   0x5   : > { %s395_s10 = smov (%p35_p0, %s33_s10), 0  ;;  %47 = sbr.rel (%p271_p1) target bundleno = 12 (0xc), region = 16 }
   0x6   : > { %s272_s13 = sshll.u32 (!%p271_p1), %s49_s11, 2  ;;  %s56_s16 = scalar_lea.vmem (!%p271_p1), %s390_s0, %s273_s12 }
   0x7   : > { %v72_v0 = vld [vmem:[%s56_s16] sm:$0xf] (!%p271_p1)  ;;  %s51_s17 = scalar_lea.vmem (!%p271_p1), [#allocation1], %s272_s13 }
   0x8   : > { %73 = vst [vmem:[%s51_s17] sm:$0xf] (!%p271_p1), %v72_v0 }
   0xc PF: > { %p274_p2 = scmp.ge.s32.totalorder %s330_s8, 1  ;;  %p89_p3 = scmp.lt.s32.totalorder %s330_s8, 3 }
   0xe   : > { %p90_p4 = pnand %p274_p2, %p89_p3 }
  0x10   : > { %93 = sbr.rel (%p90_p4) target bundleno = 511 (0x1ff), region = 50 }
  0x17   : > { %s370_s18 = sand.u32 1, %s269_s9   ;;  %v111_v1 = vlaneseq  ;;  %v332_v11 = vmov -1.0   ;;  %s278_s22 = sshll.u32 %s322_s6, 2 }
  0x18   : > { %s275_s19 = sshll.u32 %s370_s18, 2  ;;  %s178_s25 = scalar_lea.vmem %s391_s1, %s278_s22 }
  0x19   : > { %s102_s20 = scalar_lea.vmem [#allocation1], %s275_s19  ;;  %v112_v3 = vand.u32 127, %v111_v1  ;;  %v115_v4 = vshrl.u32 %v111_v1, 7  ;;  %s106_s21 = scalar_lea.vmem [#allocation3], %s275_s19 }
  0x1a   : > { %v109_v2 = vld [vmem:[%s102_s20] sm:$0xf] }
  0x1b   : > { %110 = vst [vmem:[#allocation0] sm:$0xf] %v109_v2  ;;  %vm113_vm0 = vcmp.lt.s32.totalorder %v112_v3, 3  ;;  %vm122_vm1 = vcmp.ge.s32.totalorder %v115_v4, %v112_v3  ;;  %vm117_vm2 = vcmp.eq.s32.totalorder %v115_v4, %v112_v3  ;;  %vm136_vm4 = vcmp.eq.s32.totalorder %v112_v3, 0 }
  0x1c   : > { %vm123_vm3 = vmand %vm122_vm1, %vm113_vm0  ;;  %vm133_vm5 = vcmp.eq.s32.totalorder %v112_v3, %v115_v4  ;;  %v137_v12 = vsel %vm136_vm4, 1.0, %v332_v11  ;;  %vm144_vm6 = vcmp.eq.s32.totalorder %v112_v3, 1  ;;  %vm154_vm7 = vcmp.eq.s32.totalorder %v112_v3, 2 }
  0x1d   : > { %v138_v13 = vsel %vm133_vm5, %v137_v12, 0.0 }
  0x22   : > { %v118_v5 = vld [vmem:[#allocation0] sm:$0xff] }
  0x23   : > { %v119_v6 = vsel %vm117_vm2, %v118_v5, 0.0  ;;  %v124_v7 = vsel %vm123_vm3, %v118_v5, 0.0 }
  0x24   : > { %120 = vadd.xlane.f32.xlu0 %v119_v6 }
  0xb1   : > { %v121_v8 = vpop.xlane.xlu0 %120 }
  0xb2   : > { %306 = vrcp.f32 %v121_v8  ;;  %vm161_vm8 = vweird.f32 %v121_v8 }
  0xbc   : > { %v307_v9 = vpop.eup %306 }
  0xbd   : > { %v126_v10 = vmul.f32 %v307_v9, %v124_v7 }
  0xbf   : > { %127 = vst [vmem:[#allocation4] sm:$0xff] %v126_v10 }
  0xc6   : > { %v140_v14 = vld [vmem:[#allocation4 + $0x1] ss:$0 sm:$0xff]  ;;  %v150_v17 = vld [vmem:[#allocation4 + $0x2] ss:$0 sm:$0xff] }
  0xc7   : > { %v141_v15 = vxor.u32 2147483648, %v140_v14  ;;  %v151_v19 = vxor.u32 2147483648, %v150_v17 }
  0xc9   : > { %v145_v16 = vmul.f32 %v141_v15, %v138_v13 }
  0xcb   : > { %146 = vadd.xlane.f32.xlu0 %v145_v16 }
 0x158   : > { %v147_v18 = vpop.xlane.xlu0 %146 }
 0x159   : > { %v148_v20 = vsel %vm144_vm6, %v147_v18, %v138_v13 }
 0x15a   : > { %v155_v21 = vmul.f32 %v151_v19, %v148_v20 }
 0x15c   : > { %156 = vadd.xlane.f32.xlu1 %v155_v21 }
 0x1e9   : > { %v157_v22 = vpop.xlane.xlu1 %156 }
 0x1ea   : > { %v158_v23 = vsel %vm154_vm7, %v157_v22, %v148_v20 }
 0x1eb   : > { %v160_v24 = vmul.f32 %v307_v9, %v158_v23 }
 0x1ed   : > { %v162_v25 = vsel %vm161_vm8, %v158_v23, %v160_v24 }
 0x1ee   : > { %163 = vst [vmem:[#allocation2] sm:$0xff] %v162_v25 }
 0x1f5   : > { %v167_v26 = vld [vmem:[#allocation2] sm:$0xf] }
 0x1f6   : > { %169 = vst [vmem:[%s106_s21] sm:$0xf] %v167_v26 }
 0x1fd   : > { %v194_v27 = vld [vmem:[%s106_s21] sm:$0xf] }
 0x1fe   : > { %195 = vst [vmem:[%s178_s25] sm:$0xf] %v194_v27 }
 0x1ff PF: > { %s7_s8 = sadd.s32 1, %s330_s8   ;;  %s392_s6 = smov %s326_s7 }
 0x200   : > { %p4_p5 = scmp.ge.s32.totalorder %s7_s8, 4   ;;  %s393_s7 = smov %s395_s10 }
 0x202   :  { %6 = sbr.rel (!%p4_p5) target bundleno = 2 (0x2), region = 112 }

// kernel: custom-call.22
= control target key start
LH: loop header
LB: loop body
LE: loop exit
PB: predicated region body
PF: predicated region fallthrough
CT: control target
= control target key end

     0   :  { %s1704_s30 = smov 0   ;;  %s1706_s10 = smov 0   ;;  %s2030_s0 = inlined_call_operand.vmem [shape: f32[2,2,2], index: 0, kind: input, shape index: {}]   ;;  %s2031_s1 = inlined_call_operand.vmem [shape: f32[2,2,2], index: 1, kind: input, shape index: {}]   ;;  %s2032_s2 = inlined_call_operand.vmem [shape: f32[2,2,2], index: 2, kind: input, shape index: {}]   ;;  %s2033_s3 = inlined_call_operand.vmem [shape: f32[2,2,2], index: 3, kind: input, shape index: {}]   ;;  %s2034_s4 = inlined_call_operand.vmem [shape: f32[2,2], index: 4, kind: output, shape index: {0}]   ;;  %s2035_s5 = inlined_call_operand.vmem [shape: f32[2,2], index: 5, kind: output, shape index: {1}]   ;;  %s2036_s6 = inlined_call_operand.vmem [shape: f32[2,2,2], index: 6, kind: output, shape index: {2}]   ;;  %s2037_s7 = inlined_call_operand.vmem [shape: f32[2,2,2], index: 7, kind: output, shape index: {3}]   ;;  %s2038_s8 = inlined_call_operand.vmem [shape: f32[2,2,2], index: 8, kind: output, shape index: {4}]   ;;  %s2039_s9 = inlined_call_operand.vmem [shape: f32[2,2,2], index: 9, kind: output, shape index: {5}]  }
   0x1   :  { %s1708_s11 = smov 0  }
   0x2 LB: > { %s1720_s12 = sadd.s32 4294967295, %s1641_s11   ;;  %s1723_s13 = sadd.s32 1, %s1641_s11   ;;  %s1641_s11 = sphi %s1708_s11, %s2058_s11   ;;  %s1637_s10 = sphi %s1706_s10, %s2057_s10   ;;  %s1633_s30 = sphi %s1704_s30, %s2056_s30  }
   0x3   : > { %s20_s14 = sshrl.u32 %s1641_s11, 3  ;;  %s21_s15 = sshrl.u32 %s1723_s13, 3 }
   0x4   : > { %s22_s16 = ssub.s32 %s20_s14, %s21_s15  ;;  %s25_s17 = sadd.s32 1, %s1637_s10 }
   0x5   : > { %p23_p0 = scmp.eq.s32.totalorder %s22_s16, 0  ;;  %p35_p1 = scmp.ne.s32.totalorder %s1637_s10, %s1633_s30 }
   0x6   : > { %p36_p2 = scmp.eq.s32.totalorder %s1720_s12, 1  ;;  %p1502_p4 = scmp.ge.s32.totalorder %s1641_s11, 2 }
   0x7   : > { %s1732_s18 = scalar_select %p23_p0, %s1637_s10, %s25_s17  }
   0x8   : > { %p1734_p3 = por %p36_p2, %p35_p1  ;;  %86 = sbr.rel (%p1502_p4) target bundleno = 17 (0x11), region = 16 }
   0x9   : > { %2040 = sst [smem:[#allocation33_spill]] %s1732_s18  ;;  %s88_s20 = sand.u32 (!%p1502_p4), 1, %s1641_s11  }
   0xa   : > { %s1504_s21 = sshll.u32 (!%p1502_p4), %s1641_s11, 1  ;;  %s1503_s22 = sshll.u32 (!%p1502_p4), %s88_s20, 1 }
   0xb   : > { %s92_s25 = scalar_lea.vmem (!%p1502_p4), %s2030_s0, %s1504_s21  ;;  %s90_s26 = scalar_lea.vmem (!%p1502_p4), [#allocation1], %s1503_s22 }
   0xc   : > { %v108_v0 = vld [vmem:[%s92_s25] sm:$0x3] (!%p1502_p4)  ;;  %s129_s29 = scalar_lea.vmem (!%p1502_p4), %s2031_s1, %s1504_s21  ;;  %s166_s16 = scalar_lea.vmem (!%p1502_p4), %s2032_s2, %s1504_s21 }
   0xd   : > { %109 = vst [vmem:[%s90_s26] sm:$0x3] (!%p1502_p4), %v108_v0  ;;  %v145_v1 = vld [vmem:[%s129_s29] sm:$0x3] (!%p1502_p4)  ;;  %s127_s17 = scalar_lea.vmem (!%p1502_p4), [#allocation3], %s1503_s22  ;;  %s203_s23 = scalar_lea.vmem (!%p1502_p4), %s2033_s3, %s1504_s21 }
   0xe   : > { %146 = vst [vmem:[%s127_s17] sm:$0x3] (!%p1502_p4), %v145_v1  ;;  %v182_v2 = vld [vmem:[%s166_s16] sm:$0x3] (!%p1502_p4)  ;;  %s164_s24 = scalar_lea.vmem (!%p1502_p4), [#allocation5], %s1503_s22  ;;  %s201_s25 = scalar_lea.vmem (!%p1502_p4), [#allocation7], %s1503_s22 }
   0xf   : > { %183 = vst [vmem:[%s164_s24] sm:$0x3] %v182_v2  ;;  %v219_v3 = vld [vmem:[%s203_s23] sm:$0x3] }
  0x10   : > { %220 = vst [vmem:[%s201_s25] sm:$0x3] %v219_v3 }
  0x11 PF: > { %p1511_p5 = scmp.ge.s32.totalorder %s1641_s11, 1  ;;  %p236_p6 = scmp.lt.s32.totalorder %s1641_s11, 3 }
  0x13   : > { %p237_p7 = pnand %p1511_p5, %p236_p6 }
  0x15   : > { %240 = sbr.rel (%p237_p7) target bundleno = 999 (0x3e7), region = 140 }
  0x1c   : > { %s259_s26 = sand.u32 1, %s1720_s12   ;;  %s277_s27 = sand.u32 1, %s1633_s30   ;;  %v337_v4 = vlaneseq  ;;  %v1651_v5 = vmov 0.0  }
  0x1d   : > { %s1757_s28 = sshll.u32 %s259_s26, 1  ;;  %s1759_s18 = sshll.u32 %s277_s27, 1  ;;  %332 = vst [vmem:[#allocation12] sm:$0xff] %v1651_v5  ;;  %333 = vst [vmem:[#allocation14] sm:$0xff] %v1651_v5 }
  0x1e   : > { %334 = vst [vmem:[#allocation16] sm:$0xff] %v1651_v5  ;;  %335 = vst [vmem:[#allocation18] sm:$0xff] %v1651_v5  ;;  %v1761_v6 = vand.u32 127, %v337_v4  ;;  %v1763_v7 = vshrl.u32 %v337_v4, 7  ;;  %s261_s11 = scalar_lea.vmem [#allocation1], %s1757_s28  ;;  %s265_s30 = scalar_lea.vmem [#allocation3], %s1757_s28 }
  0x1f   : > { %v304_v8 = vld [vmem:[%s261_s11] sm:$0x3]  ;;  %v308_v9 = vld [vmem:[%s265_s30] sm:$0x3]  ;;  %s269_s21 = scalar_lea.vmem [#allocation5], %s1757_s28  ;;  %s273_s22 = scalar_lea.vmem [#allocation7], %s1757_s28 }
  0x20   : > { %305 = vst [vmem:[#allocation0] sm:$0x3] %v304_v8  ;;  %309 = vst [vmem:[#allocation2] sm:$0x3] %v308_v9  ;;  %v312_v10 = vld [vmem:[%s269_s21] sm:$0x3]  ;;  %v339_v6 = vmov %v1761_v6  ;;  %v342_v7 = vmov %v1763_v7 }
  0x21   : > { %v316_v11 = vld [vmem:[%s273_s22] sm:$0x3]  ;;  %313 = vst [vmem:[#allocation4] sm:$0x3] %v312_v10  ;;  %v352_v6 = vmov %v1761_v6  ;;  %v355_v7 = vmov %v1763_v7  ;;  %s320_s29 = smov [#allocation20]  ;;  %s323_s14 = smov [#allocation21]  ;;  %vm346_vm0 = vcmp.eq.s32.totalorder %v342_v7, %v339_v6 }
  0x22   : > { %317 = vst [vmem:[#allocation6] sm:$0x3] %v316_v11  ;;  %vm359_vm1 = vcmp.eq.s32.totalorder %v355_v7, %v352_v6  ;;  %s336_s15 = smov [#allocation12]  ;;  %s349_s16 = smov [#allocation18]  ;;  %vm1391_vm2 = vcmp.lt.s32.totalorder %v1761_v6, 2  ;;  %v1383_v6 = vmov %v1761_v6  ;;  %v1386_v7 = vmov %v1763_v7 }
  0x23   : > { %s326_s17 = smov [#allocation22]  ;;  %s329_s20 = smov [#allocation23]  ;;  %vm1396_vm3 = vcmp.eq.s32.totalorder %v1386_v7, %v1383_v6  ;;  %v1434_v6 = vmov %v1761_v6  ;;  %v1403_v7 = vmov %v1763_v7 }
  0x24   : > { %v343_v12 = vld [vmem:[%s336_s15] sm:$0x3]  ;;  %s1387_s30 = smov [#allocation20]  ;;  %s1404_s21 = smov [#allocation21]  ;;  %v1400_v6 = vmov %v1761_v6  ;;  %v1437_v7 = vmov %v1763_v7 }
  0x25   : > { %v356_v13 = vld [vmem:[%s349_s16] sm:$0x3]  ;;  %v347_v16 = vsel %vm346_vm0, 1.0, %v343_v12  ;;  %s1421_s22 = smov [#allocation22]  ;;  %v1417_v6 = vmov %v1761_v6  ;;  %v1420_v7 = vmov %v1763_v7  ;;  %vm1447_vm4 = vcmp.eq.s32.totalorder %v1437_v7, %v1434_v6 }
  0x26   : > { %v360_v17 = vsel %vm359_vm1, 1.0, %v356_v13  ;;  %348 = vst [vmem:[%s336_s15] sm:$0x3] %v347_v16 }
  0x27   : > { %v321_v14 = vld [vmem:[#allocation0] sm:$0xff]  ;;  %v324_v15 = vld [vmem:[#allocation2] sm:$0xff]  ;;  %361 = vst [vmem:[%s349_s16] sm:$0x3] %v360_v17 }
  0x28   : > { %322 = vst [vmem:[%s320_s29] sm:$0xff] %v321_v14  ;;  %325 = vst [vmem:[%s323_s14] sm:$0xff] %v324_v15  ;;  %v327_v18 = vld [vmem:[#allocation4] sm:$0xff]  ;;  %s1438_s29 = smov [#allocation23] }
  0x29   : > { %v330_v19 = vld [vmem:[#allocation6] sm:$0xff]  ;;  %328 = vst [vmem:[%s326_s17] sm:$0xff] %v327_v18 }
  0x2a   : > { %331 = vst [vmem:[%s329_s20] sm:$0xff] %v330_v19 }
  0x2f   : > { %v1393_v20 = vld [vmem:[%s1387_s30] sm:$0x3] }
  0x30   : > { %v1410_v21 = vld [vmem:[%s1404_s21] sm:$0x3]  ;;  %v1394_v22 = vsel %vm1391_vm2, %v1393_v20, 0.0 }
  0x31   : > { %v1411_v23 = vsel %vm1391_vm2, %v1410_v21, 0.0  ;;  %v1427_v24 = vld [vmem:[%s1421_s22] sm:$0x3]  ;;  %v1395_v26 = vmul.f32 %v1394_v22, %v1394_v22 }
  0x32   : > { %v1444_v25 = vld [vmem:[%s1438_s29] sm:$0x3]  ;;  %v1412_v27 = vmul.f32 %v1411_v23, %v1411_v23  ;;  %v1428_v28 = vsel %vm1391_vm2, %v1427_v24, 0.0 }
  0x33   : > { %v1445_v29 = vsel %vm1391_vm2, %v1444_v25, 0.0  ;;  %v1429_v30 = vmul.f32 %v1428_v28, %v1428_v28  ;;  %v1397_v33 = vsel %vm1396_vm3, 0.0, %v1395_v26 }
  0x34   : > { %v1414_v31 = vadd.f32 %v1412_v27, %v1395_v26  ;;  %v1446_v32 = vmul.f32 %v1445_v29, %v1445_v29  ;;  %v1413_v34 = vadd.f32 %v1412_v27, %v1397_v33 }
  0x36   : > { %v1431_v35 = vadd.f32 %v1429_v30, %v1414_v31  ;;  %v1430_v36 = vadd.f32 %v1429_v30, %v1413_v34  ;;  %v1448_v37 = vsel %vm1447_vm4, 0.0, %v1446_v32 }
  0x38   : > { %v1450_v38 = vadd.f32 %v1446_v32, %v1431_v35  ;;  %v1449_v39 = vadd.f32 %v1448_v37, %v1430_v36 }
  0x3a   : > { %1451 = vadd.xlane.f32.xlu0 %v1450_v38 }
  0x3e   : > { %1459 = vadd.xlane.f32.xlu0 %v1449_v39 }
  0xc7   : > { %v1452_v40 = vpop.xlane.xlu0 %1451 }
  0xc8   : > { %v1453_v41 = vrot.slane %v1452_v40, 4 }
  0xca   : > { %v1454_v42 = vadd.f32 %v1453_v41, %v1452_v40 }
  0xcb   : > { %v1460_v43 = vpop.xlane.xlu0 %1459 }
  0xcc   : > { %v1455_v44 = vrot.slane %v1454_v42, 2  ;;  %v1461_v45 = vrot.slane %v1460_v43, 4 }
  0xce   : > { %v1462_v46 = vadd.f32 %v1461_v45, %v1460_v43  ;;  %v1456_v47 = vadd.f32 %v1455_v44, %v1454_v42 }
  0xd0   : > { %v1463_v48 = vrot.slane %v1462_v46, 2  ;;  %v1457_v50 = vrot.slane %v1456_v47, 1 }
  0xd2   : > { %v1464_v49 = vadd.f32 %v1463_v48, %v1462_v46  ;;  %v1458_v53 = vadd.f32 %v1457_v50, %v1456_v47 }
  0xd4   : > { %v1465_v51 = vrot.slane %v1464_v49, 1 }
  0xd6   : > { %v1466_v52 = vadd.f32 %v1465_v51, %v1464_v49 }
  0xd8   : > { %1552 = vpush %v1466_v52 }
  0xd9   : > { %1554 = vpush %v1458_v53 }
 0x109   : > { %s1553_s14 = spop %1552 }
 0x10a   : > { %s1555_s15 = spop %1554 }
 0x10b   : > { %s1469_s16 = smul.f32 1e-10, %s1555_s15 }
 0x10d   : > { %p1470_p8 = scmp.le.f32.partialorder %s1553_s14, %s1469_s16 }
 0x10e   : > { %s1797_s17 = smov (!%p1470_p8), 0  }
 0x10f   : > { %1473 = sbr.rel (%p1470_p8) target bundleno = 953 (0x3b9), region = 467 }
 0x116 LB: >> { %s1802_s20 = smov 0   ;;  %s1645_s17 = sphi %s1797_s17, %s2042_s17  }
 0x117 LB: >>> { %s466_s30 = smov [#allocation20]  ;;  %v470_v6 = vmov %v1761_v6  ;;  %v473_v7 = vmov %v1763_v7  ;;  %s486_s21 = smov [#allocation21]  ;;  %vm789_vm14 = vcmp.eq.s32.totalorder %v1763_v7, 0  ;;  %vm801_vm15 = vcmp.eq.s32.totalorder %v1763_v7, 1  ;;  %s1649_s20 = sphi %s1802_s20, %s465_s20  }
 0x118   : >>> { %v490_v6 = vmov %v1761_v6  ;;  %v493_v7 = vmov %v1763_v7  ;;  %v474_v54 = vld [vmem:[%s466_s30] sm:$0x3]  ;;  %vm477_vm5 = vcmp.eq.s32.totalorder %v473_v7, %v470_v6  ;;  %s506_s22 = smov [#allocation23]  ;;  %s467_s29 = smov [#allocation24] }
 0x119   : >>> { %vm497_vm6 = vcmp.eq.s32.totalorder %v493_v7, %v490_v6  ;;  %v510_v6 = vmov %v1761_v6  ;;  %v513_v7 = vmov %v1763_v7  ;;  %v478_v55 = vsel %vm477_vm5, %v474_v54, 0.0  ;;  %v494_v56 = vld [vmem:[%s486_s21] sm:$0x3]  ;;  %s487_s14 = smov [#allocation25]  ;;  %s507_s15 = smov [#allocation26] }
 0x11a   : >>> { %vm517_vm7 = vcmp.eq.s32.totalorder %v513_v7, %v510_v6  ;;  %v479_v57 = vrot.slane %v478_v55, 4  ;;  %v498_v58 = vsel %vm497_vm6, %v494_v56, 0.0  ;;  %v514_v59 = vld [vmem:[%s506_s22] sm:$0x3]  ;;  %s530_s16 = smov [#allocation25]  ;;  %s528_s30 = smov [#allocation24]  ;;  %v579_v6 = vmov %v1761_v6 }
 0x11b   : >>> { %v499_v60 = vrot.slane %v498_v58, 4  ;;  %v518_v61 = vsel %vm517_vm7, %v514_v59, 0.0  ;;  %s532_s21 = smov [#allocation26]  ;;  %s567_s22 = smov [#allocation27]  ;;  %v582_v7 = vmov %v1763_v7  ;;  %v594_v6 = vmov %v1761_v6 }
 0x11c   : >>> { %v480_v62 = vadd.f32 %v479_v57, %v478_v55  ;;  %v519_v63 = vrot.slane %v518_v61, 4  ;;  %v597_v7 = vmov %v1763_v7  ;;  %vm584_vm12 = vcmp.eq.s32.totalorder %v582_v7, %v579_v6  ;;  %s1821_s24 = smov [#allocation22]  ;;  %s1827_s23 = smov [#allocation14] }
 0x11d   : >>> { %v500_v0 = vadd.f32 %v499_v60, %v498_v58  ;;  %vm599_vm13 = vcmp.eq.s32.totalorder %v597_v7, %v594_v6  ;;  %s829_s11 = smov [#allocation31]  ;;  %s1833_s27 = smov [#allocation18]  ;;  %v615_v55 = vld [vmem:[%s1821_s24] sm:$0x3]  ;;  %v692_v6 = vmov %v1761_v6  ;;  %v695_v7 = vmov %v1763_v7 }
 0x11e   : >>> { %v481_v1 = vrot.slane %v480_v62, 2  ;;  %v520_v2 = vadd.f32 %v519_v63, %v518_v61  ;;  %v838_v58 = vld [vmem:[%s1827_s23] sm:$0x3]  ;;  %s607_s26 = smov [#allocation32]  ;;  %s831_s25 = smov [#allocation32]  ;;  %v706_v6 = vmov %v1761_v6  ;;  %v709_v7 = vmov %v1763_v7 }
 0x11f   : >>> { %v501_v3 = vrot.slane %v500_v0, 2  ;;  %v840_v61 = vld [vmem:[%s1833_s27] sm:$0x3]  ;;  %vm699_vm0 = vcmp.eq.s32.totalorder %v695_v7, %v692_v6  ;;  %v665_v6 = vmov %v1761_v6  ;;  %v668_v7 = vmov %v1763_v7  ;;  %s465_s20 = sadd.s32 1, %s1649_s20  }
 0x120   : >>> { %v482_v4 = vadd.f32 %v481_v1, %v480_v62  ;;  %v521_v5 = vrot.slane %v520_v2, 2  ;;  %v679_v6 = vmov %v1761_v6  ;;  %v682_v7 = vmov %v1763_v7  ;;  %p462_p9 = scmp.ge.s32.totalorder %s465_s20, 3  }
 0x121   : >>> { %v502_v8 = vadd.f32 %v501_v3, %v500_v0  ;;  %vm714_vm1 = vcmp.eq.s32.totalorder %v709_v7, %v706_v6  ;;  %vm673_vm3 = vcmp.eq.s32.totalorder %v668_v7, %v665_v6  ;;  %vm686_vm4 = vcmp.eq.s32.totalorder %v682_v7, %v679_v6 }
 0x122   : >>> { %v483_v9 = vrot.slane %v482_v4, 1  ;;  %v522_v10 = vadd.f32 %v521_v5, %v520_v2  ;;  %vm728_vm5 = vcmp.eq.s32.totalorder %v1761_v6, 0  ;;  %vm732_vm6 = vcmp.eq.s32.totalorder %v1761_v6, 1 }
 0x123   : >>> { %v503_v11 = vrot.slane %v502_v8, 1  ;;  %v366_v6 = vmov (%p462_p9), %v1761_v6  ;;  %v369_v7 = vmov (%p462_p9), %v1763_v7 }
 0x124   : >>> { %v484_v12 = vadd.f32 %v483_v9, %v482_v4  ;;  %v523_v13 = vrot.slane %v522_v10, 1  ;;  %v419_v6 = vmov (%p462_p9), %v1761_v6  ;;  %vm381_vm7 = vcmp.eq.s32.totalorder (%p462_p9), %v369_v7, %v366_v6 }
 0x125   : >>> { %v504_v14 = vadd.f32 %v503_v11, %v502_v8  ;;  %v422_v7 = vmov (%p462_p9), %v1763_v7  ;;  %v385_v6 = vmov (%p462_p9), %v1761_v6 }
 0x126   : >>> { %485 = vst [vmem:[%s467_s29] sm:$0x1] %v484_v12  ;;  %v524_v15 = vadd.f32 %v523_v13, %v522_v10  ;;  %s569_s29 = smov [#allocation28]  ;;  %v388_v7 = vmov (%p462_p9), %v1763_v7  ;;  %v402_v6 = vmov (%p462_p9), %v1761_v6 }
 0x127   : >>> { %505 = vst [vmem:[%s487_s14] sm:$0x1] %v504_v14  ;;  %s526_s14 = smov [#allocation29]  ;;  %v405_v7 = vmov (%p462_p9), %v1763_v7 }
 0x128   : >>> { %525 = vst [vmem:[%s507_s15] sm:$0x1] %v524_v15  ;;  %s527_s15 = smov [#allocation30]  ;;  %s571_s14 = smov %s526_s14 }
 0x129   : >>> { %s573_s15 = smov %s527_s15 }
 0x12d   : >>> { %v529_v18 = vld [vmem:[%s528_s30] sm:$0xff]  ;;  %s590_s30 = smov [#allocation30] }
 0x12e   : >>> { %v531_v16 = vld [vmem:[%s530_s16] sm:$0xff]  ;;  %v552_v31 = vand.u32 2147483647, %v529_v18  ;;  %s575_s16 = smov [#allocation29] }
 0x12f   : >>> { %v535_v17 = vmul.f32 2.0, %v531_v16  ;;  %v533_v19 = vld [vmem:[%s532_s21] sm:$0xff]  ;;  %v553_v36 = vand.u32 2147483647, %v531_v16  ;;  %s588_s21 = smov [#allocation31] }
 0x130   : >>> { %v534_v20 = vsub.f32 %v533_v19, %v529_v18  ;;  %v554_v32 = vand.u32 2147483647, %v533_v19 }
 0x131   : >>> { %1603 = vrcp.f32 %v535_v17 }
 0x132   : >>> { %v555_v35 = vmin.f32 %v552_v31, %v554_v32 }
 0x134   : >>> { %v556_v37 = vmul.f32 1.1920929e-08, %v555_v35 }
 0x136   : >>> { %vm557_vm11 = vcmp.le.f32.partialorder %v553_v36, %v556_v37 }
 0x13b   : >>> { %v1604_v21 = vpop.eup %1603 }
 0x13c   : >>> { %v537_v22 = vmul.f32 %v1604_v21, %v534_v20 }
 0x13e   : >>> { %v539_v23 = vmul.f32 %v537_v22, %v537_v22  ;;  %vm538_vm10 = vcmp.ge.f32.partialorder %v537_v22, 0.0 }
 0x140   : >>> { %v540_v24 = vadd.f32 1.0, %v539_v23 }
 0x142   : >>> { %1605 = vrsqrt.f32 %v540_v24  ;;  %vm543_vm8 = vcmp.eq.f32.partialorder %v540_v24, inf  ;;  %v546_v26 = vand.u32 2147483648, %v540_v24  ;;  %vm545_vm9 = vcmp.eq.f32.partialorder %v540_v24, 0.0 }
 0x14c   : >>> { %v1606_v25 = vpop.eup %1605 }
 0x14d   : >>> { %v542_v27 = vmul.f32 %v1606_v25, %v540_v24 }
 0x14f   : >>> { %v544_v28 = vsel %vm543_vm8, %v540_v24, %v542_v27  ;;  %vm434_vm8 = vcmp.eq.s32.totalorder (%p462_p9), %v422_v7, %v419_v6 }
 0x150   : >>> { %v547_v29 = vsel %vm545_vm9, %v546_v26, %v544_v28 }
 0x151   : >>> { %v548_v30 = vxor.u32 2147483648, %v547_v29 }
 0x153   : >>> { %v549_v33 = vsel %vm538_vm10, %v547_v29, %v548_v30 }
 0x154   : >>> { %v550_v34 = vadd.f32 %v549_v33, %v537_v22 }
 0x156   : >>> { %1607 = vrcp.f32 %v550_v34 }
 0x160   : >>> { %v1608_v38 = vpop.eup %1607 }
 0x161   : >>> { %v558_v39 = vsel %vm557_vm11, 0.0, %v1608_v38 }
 0x162   : >>> { %v559_v40 = vmul.f32 %v558_v39, %v558_v39  ;;  %v563_v41 = vmul.f32 %v558_v39, %v531_v16 }
 0x164   : >>> { %v560_v42 = vadd.f32 1.0, %v559_v40  ;;  %v564_v43 = vsub.f32 %v529_v18, %v563_v41  ;;  %v566_v44 = vadd.f32 %v563_v41, %v533_v19 }
 0x166   : >>> { %1609 = vrsqrt.f32 %v560_v42  ;;  %568 = vst [vmem:[%s567_s22] sm:$0xff] %v564_v43  ;;  %570 = vst [vmem:[%s569_s29] sm:$0xff] %v566_v44  ;;  %s605_s22 = smov [#allocation31]  ;;  %s1817_s29 = smov [#allocation20] }
 0x167   : >>> { %v613_v53 = vld [vmem:[%s1817_s29] sm:$0x3] }
 0x170   : >>> { %v1610_v45 = vpop.eup %1609 }
 0x171   : >>> { %572 = vst [vmem:[%s571_s14] sm:$0xff] %v1610_v45  ;;  %v562_v46 = vmul.f32 %v1610_v45, %v558_v39  ;;  %s603_s14 = smov [#allocation32] }
 0x173   : >>> { %574 = vst [vmem:[%s573_s15] sm:$0xff] %v562_v46  ;;  %s1819_s15 = smov [#allocation21] }
 0x174   : >>> { %v614_v54 = vld [vmem:[%s1819_s15] sm:$0x3] }
 0x178   : >>> { %v576_v47 = vld [vmem:[%s575_s16] ss:$0 sm:$0xff]  ;;  %s1823_s16 = smov [#allocation23] }
 0x179   : >>> { %v585_v48 = vsel %vm584_vm12, %v576_v47, 0.0  ;;  %v616_v56 = vld [vmem:[%s1823_s16] sm:$0x3] }
 0x17a   : >>> { %586 = vadd.xlane.f32.xlu0 %v585_v48  ;;  %v591_v49 = vld [vmem:[%s590_s30] ss:$0 sm:$0xff]  ;;  %s1825_s30 = smov [#allocation12] }
 0x17b   : >>> { %v600_v50 = vsel %vm599_vm13, %v591_v49, 0.0  ;;  %v837_v57 = vld [vmem:[%s1825_s30] sm:$0x3] }
 0x17e   : >>> { %601 = vadd.xlane.f32.xlu0 %v600_v50 }
 0x207   : >>> { %v587_v51 = vpop.xlane.xlu0 %586 }
 0x208   : >>> { %589 = vst [vmem:[%s588_s21] sm:$0xff] %v587_v51  ;;  %s1829_s21 = smov [#allocation16] }
 0x209   : >>> { %v839_v59 = vld [vmem:[%s1829_s21] sm:$0x3] }
 0x20b   : >>> { %v602_v52 = vpop.xlane.xlu0 %601 }
 0x20c   : >>> { %604 = vst [vmem:[%s603_s14] sm:$0xff] %v602_v52  ;;  %s1853_s14 = smov [#allocation23] }
 0x20f   : >>> { %v606_v60 = vld [vmem:[%s605_s22] sm:$0xff]  ;;  %s1851_s22 = smov [#allocation22] }
 0x210   : >>> { %v830_v62 = vld [vmem:[%s829_s11] sm:$0xff]  ;;  %v617_v63 = vmul.f32 %v613_v53, %v606_v60  ;;  %v620_v0 = vmul.f32 %v614_v54, %v606_v60  ;;  %v624_v1 = vmul.f32 %v615_v55, %v606_v60  ;;  %v627_v2 = vmul.f32 %v616_v56, %v606_v60  ;;  %s1849_s11 = smov [#allocation12] }
 0x211   : >>> { %v841_v3 = vmul.f32 %v837_v57, %v830_v62  ;;  %v844_v4 = vmul.f32 %v838_v58, %v830_v62  ;;  %v848_v5 = vmul.f32 %v839_v59, %v830_v62  ;;  %v851_v8 = vmul.f32 %v840_v61, %v830_v62 }
 0x213   : >>> { %v608_v9 = vld [vmem:[%s607_s26] sm:$0xff]  ;;  %s635_s26 = smov [#allocation30] }
 0x214   : >>> { %v832_v10 = vld [vmem:[%s831_s25] sm:$0xff]  ;;  %v618_v11 = vmul.f32 %v615_v55, %v608_v9  ;;  %v621_v12 = vmul.f32 %v616_v56, %v608_v9  ;;  %v623_v13 = vmul.f32 %v613_v53, %v608_v9  ;;  %v626_v14 = vmul.f32 %v614_v54, %v608_v9  ;;  %s633_s25 = smov [#allocation29] }
 0x215   : >>> { %v842_v15 = vmul.f32 %v839_v59, %v832_v10  ;;  %v845_v16 = vmul.f32 %v840_v61, %v832_v10  ;;  %v847_v17 = vmul.f32 %v837_v57, %v832_v10  ;;  %v850_v18 = vmul.f32 %v838_v58, %v832_v10  ;;  %v634_v27 = vld [vmem:[%s633_s25] ss:$0 sm:$0xff]  ;;  %s662_s25 = smov [#allocation27] }
 0x216   : >>> { %v619_v19 = vsub.f32 %v617_v63, %v618_v11  ;;  %v622_v20 = vsub.f32 %v620_v0, %v621_v12  ;;  %v625_v21 = vadd.f32 %v624_v1, %v623_v13  ;;  %v628_v22 = vadd.f32 %v627_v2, %v626_v14  ;;  %v636_v28 = vld [vmem:[%s635_s26] ss:$0 sm:$0xff]  ;;  %s661_s26 = smov [#allocation20] }
 0x217   : >>> { %v843_v23 = vsub.f32 %v841_v3, %v842_v15  ;;  %v846_v24 = vsub.f32 %v844_v4, %v845_v16  ;;  %v849_v25 = vadd.f32 %v848_v5, %v847_v17  ;;  %v852_v26 = vadd.f32 %v851_v8, %v850_v18  ;;  %v669_v63 = vld [vmem:[%s662_s25] ss:$0 sm:$0xff]  ;;  %s905_s25 = sadd.s32 (%p462_p9), 1, %s1645_s17  }
 0x218   : >>> { %630 = vst [vmem:[%s1819_s15] sm:$0x3] %v622_v20  ;;  %632 = vst [vmem:[%s1823_s16] sm:$0x3] %v628_v22  ;;  %s1855_s15 = smov [#allocation20]  ;;  %s703_s16 = smov [#allocation28] }
 0x219   : >>> { %629 = vst [vmem:[%s1817_s29] sm:$0x3] %v619_v19  ;;  %631 = vst [vmem:[%s1821_s24] sm:$0x3] %v625_v21  ;;  %s1857_s24 = smov [#allocation16]  ;;  %s1865_s29 = smov [#allocation21]  ;;  %v710_v59 = vld [vmem:[%s703_s16] ss:$0 sm:$0xff] }
 0x21a   : >>> { %853 = vst [vmem:[%s1825_s30] sm:$0x3] %v843_v23  ;;  %854 = vst [vmem:[%s1827_s23] sm:$0x3] %v846_v24  ;;  %s1859_s23 = smov [#allocation14]  ;;  %s689_s30 = smov [#allocation22] }
 0x21b   : >>> { %855 = vst [vmem:[%s1829_s21] sm:$0x3] %v849_v25  ;;  %856 = vst [vmem:[%s1833_s27] sm:$0x3] %v852_v26  ;;  %s1863_s27 = smov [#allocation18]  ;;  %s702_s21 = smov [#allocation23] }
 0x21c   : >>> { %s805_s16 = smov [#allocation21]  ;;  %p458_p10 = scmp.ge.s32.totalorder (%p462_p9), %s905_s25, 15 }
 0x21d   : >> { %s2042_s17 = smov (%p462_p9), %s905_s25 }
 0x21f   : >>> { %v644_v30 = vld [vmem:[%s1853_s14] sm:$0x3] }
 0x220   : >>> { %v643_v29 = vld [vmem:[%s1851_s22] sm:$0x3]  ;;  %v652_v36 = vmul.f32 %v644_v30, %v636_v28  ;;  %v655_v42 = vmul.f32 %v644_v30, %v634_v27 }
 0x221   : >>> { %v641_v31 = vld [vmem:[%s1855_s15] sm:$0x3]  ;;  %v651_v35 = vmul.f32 %v643_v29, %v634_v27  ;;  %v654_v37 = vmul.f32 %v643_v29, %v636_v28 }
 0x222   : >>> { %v859_v32 = vld [vmem:[%s1849_s11] ss:$0 sm:$0xff]  ;;  %v1531_v34 = vld [vmem:[%s1849_s11 + $0x1] ss:$0 sm:$0xff]  ;;  %v645_v48 = vmul.f32 %v641_v31, %v634_v27  ;;  %v648_v49 = vmul.f32 %v641_v31, %v636_v28 }
 0x223   : >>> { %v1530_v33 = vld [vmem:[%s1849_s11 - $0x1] sm:$0x2]  ;;  %v1533_v40 = vld [vmem:[%s1857_s24 + $0x1] sm:$0x1]  ;;  %v653_v47 = vsub.f32 %v651_v35, %v652_v36  ;;  %v656_v53 = vadd.f32 %v655_v42, %v654_v37 }
 0x224   : >>> { %v866_v38 = vsel %vm789_vm14, %v859_v32, %v1530_v33  ;;  %v870_v39 = vld [vmem:[%s1857_s24] ss:$0 sm:$0xff]  ;;  %v878_v43 = vsel %vm801_vm15, %v1531_v34, %v1533_v40  ;;  %v1535_v45 = vld [vmem:[%s1859_s23 + $0x1] ss:$0 sm:$0xff] }
 0x225   : >>> { %v883_v41 = vld [vmem:[%s1859_s23] ss:$0 sm:$0xff]  ;;  %869 = vst [vmem:[%s1849_s11] sm:$0x3] %v866_v38  ;;  %880 = vst [vmem:[%s1857_s24] sm:$0x3] %v878_v43  ;;  %v1537_v51 = vld [vmem:[%s1863_s27 + $0x1] sm:$0x1] }
 0x226   : >>> { %v1534_v44 = vld [vmem:[%s1859_s23 - $0x1] sm:$0x2]  ;;  %1532 = vst [vmem:[%s1849_s11 + $0x1] sm:$0x1] %v870_v39  ;;  %v902_v54 = vsel %vm801_vm15, %v1535_v45, %v1537_v51  ;;  %659 = vst [vmem:[%s1851_s22] sm:$0x3] %v653_v47  ;;  %s676_s11 = smov [#allocation21] }
 0x227   : >>> { %v894_v46 = vld [vmem:[%s1863_s27] ss:$0 sm:$0xff]  ;;  %v890_v50 = vsel %vm789_vm14, %v883_v41, %v1534_v44  ;;  %660 = vst [vmem:[%s1853_s14] sm:$0x3] %v656_v53  ;;  %s1907_s22 = smov [#allocation22]  ;;  %s1652_s14 = smov 1  }
 0x228   : >>> { %v642_v52 = vld [vmem:[%s1865_s29] sm:$0x3]  ;;  %893 = vst [vmem:[%s1859_s23] sm:$0x3] %v890_v50  ;;  %904 = vst [vmem:[%s1863_s27] sm:$0x3] %v902_v54  ;;  %s718_s24 = smov [#allocation21]  ;;  %s1910_s27 = smov [#allocation23] }
 0x229   : >>> { %v646_v55 = vmul.f32 %v642_v52, %v636_v28  ;;  %v649_v56 = vmul.f32 %v642_v52, %v634_v27  ;;  %1536 = vst [vmem:[%s1859_s23 + $0x1] sm:$0x1] %v894_v46  ;;  %s1653_s23 = smov 127  }
 0x22b   : >>> { %v647_v57 = vsub.f32 %v645_v48, %v646_v55  ;;  %v650_v58 = vadd.f32 %v649_v56, %v648_v49 }
 0x22d   : >>> { %657 = vst [vmem:[%s1855_s15] sm:$0x3] %v647_v57  ;;  %658 = vst [vmem:[%s1865_s29] sm:$0x3] %v650_v58  ;;  %v696_v60 = vld [vmem:[%s689_s30] sm:$0x3]  ;;  %s717_s15 = smov [#allocation20]  ;;  %s781_s29 = smov [#allocation20] }
 0x22e   : >>> { %v700_v61 = vsel %vm699_vm0, 0.0, %v696_v60  ;;  %v711_v62 = vld [vmem:[%s702_s21] sm:$0x3] }
 0x22f   : >>> { %701 = vst [vmem:[%s689_s30] sm:$0x3] %v700_v61  ;;  %v715_v0 = vsel %vm714_vm1, %v710_v59, %v711_v62  ;;  %s782_s30 = smov [#allocation22] }
 0x230   : >>> { %716 = vst [vmem:[%s702_s21] sm:$0x3] %v715_v0  ;;  %s806_s21 = smov [#allocation23] }
 0x234   : >>> { %v670_v1 = vld [vmem:[%s661_s26] sm:$0x3] }
 0x235   : >>> { %v683_v2 = vld [vmem:[%s676_s11] sm:$0x3]  ;;  %v674_v3 = vsel %vm673_vm3, %v669_v63, %v670_v1 }
 0x236   : >>> { %v687_v4 = vsel %vm686_vm4, 0.0, %v683_v2  ;;  %675 = vst [vmem:[%s661_s26] sm:$0x3] %v674_v3  ;;  %v755_v5 = vld [vmem:[%s1907_s22] sm:$0x3]  ;;  %s370_s26 = smov (%p462_p9), [#allocation20] }
 0x237   : >>> { %688 = vst [vmem:[%s676_s11] sm:$0x3] %v687_v4  ;;  %756 = vrot.lane.b32.xlu0 %v755_v5, %s1652_s14  ;;  %v751_v11 = vld [vmem:[%s1910_s27] sm:$0x3]  ;;  %s389_s11 = smov (%p462_p9), [#allocation21] }
 0x238   : >>> { %v772_v12 = vld [vmem:[%s1910_s27] sm:$0x3] }
 0x239   : >>> { %v754_v30 = vld [vmem:[%s1907_s22] sm:$0x3] }
 0x23d   : >>> { %v723_v8 = vld [vmem:[%s717_s15] sm:$0x3] }
 0x23e   : >>> { %724 = vrot.lane.b32.xlu1 %v723_v8, %s1652_s14  ;;  %v719_v9 = vld [vmem:[%s718_s24] sm:$0x3] }
 0x23f   : >>> { %v740_v10 = vld [vmem:[%s718_s24] sm:$0x3] }
 0x240   : >>> { %v722_v18 = vld [vmem:[%s717_s15] sm:$0x3] }
 0x242   : >>> { %720 = vrot.lane.b32.xlu1 %v719_v9, %s1652_s14 }
 0x246   : >>> { %741 = vrot.lane.b32.xlu1 %v740_v10, %s1653_s23 }
 0x24a   : >>> { %752 = vrot.lane.b32.xlu1 %v751_v11, %s1652_s14  ;;  %s423_s14 = smov (%p462_p9), [#allocation23] }
 0x24e   : >>> { %773 = vrot.lane.b32.xlu1 %v772_v12, %s1653_s23 }
 0x2a9   : >>> { %v757_v20 = vpop.permute.xlu0 %756 }
 0x2aa   : >>> { %v761_v22 = vsel %vm728_vm5, %v755_v5, %v757_v20 }
 0x2b0   : >>> { %v725_v13 = vpop.permute.xlu1 %724 }
 0x2b1   : >>> { %v729_v14 = vsel %vm728_vm5, %v723_v8, %v725_v13 }
 0x2b4   : >>> { %v721_v15 = vpop.permute.xlu1 %720 }
 0x2b5   : >>> { %v733_v16 = vsel %vm732_vm6, %v721_v15, %v729_v14 }
 0x2b6   : >>> { %v739_v17 = vsel %vm1391_vm2, %v733_v16, 0.0 }
 0x2b7   : >>> { %747 = vst [vmem:[%s717_s15] sm:$0x3] %v739_v17 }
 0x2b8   : >>> { %v742_v19 = vpop.permute.xlu1 %741 }
 0x2b9   : >>> { %v746_v21 = vsel %vm732_vm6, %v722_v18, %v742_v19 }
 0x2ba   : >>> { %748 = vst [vmem:[%s718_s24] sm:$0x3] %v746_v21 }
 0x2bc   : >>> { %v753_v23 = vpop.permute.xlu1 %752 }
 0x2bd   : >>> { %v765_v24 = vsel %vm732_vm6, %v753_v23, %v761_v22 }
 0x2be   : >>> { %v783_v25 = vld [vmem:[%s781_s29] ss:$0 sm:$0xff]  ;;  %v1523_v27 = vld [vmem:[%s781_s29 + $0x1] ss:$0 sm:$0xff]  ;;  %v771_v29 = vsel %vm1391_vm2, %v765_v24, 0.0 }
 0x2bf   : >>> { %v1522_v26 = vld [vmem:[%s781_s29 - $0x1] sm:$0x2]  ;;  %779 = vst [vmem:[%s1907_s22] sm:$0x3] %v771_v29  ;;  %s406_s22 = smov (%p462_p9), [#allocation22] }
 0x2c0   : >>> { %v790_v28 = vsel %vm789_vm14, %v783_v25, %v1522_v26  ;;  %v774_v31 = vpop.permute.xlu1 %773 }
 0x2c1   : >>> { %793 = vst [vmem:[%s781_s29] sm:$0x3] %v790_v28  ;;  %v807_v32 = vld [vmem:[%s805_s16] ss:$0 sm:$0xff]  ;;  %v1527_v34 = vld [vmem:[%s805_s16 + $0x1] ss:$0 sm:$0xff]  ;;  %v778_v35 = vsel %vm732_vm6, %v754_v30, %v774_v31 }
 0x2c2   : >>> { %v1526_v33 = vld [vmem:[%s805_s16 - $0x1] sm:$0x2]  ;;  %780 = vst [vmem:[%s1910_s27] sm:$0x3] %v778_v35 }
 0x2c3   : >>> { %v814_v36 = vsel %vm789_vm14, %v807_v32, %v1526_v33 }
 0x2c4   : >>> { %817 = vst [vmem:[%s805_s16] sm:$0x3] %v814_v36 }
 0x2c6   : >>> { %v794_v37 = vld [vmem:[%s782_s30] ss:$0 sm:$0xff]  ;;  %v1525_v38 = vld [vmem:[%s782_s30 + $0x1] sm:$0x1] }
 0x2c7   : >>> { %1524 = vst [vmem:[%s781_s29 + $0x1] sm:$0x1] %v794_v37  ;;  %v802_v39 = vsel %vm801_vm15, %v1523_v27, %v1525_v38  ;;  %464 = sbr.rel (!%p462_p9) target bundleno = 279 (0x117), region = 462 }
 0x2c8   : >>> { %804 = vst [vmem:[%s782_s30] sm:$0x3] %v802_v39 }
 0x2c9   : >>> { %v818_v40 = vld [vmem:[%s806_s21] ss:$0 sm:$0xff]  ;;  %v1529_v41 = vld [vmem:[%s806_s21 + $0x1] sm:$0x1] }
 0x2ca   : >>> { %1528 = vst [vmem:[%s805_s16 + $0x1] sm:$0x1] %v818_v40  ;;  %v826_v42 = vsel %vm801_vm15, %v1527_v34, %v1529_v41 }
 0x2cb   : >>> { %828 = vst [vmem:[%s806_s21] sm:$0x3] %v826_v42 }
 0x2ce   : >> { %v376_v43 = vld [vmem:[%s370_s26] sm:$0x3] }
 0x2cf   : >> { %v377_v45 = vsel %vm1391_vm2, %v376_v43, 0.0  ;;  %v412_v47 = vld [vmem:[%s406_s22] sm:$0x3] }
 0x2d0   : >> { %v378_v49 = vmul.f32 %v377_v45, %v377_v45  ;;  %v413_v51 = vsel %vm1391_vm2, %v412_v47, 0.0 }
 0x2d1   : >> { %v395_v44 = vld [vmem:[%s389_s11] sm:$0x3]  ;;  %v414_v53 = vmul.f32 %v413_v51, %v413_v51 }
 0x2d2   : >> { %v396_v46 = vsel %vm1391_vm2, %v395_v44, 0.0  ;;  %v429_v48 = vld [vmem:[%s423_s14] sm:$0x3]  ;;  %v382_v56 = vsel %vm381_vm7, 0.0, %v378_v49 }
 0x2d3   : >> { %v397_v50 = vmul.f32 %v396_v46, %v396_v46  ;;  %v430_v52 = vsel %vm1391_vm2, %v429_v48, 0.0 }
 0x2d4   : >> { %v431_v55 = vmul.f32 %v430_v52, %v430_v52 }
 0x2d5   : >> { %v399_v54 = vadd.f32 %v397_v50, %v378_v49  ;;  %v398_v57 = vadd.f32 %v397_v50, %v382_v56 }
 0x2d6   : >> { %v435_v60 = vsel %vm434_vm8, 0.0, %v431_v55 }
 0x2d7   : >> { %v416_v58 = vadd.f32 %v414_v53, %v399_v54  ;;  %v415_v59 = vadd.f32 %v414_v53, %v398_v57 }
 0x2d9   : >> { %v437_v61 = vadd.f32 %v431_v55, %v416_v58  ;;  %v436_v62 = vadd.f32 %v435_v60, %v415_v59 }
 0x2db   : >> { %438 = vadd.xlane.f32.xlu0 %v437_v61 }
 0x2df   : >> { %446 = vadd.xlane.f32.xlu0 %v436_v62 }
 0x368   : >> { %v439_v63 = vpop.xlane.xlu0 %438 }
 0x369   : >> { %v440_v0 = vrot.slane %v439_v63, 4 }
 0x36b   : >> { %v441_v1 = vadd.f32 %v440_v0, %v439_v63 }
 0x36c   : >> { %v447_v2 = vpop.xlane.xlu0 %446 }
 0x36d   : >> { %v442_v3 = vrot.slane %v441_v1, 2  ;;  %v448_v4 = vrot.slane %v447_v2, 4 }
 0x36f   : >> { %v449_v5 = vadd.f32 %v448_v4, %v447_v2  ;;  %v443_v8 = vadd.f32 %v442_v3, %v441_v1 }
 0x371   : >> { %v450_v9 = vrot.slane %v449_v5, 2  ;;  %v444_v11 = vrot.slane %v443_v8, 1 }
 0x373   : >> { %v451_v10 = vadd.f32 %v450_v9, %v449_v5  ;;  %v445_v14 = vadd.f32 %v444_v11, %v443_v8 }
 0x375   : >> { %v452_v12 = vrot.slane %v451_v10, 1 }
 0x377   : >> { %v453_v13 = vadd.f32 %v452_v12, %v451_v10 }
 0x379   : >> { %1556 = vpush %v453_v13 }
 0x37a   : >> { %1558 = vpush %v445_v14 }
 0x3aa   : >> { %s1557_s20 = spop %1556 }
 0x3ab   : >> { %s1559_s15 = spop %1558 }
 0x3ac   : >> { %s456_s24 = smul.f32 1e-10, %s1559_s15 }
 0x3ae   : >> { %p457_p11 = scmp.le.f32.partialorder %s1557_s20, %s456_s24 }
 0x3b0   : >> { %p459_p12 = por %p458_p10, %p457_p11 }
 0x3b2   : > { %907 = sbr.rel (!%p459_p12) target bundleno = 278 (0x116), region = 473 }
 0x3b9 PF: > { %s912_s23 = smov [#allocation20]  ;;  %v916_v6 = vmov %v1761_v6  ;;  %v919_v7 = vmov %v1763_v7  ;;  %v967_v15 = vld [vmem:[#allocation12] sm:$0x3]  ;;  %v973_v16 = vld [vmem:[#allocation14] sm:$0x3]  ;;  %s2043_s17 = scalar_lea.vmem [#allocation13], %s1757_s28 }
 0x3ba   : > { %v936_v6 = vmov %v1761_v6  ;;  %v939_v7 = vmov %v1763_v7  ;;  %v920_v17 = vld [vmem:[%s912_s23] sm:$0x3]  ;;  %vm923_vm9 = vcmp.eq.s32.totalorder %v919_v7, %v916_v6  ;;  %969 = vst [vmem:[%s2043_s17] sm:$0x3] %v967_v15  ;;  %s2044_s27 = scalar_lea.vmem [#allocation15], %s1757_s28  ;;  %s932_s29 = smov [#allocation23] }
 0x3bb   : > { %vm943_vm10 = vcmp.eq.s32.totalorder %v939_v7, %v936_v6  ;;  %975 = vst [vmem:[%s2044_s27] sm:$0x3] %v973_v16  ;;  %v979_v18 = vld [vmem:[#allocation16] sm:$0x3]  ;;  %v924_v19 = vsel %vm923_vm9, %v920_v17, 0.0  ;;  %s2045_s16 = scalar_lea.vmem [#allocation17], %s1757_s28  ;;  %s2046_s30 = scalar_lea.vmem [#allocation19], %s1757_s28 }
 0x3bc   : > { %981 = vst [vmem:[%s2045_s16] sm:$0x3] %v979_v18  ;;  %v985_v20 = vld [vmem:[#allocation18] sm:$0x3]  ;;  %v925_v21 = vrot.slane %v924_v19, 4  ;;  %v940_v22 = vld [vmem:[%s932_s29] sm:$0x3] }
 0x3bd   : > { %987 = vst [vmem:[%s2046_s30] sm:$0x3] %v985_v20  ;;  %v944_v23 = vsel %vm943_vm10, %v940_v22, 0.0  ;;  %s908_s21 = sand.u32 7, %s1720_s12   ;;  %s2047_s11 = scalar_lea.vmem [#allocation9], %s1759_s18 }
 0x3be   : > { %v926_v24 = vadd.f32 %v925_v21, %v924_v19  ;;  %v945_v25 = vrot.slane %v944_v23, 4  ;;  %s909_s25 = scalar_lea.vmem [#allocation8], %s908_s21  ;;  %s911_s26 = scalar_lea.vmem [#allocation10], %s908_s21 }
 0x3bf   : > { %s913_s25 = smov %s909_s25  ;;  %s933_s26 = smov %s911_s26 }
 0x3c0   : > { %v927_v26 = vrot.slane %v926_v24, 2  ;;  %v946_v6 = vadd.f32 %v945_v25, %v944_v23  ;;  %s2048_s22 = scalar_lea.vmem [#allocation11], %s1759_s18  ;;  %s1015_s14 = sshrl.u32 (%p1734_p3), %s1720_s12, 3 }
 0x3c1   : > { %s2049_s20 = scalar_lea.vmem (%p1734_p3), [#allocation9], %s1759_s18  ;;  %s1544_s15 = sshll.u32 (%p1734_p3), %s1015_s14, 1 }
 0x3c2   : > { %v928_v7 = vadd.f32 %v927_v26, %v926_v24  ;;  %v947_v27 = vrot.slane %v946_v6, 2  ;;  %s1017_s17 = scalar_lea.vmem (%p1734_p3), %s2034_s4, %s1544_s15 }
 0x3c4   : > { %v929_v28 = vrot.slane %v928_v7, 1  ;;  %v948_v29 = vadd.f32 %v947_v27, %v946_v6 }
 0x3c6   : > { %v930_v30 = vadd.f32 %v929_v28, %v928_v7  ;;  %v949_v31 = vrot.slane %v948_v29, 1 }
 0x3c8   : > { %931 = vst [vmem:[%s913_s25] sm:$0x1] %v930_v30  ;;  %v950_v32 = vadd.f32 %v949_v31, %v948_v29 }
 0x3ca   : > { %951 = vst [vmem:[%s933_s26] sm:$0x1] %v950_v32 }
 0x3cc   : > { %1014 = sbr.rel (!%p1734_p3) target bundleno = 985 (0x3d9), region = 158 }
 0x3cf   : > { %v955_v33 = vld [vmem:[#allocation8] sm:$0x3] }
 0x3d0   : > { %957 = vst [vmem:[%s2047_s11] sm:$0x3] %v955_v33 }
 0x3d1   : > { %v961_v34 = vld [vmem:[#allocation10] sm:$0x3] }
 0x3d2   : > { %963 = vst [vmem:[%s2048_s22] sm:$0x3] %v961_v34 }
 0x3d7   : > { %v1033_v35 = vld [vmem:[%s2049_s20] sm:$0x3] }
 0x3d8   : > { %1034 = vst [vmem:[%s1017_s17] sm:$0x3] %v1033_v35 }
 0x3d9 PF: > { %1051 = sbr.rel (!%p1734_p3) target bundleno = 993 (0x3e1), region = 192  ;;  %s1052_s27 = sshrl.u32 (%p1734_p3), %s1720_s12, 3 }
 0x3da   : > { %s2050_s29 = scalar_lea.vmem (%p1734_p3), [#allocation11], %s1759_s18  ;;  %s1545_s16 = sshll.u32 (%p1734_p3), %s1052_s27, 1 }
 0x3db   : > { %s1054_s25 = scalar_lea.vmem (%p1734_p3), %s2035_s5, %s1545_s16 }
 0x3df   : > { %v1070_v36 = vld [vmem:[%s2050_s29] sm:$0x3] (%p1734_p3) }
 0x3e0   : > { %1071 = vst [vmem:[%s1054_s25] sm:$0x3] %v1070_v36 }
 0x3e1 PF: > { %s1546_s26 = sshll.u32 %s1720_s12, 1  ;;  %s2051_s19 = scalar_lea.vmem [#allocation13], %s1757_s28 }
 0x3e2   : > { %v1103_v37 = vld [vmem:[%s2051_s19] sm:$0x3]  ;;  %s2052_s11 = scalar_lea.vmem [#allocation15], %s1757_s28  ;;  %s1087_s14 = scalar_lea.vmem %s2036_s6, %s1546_s26 }
 0x3e3   : > { %v1136_v38 = vld [vmem:[%s2052_s11] sm:$0x3]  ;;  %s1120_s24 = scalar_lea.vmem %s2037_s7, %s1546_s26  ;;  %s2053_s23 = scalar_lea.vmem [#allocation17], %s1757_s28  ;;  %1104 = vst [vmem:[%s1087_s14] sm:$0x3] %v1103_v37 }
 0x3e4   : > { %v1169_v39 = vld [vmem:[%s2053_s23] sm:$0x3]  ;;  %s2054_s17 = scalar_lea.vmem [#allocation19], %s1757_s28  ;;  %1137 = vst [vmem:[%s1120_s24] sm:$0x3] %v1136_v38  ;;  %s1153_s29 = scalar_lea.vmem %s2038_s8, %s1546_s26 }
 0x3e5   : > { %v1202_v40 = vld [vmem:[%s2054_s17] sm:$0x3]  ;;  %s1186_s21 = scalar_lea.vmem %s2039_s9, %s1546_s26  ;;  %1170 = vst [vmem:[%s1153_s29] sm:$0x3] %v1169_v39 }
 0x3e6   : > { %1203 = vst [vmem:[%s1186_s21] sm:$0x3] %v1202_v40 }
 0x3e7 PF: > { %s2055_s25 = sld [smem:[#allocation33_spill]]  ;;  %p13_p13 = scmp.ge.s32.totalorder %s1723_s13, 4  }
 0x3e8   : > { %s2056_s30 = smov %s1637_s10  ;;  %s2058_s11 = smov %s1723_s13 }
 0x3e9   :  { %15 = sbr.rel (!%p13_p13) target bundleno = 2 (0x2), region = 484 }
 0x3ed   : > { %s2057_s10 = smov %s2055_s25 }

// kernel: reverse
= control target key start
LH: loop header
LB: loop body
LE: loop exit
PB: predicated region body
PF: predicated region fallthrough
CT: control target
= control target key end

     0   :  { %v2_v0 = vlaneseq  ;;  %s105_s0 = inlined_call_operand.vmem [shape: f32[2,3], index: 0, kind: input, shape index: {}]   ;;  %s106_s1 = inlined_call_operand.vmem [shape: f32[2,3], index: 1, kind: output, shape index: {}]  }
   0x2   :  { %v3_v1 = vsub.s32 2, %v2_v0 }
   0x4   :  { %4 = vset.pattern.permute.xlu0 %v3_v1 }
   0x5   :  { %v20_v2 = vld [vmem:[%s105_s0] sm:$0x3] }
   0x6   :  { %21 = vst [vmem:[#allocation1] sm:$0x3] %v20_v2 }
   0xd   :  { %v38_v3 = vld [vmem:[#allocation1] sm:$0x3] }
   0xe   :  { %39 = vst [vmem:[#allocation0] sm:$0x3] %v38_v3 }
  0x15   :  { %v40_v4 = vld [vmem:[#allocation0] sm:$0xff] }
  0x16   :  { %41 = vperm.xlu0 %4, %v40_v4  }
  0x95   :  { %v42_v5 = vpop.permute.xlu0 %41 }
  0x96   :  { %43 = vst [vmem:[#allocation2] sm:$0xff] %v42_v5 }
  0x9d   :  { %v47_v6 = vld [vmem:[#allocation2] sm:$0x3] }
  0x9e   :  { %49 = vst [vmem:[#allocation3] sm:$0x3] %v47_v6 }
  0xa5   :  { %v65_v7 = vld [vmem:[#allocation3] sm:$0x3] }
  0xa6   :  { %66 = vst [vmem:[%s106_s1] sm:$0x3] %v65_v7 }

// kernel: _weight_svd_forward.1
= control target key start
LH: loop header
LB: loop body
LE: loop exit
PB: predicated region body
PF: predicated region fallthrough
CT: control target
= control target key end

     0   :  { %v630_v0 = vmov 1   ;;  %v631_v1 = vmov 0   ;;  %v632_v4 = vmov 2   ;;  %vm264_vm0 = vcmask 1041409   ;;  %s1116_s4 = inlined_call_operand.vmem [shape: f32[8,3], index: 4, kind: input, shape index: {}]   ;;  %s1117_s3 = inlined_call_operand.vmem [shape: f32[8,3], index: 3, kind: input, shape index: {}]   ;;  %s1118_s1 = inlined_call_operand.vmem [shape: f32[8,3,128], index: 1, kind: input, shape index: {}]   ;;  %s1119_s0 = inlined_call_operand.vmem [shape: f32[8,3,128], index: 0, kind: input, shape index: {}]   ;;  %s1120_s2 = inlined_call_operand.vmem [shape: f32[8,128], index: 2, kind: input, shape index: {}]   ;;  %s1121_s5 = inlined_call_operand.vmem [shape: f32[8,128], index: 5, kind: output, shape index: {}]  }
   0x1   :  { %627 = vset.pattern.permute.xlu1 %v630_v0  ;;  %626 = vset.pattern.permute.xlu0 %v631_v1  ;;  %v47_v2 = vld [vmem:[%s1116_s4] sm:$0xff]  ;;  %v83_v8 = vld [vmem:[%s1118_s1 + $0x9] sm:$0x1]  ;;  %v51_v13 = vld [vmem:[%s1119_s0 + $0x8] sm:$0x1]  ;;  %vm267_vm1 = vcmask 1042434  }
   0x2   :  { %v46_v3 = vld [vmem:[%s1117_s3] sm:$0xff]  ;;  %204 = vperm.xlu1 %627, %v47_v2   ;;  %v52_v14 = vld [vmem:[%s1119_s0 + $0xc] sm:$0x1]  ;;  %v53_v23 = vld [vmem:[%s1119_s0 + $0x10] sm:$0x1]  ;;  %vm270_vm2 = vcmask 1043459  }
   0x3   :  { %99 = vperm.xlu0 %626, %v46_v3   ;;  %v672_v5 = vld [vmem:[%s1118_s1 + $0x1] sm:$0x1]  ;;  %v82_v7 = vld [vmem:[%s1118_s1 + $0x5] sm:$0x1]  ;;  %v50_v10 = vld [vmem:[%s1119_s0 + $0x4] sm:$0x1] }
   0x4   :  { %v699_v16 = vld [vmem:[%s1119_s0] sm:$0x1]  ;;  %v726_v30 = vld [vmem:[%s1119_s0 + $0x1] sm:$0x1]  ;;  %v58_v31 = vld [vmem:[%s1119_s0 + $0x5] sm:$0x1] }
   0x5   :  { %v59_v32 = vld [vmem:[%s1119_s0 + $0x9] sm:$0x1]  ;;  %v60_v36 = vld [vmem:[%s1119_s0 + $0xd] sm:$0x1]  ;;  %v61_v42 = vld [vmem:[%s1119_s0 + $0x11] sm:$0x1] }
   0x6   :  { %125 = vperm.xlu1 %627, %v46_v3   ;;  %v74_v48 = vld [vmem:[%s1118_s1 + $0x4] sm:$0x1]  ;;  %v766_v51 = vld [vmem:[%s1118_s1] sm:$0x1]  ;;  %v75_v52 = vld [vmem:[%s1118_s1 + $0x8] sm:$0x1] }
   0x7   :  { %178 = vperm.xlu0 %626, %v47_v2   ;;  %v785_v60 = vld [vmem:[%s1119_s0 + $0x2] sm:$0x1]  ;;  %v66_v61 = vld [vmem:[%s1119_s0 + $0x6] sm:$0x1]  ;;  %v67_v62 = vld [vmem:[%s1119_s0 + $0xa] sm:$0x1] }
   0x8   :  { %vm273_vm3 = vcmask 1044484   ;;  %vm276_vm4 = vcmask 1045509   ;;  %vm279_vm5 = vcmask 1046534   ;;  %vm282_vm6 = vcmask 1047559  }
   0xa   :  { %629 = vset.pattern.permute.xlu1 %v632_v4 }
   0xb   :  { %628 = vset.pattern.permute.xlu0 %v632_v4  ;;  %151 = vperm.xlu1 %629, %v46_v3   ;;  %v68_v3 = vld [vmem:[%s1119_s0 + $0xe] sm:$0x1]  ;;  %v69_v4 = vld [vmem:[%s1119_s0 + $0x12] sm:$0x1] }
   0xc   :  { %230 = vperm.xlu0 %628, %v47_v2  }
  0x81   :  { %v674_v6 = vpop.permute.xlu1 %204 }
  0x82   :  { %v682_v9 = vpop.permute.xlu0 %99  ;;  %v206_v11 = vrot.slane %v674_v6, 1  ;;  %v207_v12 = vrot.slane %v674_v6, 2  ;;  %v208_v15 = vrot.slane %v674_v6, 3  ;;  %v209_v20 = vrot.slane %v674_v6, 4 }
  0x83   :  { %v101_v17 = vrot.slane %v682_v9, 1  ;;  %v102_v18 = vrot.slane %v682_v9, 2  ;;  %v103_v19 = vrot.slane %v682_v9, 3  ;;  %v104_v24 = vrot.slane %v682_v9, 4 }
  0x84   :  { %v705_v21 = vsub.f32 %v82_v7, %v206_v11  ;;  %v707_v22 = vsub.f32 %v83_v8, %v207_v12  ;;  %v221_v25 = vsub.f32 %v672_v5, %v674_v6  ;;  %v105_v34 = vrot.slane %v682_v9, 5  ;;  %v76_v5 = vld [vmem:[%s1118_s1 + $0xc] sm:$0x1] }
  0x85   :  { %v715_v26 = vsub.f32 %v50_v10, %v101_v17  ;;  %v717_v27 = vsub.f32 %v51_v13, %v102_v18  ;;  %v719_v28 = vsub.f32 %v52_v14, %v103_v19  ;;  %v721_v29 = vpop.permute.xlu1 %125  ;;  %v116_v35 = vsub.f32 %v699_v16, %v682_v9  ;;  %v814_v13 = vld [vmem:[%s1118_s1 + $0x2] sm:$0x1] }
  0x86   :  { %v369_v33 = vrot.slane %v705_v21, 7  ;;  %v127_v37 = vrot.slane %v721_v29, 1  ;;  %v742_v38 = vpop.permute.xlu0 %178  ;;  %v371_v39 = vrot.slane %v707_v22, 6  ;;  %v745_v40 = vsub.f32 %v53_v23, %v104_v24  ;;  %v90_v23 = vld [vmem:[%s1118_s1 + $0x6] sm:$0x1] }
  0x87   :  { %v263_v41 = vrot.slane %v715_v26, 7  ;;  %v128_v43 = vrot.slane %v721_v29, 2  ;;  %v266_v44 = vrot.slane %v717_v27, 6  ;;  %v269_v45 = vrot.slane %v719_v28, 5  ;;  %v54_v24 = vld [vmem:[%s1119_s0 + $0x14] sm:$0x1] }
  0x88   :  { %v129_v46 = vrot.slane %v721_v29, 3  ;;  %v130_v47 = vrot.slane %v721_v29, 4  ;;  %v759_v49 = vsub.f32 %v58_v31, %v127_v37  ;;  %v180_v53 = vrot.slane %v742_v38, 1  ;;  %v910_v26 = vld [vmem:[%s1120_s2] sm:$0xff]  ;;  %v78_v22 = vld [vmem:[%s1118_s1 + $0x14] sm:$0x1] }
  0x89   :  { %v761_v50 = vsub.f32 %v59_v32, %v128_v43  ;;  %v181_v54 = vrot.slane %v742_v38, 2  ;;  %v182_v0 = vrot.slane %v742_v38, 3  ;;  %v183_v1 = vrot.slane %v742_v38, 4  ;;  %v85_v43 = vld [vmem:[%s1118_s1 + $0x11] sm:$0x1] }
  0x8a   :  { %v776_v57 = vsub.f32 %v60_v36, %v129_v46  ;;  %v778_v58 = vsub.f32 %v61_v42, %v130_v47  ;;  %v780_v59 = vpop.permute.xlu1 %151  ;;  %v796_v2 = vsub.f32 %v74_v48, %v180_v53  ;;  %v195_v17 = vsub.f32 %v766_v51, %v742_v38  ;;  %v91_v42 = vld [vmem:[%s1118_s1 + $0xa] sm:$0x1]  ;;  %v56_v53 = vld [vmem:[%s1119_s0 + $0x1c] sm:$0x1] }
  0x8b   :  { %v805_v8 = vsub.f32 %v75_v52, %v181_v54  ;;  %v153_v10 = vrot.slane %v780_v59, 1  ;;  %v154_v11 = vrot.slane %v780_v59, 2  ;;  %v809_v12 = vpop.permute.xlu0 %230  ;;  %v155_v18 = vrot.slane %v780_v59, 3  ;;  %v55_v52 = vld [vmem:[%s1119_s0 + $0x18] sm:$0x1] }
  0x8c   :  { %v156_v19 = vrot.slane %v780_v59, 4  ;;  %v232_v47 = vrot.slane %v809_v12, 1  ;;  %v233_v48 = vrot.slane %v809_v12, 2  ;;  %v106_v36 = vrot.slane %v682_v9, 6 }
  0x8d   :  { %v830_v37 = vsub.f32 %v66_v61, %v153_v10  ;;  %v837_v46 = vsub.f32 %v67_v62, %v154_v11  ;;  %v847_v54 = vsub.f32 %v68_v3, %v155_v18  ;;  %v84_v11 = vld [vmem:[%s1118_s1 + $0xd] sm:$0x1]  ;;  %v87_v62 = vld [vmem:[%s1118_s1 + $0x19] sm:$0x1]  ;;  %v88_v10 = vld [vmem:[%s1118_s1 + $0x1d] sm:$0x1]  ;;  %v225_v32 = vsub.f32 %v85_v43, %v209_v20 }
  0x8e   :  { %v849_v61 = vsub.f32 %v69_v4, %v156_v19  ;;  %v862_v4 = vsub.f32 %v90_v23, %v232_v47  ;;  %v864_v18 = vsub.f32 %v91_v42, %v233_v48  ;;  %v86_v19 = vld [vmem:[%s1118_s1 + $0x15] sm:$0x1]  ;;  %v107_v3 = vrot.slane %v682_v9, 7 }
  0x8f   :  { %v121_v23 = vsub.f32 %v54_v24, %v105_v34  ;;  %v210_v42 = vrot.slane %v674_v6, 5  ;;  %v211_v14 = vrot.slane %v674_v6, 6  ;;  %v212_v7 = vrot.slane %v674_v6, 7 }
  0x90   :  { %v396_v47 = vrot.slane %v862_v4, 7  ;;  %v122_v63 = vsub.f32 %v55_v52, %v106_v36  ;;  %v123_v56 = vsub.f32 %v56_v53, %v107_v3  ;;  %v224_v55 = vsub.f32 %v84_v11, %v208_v15 }
  0x91   :  { %v226_v31 = vsub.f32 %v86_v19, %v210_v42  ;;  %v227_v34 = vsub.f32 %v87_v62, %v211_v14  ;;  %v228_v24 = vsub.f32 %v88_v10, %v212_v7  ;;  %v265_v48 = vsel %vm264_vm0, %v263_v41, %v116_v35  ;;  %v77_v41 = vld [vmem:[%s1118_s1 + $0x10] sm:$0x1] }
  0x92   :  { %v268_v36 = vsel %vm267_vm1, %v266_v44, %v265_v48  ;;  %v272_v52 = vrot.slane %v745_v40, 4  ;;  %v275_v15 = vrot.slane %v121_v23, 3  ;;  %v278_v53 = vrot.slane %v122_v63, 2 }
  0x93   :  { %v271_v20 = vsel %vm270_vm2, %v269_v45, %v268_v36  ;;  %v281_v7 = vrot.slane %v123_v56, 1  ;;  %v370_v9 = vsel %vm264_vm0, %v369_v33, %v221_v25  ;;  %v373_v16 = vrot.slane %v224_v55, 5  ;;  %v79_v45 = vld [vmem:[%s1118_s1 + $0x18] sm:$0x1]  ;;  %v80_v55 = vld [vmem:[%s1118_s1 + $0x1c] sm:$0x1] }
  0x94   :  { %v274_v27 = vsel %vm273_vm3, %v272_v52, %v271_v20  ;;  %v372_v28 = vsel %vm267_vm1, %v371_v39, %v370_v9  ;;  %v375_v35 = vrot.slane %v225_v32, 4  ;;  %v377_v40 = vrot.slane %v226_v31, 3 }
  0x95   :  { %v277_v6 = vsel %vm276_vm4, %v275_v15, %v274_v27  ;;  %v374_v21 = vsel %vm270_vm2, %v373_v16, %v372_v28  ;;  %v379_v25 = vrot.slane %v227_v34, 2  ;;  %v381_v33 = vrot.slane %v228_v24, 1  ;;  %v62_v34 = vld [vmem:[%s1119_s0 + $0x15] sm:$0x1] }
  0x96   :  { %v280_v39 = vsel %vm279_vm5, %v278_v53, %v277_v6  ;;  %v376_v44 = vsel %vm273_vm3, %v375_v35, %v374_v21  ;;  %v184_v56 = vrot.slane %v742_v38, 5  ;;  %v185_v63 = vrot.slane %v742_v38, 6  ;;  %v64_v53 = vld [vmem:[%s1119_s0 + $0x1d] sm:$0x1] }
  0x97   :  { %v938_v14 = vsel %vm282_vm6, %v281_v7, %v280_v39  ;;  %v378_v31 = vsel %vm276_vm4, %v377_v40, %v376_v44  ;;  %v186_v32 = vrot.slane %v742_v38, 7  ;;  %v198_v43 = vsub.f32 %v76_v5, %v182_v0  ;;  %v63_v38 = vld [vmem:[%s1119_s0 + $0x19] sm:$0x1] }
  0x98   :  { %v946_v62 = vmul.f32 %v938_v14, %v910_v26  ;;  %v380_v10 = vsel %vm279_vm5, %v379_v25, %v378_v31  ;;  %v199_v11 = vsub.f32 %v77_v41, %v183_v1  ;;  %v200_v3 = vsub.f32 %v78_v22, %v184_v56 }
  0x99   :  { %v952_v19 = vsel %vm282_vm6, %v381_v33, %v380_v10  ;;  %v201_v23 = vsub.f32 %v79_v45, %v185_v63  ;;  %v202_v42 = vsub.f32 %v80_v55, %v186_v32  ;;  %v1122_v0 = vrot.slane %v796_v2, 7  ;;  %v95_v45 = vld [vmem:[%s1118_s1 + $0x1a] sm:$0x1]  ;;  %v96_v32 = vld [vmem:[%s1118_s1 + $0x1e] sm:$0x1] }
  0x9a   :  { %v384_v1 = vmul.f32 %v952_v19, %v946_v62  ;;  %v1123_v24 = vrot.slane %v805_v8, 6  ;;  %v346_v52 = vrot.slane %v198_v43, 5  ;;  %v348_v15 = vrot.slane %v199_v11, 4 }
  0x9b   :  { %v343_v48 = vsel %vm264_vm0, %v1122_v0, %v195_v17  ;;  %v350_v51 = vrot.slane %v200_v3, 3  ;;  %v352_v2 = vrot.slane %v201_v23, 2  ;;  %v354_v17 = vrot.slane %v202_v42, 1 }
  0x9c   :  { %v345_v36 = vsel %vm267_vm1, %v1123_v24, %v343_v48  ;;  %v132_v20 = vrot.slane %v721_v29, 6  ;;  %493 = vadd.xlane.f32.xlu0 %v384_v1  ;;  %v133_v7 = vrot.slane %v721_v29, 7  ;;  %v1124_v9 = vrot.slane %v721_v29, 5 }
  0x9d   :  { %v347_v8 = vsel %vm270_vm2, %v346_v52, %v345_v36  ;;  %v1125_v27 = vsub.f32 %v726_v30, %v721_v29  ;;  %v1126_v28 = vrot.slane %v759_v49, 7  ;;  %v1127_v6 = vrot.slane %v761_v50, 6  ;;  %v92_v49 = vld [vmem:[%s1118_s1 + $0xe] sm:$0x1]  ;;  %v93_v50 = vld [vmem:[%s1118_s1 + $0x12] sm:$0x1] }
  0x9e   :  { %v147_v16 = vsub.f32 %v62_v34, %v1124_v9  ;;  %v349_v40 = vsel %vm273_vm3, %v348_v15, %v347_v8  ;;  %v148_v5 = vsub.f32 %v63_v38, %v132_v20  ;;  %v300_v25 = vrot.slane %v778_v58, 4  ;;  %v71_v9 = vld [vmem:[%s1119_s0 + $0x1a] sm:$0x1] }
  0x9f   :  { %v295_v35 = vsel %vm264_vm0, %v1126_v28, %v1125_v27  ;;  %v351_v33 = vsel %vm276_vm4, %v350_v51, %v349_v40  ;;  %v149_v41 = vsub.f32 %v64_v53, %v133_v7  ;;  %v1128_v22 = vrot.slane %v776_v57, 5  ;;  %v94_v57 = vld [vmem:[%s1118_s1 + $0x16] sm:$0x1] }
  0xa0   :  { %v297_v21 = vsel %vm267_vm1, %v1127_v6, %v295_v35  ;;  %v302_v30 = vrot.slane %v147_v16, 3  ;;  %v353_v39 = vsel %vm279_vm5, %v352_v2, %v351_v33  ;;  %v304_v44 = vrot.slane %v148_v5, 2  ;;  %v70_v2 = vld [vmem:[%s1119_s0 + $0x16] sm:$0x1] }
  0xa1   :  { %v299_v29 = vsel %vm270_vm2, %v1128_v22, %v297_v21  ;;  %v236_v55 = vrot.slane %v809_v12, 5  ;;  %v1010_v56 = vsel %vm282_vm6, %v354_v17, %v353_v39  ;;  %v306_v31 = vrot.slane %v149_v41, 1 }
  0xa2   :  { %v301_v58 = vsel %vm273_vm3, %v300_v25, %v299_v29  ;;  %v237_v43 = vrot.slane %v809_v12, 6  ;;  %v357_v10 = vmul.f32 %v1010_v56, %v946_v62  ;;  %v238_v3 = vrot.slane %v809_v12, 7 }
  0xa3   :  { %v303_v63 = vsel %vm276_vm4, %v302_v30, %v301_v58  ;;  %v1129_v23 = vrot.slane %v809_v12, 3  ;;  %v1130_v48 = vrot.slane %v809_v12, 4  ;;  %v252_v1 = vsub.f32 %v94_v57, %v236_v55 }
  0xa4   :  { %v305_v11 = vsel %vm279_vm5, %v304_v44, %v303_v63  ;;  %v253_v24 = vsub.f32 %v95_v45, %v237_v43  ;;  %487 = vadd.xlane.f32.xlu1 %v357_v10  ;;  %v254_v52 = vsub.f32 %v96_v32, %v238_v3  ;;  %v1131_v15 = vsub.f32 %v814_v13, %v809_v12 }
  0xa5   :  { %v250_v42 = vsub.f32 %v92_v49, %v1129_v23  ;;  %v1024_v0 = vsel %vm282_vm6, %v306_v31, %v305_v11  ;;  %v251_v34 = vsub.f32 %v93_v50, %v1130_v48  ;;  %v320_v17 = vrot.slane %v837_v46, 6  ;;  %v72_v46 = vld [vmem:[%s1119_s0 + $0x1e] sm:$0x1] }
  0xa6   :  { %v309_v36 = vmul.f32 %v1024_v0, %v910_v26  ;;  %v397_v38 = vsel %vm264_vm0, %v396_v47, %v1131_v15  ;;  %v322_v53 = vrot.slane %v847_v54, 5  ;;  %v1132_v20 = vrot.slane %v864_v18, 6 }
  0xa7   :  { %v400_v51 = vrot.slane %v250_v42, 5  ;;  %v402_v7 = vrot.slane %v251_v34, 4  ;;  %v404_v4 = vrot.slane %v252_v1, 3  ;;  %v406_v47 = vrot.slane %v253_v24, 2 }
  0xa8   :  { %v399_v8 = vsel %vm267_vm1, %v1132_v20, %v397_v38  ;;  %v415_v12 = vmul.f32 %v1010_v56, %v309_v36  ;;  %v158_v18 = vrot.slane %v780_v59, 6  ;;  %v159_v16 = vrot.slane %v780_v59, 7 }
  0xa9   :  { %v401_v13 = vsel %vm270_vm2, %v400_v51, %v399_v8  ;;  %v1133_v27 = vrot.slane %v780_v59, 5  ;;  %v408_v40 = vrot.slane %v254_v52, 1  ;;  %v1134_v5 = vsub.f32 %v785_v60, %v780_v59 }
  0xaa   :  { %v403_v54 = vsel %vm273_vm3, %v402_v7, %v401_v13  ;;  %505 = vadd.xlane.f32.xlu1 %v415_v12  ;;  %v1135_v6 = vrot.slane %v830_v37, 7  ;;  %v324_v25 = vrot.slane %v849_v61, 4  ;;  %v174_v41 = vsub.f32 %v71_v9, %v158_v18 }
  0xab   :  { %v173_v28 = vsub.f32 %v70_v2, %v1133_v27  ;;  %v405_v35 = vsel %vm276_vm4, %v404_v4, %v403_v54  ;;  %v175_v22 = vsub.f32 %v72_v46, %v159_v16  ;;  %v419_v45 = vmul.f32 %v952_v19, %v309_v36 }
  0xac   :  { %v319_v21 = vsel %vm264_vm0, %v1135_v6, %v1134_v5  ;;  %v407_v33 = vsel %vm279_vm5, %v406_v47, %v405_v35  ;;  %v328_v37 = vrot.slane %v174_v41, 2  ;;  %v452_v43 = vmul.f32 %v952_v19, %v910_v26 }
  0xad   :  { %v321_v29 = vsel %vm267_vm1, %v320_v17, %v319_v21  ;;  %v409_v30 = vsel %vm282_vm6, %v408_v40, %v407_v33  ;;  %v326_v50 = vrot.slane %v173_v28, 3  ;;  %v330_v61 = vrot.slane %v175_v22, 1 }
  0xae   :  { %v323_v49 = vsel %vm270_vm2, %v322_v53, %v321_v29  ;;  %v411_v39 = vmul.f32 %v409_v30, %v946_v62  ;;  %v423_v59 = vmul.f32 %v409_v30, %v309_v36  ;;  %v448_v10 = vmul.f32 %v1010_v56, %v910_v26 }
  0xaf   :  { %v325_v60 = vsel %vm273_vm3, %v324_v25, %v323_v49  ;;  %v456_v11 = vmul.f32 %v409_v30, %v910_v26 }
  0xb0   :  { %v327_v58 = vsel %vm276_vm4, %v326_v50, %v325_v60  ;;  %499 = vadd.xlane.f32.xlu0 %v411_v39  ;;  %517 = vadd.xlane.f32.xlu1 %v423_v59 }
  0xb1   :  { %v329_v44 = vsel %vm279_vm5, %v328_v37, %v327_v58 }
  0xb2   :  { %v331_v57 = vsel %vm282_vm6, %v330_v61, %v329_v44 }
  0xb3   :  { %v333_v55 = vmul.f32 %v331_v57, %v910_v26 }
  0xb4   :  { %511 = vadd.xlane.f32.xlu0 %v419_v45 }
  0xb5   :  { %v431_v63 = vmul.f32 %v952_v19, %v333_v55  ;;  %v427_v31 = vmul.f32 %v1010_v56, %v333_v55  ;;  %v435_v32 = vmul.f32 %v409_v30, %v333_v55 }
  0xb7   :  { %529 = vadd.xlane.f32.xlu1 %v431_v63 }
  0xb8   :  { %523 = vadd.xlane.f32.xlu0 %v427_v31 }
  0xbb   :  { %541 = vadd.xlane.f32.xlu1 %v946_v62  ;;  %v484_v62 = vlaneseq }
  0xbc   :  { %535 = vadd.xlane.f32.xlu0 %v435_v32 }
  0xbd   :  { %v1089_v23 = vand.u32 127, %v484_v62 }
  0xbf   :  { %553 = vadd.xlane.f32.xlu1 %v333_v55  ;;  %vm489_vm7 = vcmp.eq.s32.totalorder %v1089_v23, 0  ;;  %vm495_vm8 = vcmp.eq.s32.totalorder %v1089_v23, 1  ;;  %vm501_vm9 = vcmp.eq.s32.totalorder %v1089_v23, 2  ;;  %vm507_vm10 = vcmp.eq.s32.totalorder %v1089_v23, 3 }
  0xc0   :  { %547 = vadd.xlane.f32.xlu0 %v309_v36  ;;  %vm513_vm11 = vcmp.eq.s32.totalorder %v1089_v23, 4  ;;  %vm519_vm12 = vcmp.eq.s32.totalorder %v1089_v23, 5  ;;  %vm525_vm13 = vcmp.eq.s32.totalorder %v1089_v23, 6  ;;  %vm531_vm14 = vcmp.eq.s32.totalorder %v1089_v23, 7 }
  0xc1   :  { %vm537_vm15 = vcmp.eq.s32.totalorder %v1089_v23, 8  ;;  %vm543_vm0 = vcmp.eq.s32.totalorder %v1089_v23, 9  ;;  %vm549_vm1 = vcmp.eq.s32.totalorder %v1089_v23, 10  ;;  %vm555_vm2 = vcmp.eq.s32.totalorder %v1089_v23, 11 }
  0xc2   :  { %vm561_vm3 = vcmp.eq.s32.totalorder %v1089_v23, 12  ;;  %vm567_vm4 = vcmp.eq.s32.totalorder %v1089_v23, 13  ;;  %vm573_vm5 = vcmp.eq.s32.totalorder %v1089_v23, 14  ;;  %vm579_vm6 = vcmp.eq.s32.totalorder %v1089_v23, 15 }
  0xc3   :  { %565 = vadd.xlane.f32.xlu1 %v452_v43 }
  0xc4   :  { %559 = vadd.xlane.f32.xlu0 %v448_v10 }
  0xc7   :  { %577 = vadd.xlane.f32.xlu1 %v938_v14 }
  0xc8   :  { %571 = vadd.xlane.f32.xlu0 %v456_v11 }
  0xcb   :  { %589 = vadd.xlane.f32.xlu1 %v331_v57 }
  0xcc   :  { %583 = vadd.xlane.f32.xlu0 %v1024_v0 }
  0xcf   :  { %601 = vadd.xlane.f32.xlu1 %v952_v19 }
  0xd0   :  { %595 = vadd.xlane.f32.xlu0 %v1010_v56 }
  0xd3   :  { %613 = vadd.xlane.f32.xlu1 %v910_v26 }
  0xd4   :  { %607 = vadd.xlane.f32.xlu0 %v409_v30 }
 0x129   :  { %v494_v42 = vpop.xlane.xlu0 %493 }
 0x12a   :  { %v496_v0 = vsel %vm495_vm8, %v494_v42, 0.0  ;;  %vm591_vm8 = vcmp.eq.s32.totalorder %v1089_v23, 17 }
 0x131   :  { %v488_v3 = vpop.xlane.xlu1 %487 }
 0x132   :  { %v490_v48 = vsel %vm489_vm7, %v488_v3, 0.0  ;;  %vm585_vm7 = vcmp.eq.s32.totalorder %v1089_v23, 16 }
 0x133   :  { %v497_v19 = vadd.f32 %v496_v0, %v490_v48 }
 0x137   :  { %v506_v14 = vpop.xlane.xlu1 %505 }
 0x138   :  { %v508_v24 = vsel %vm507_vm10, %v506_v14, 0.0  ;;  %vm603_vm10 = vcmp.eq.s32.totalorder %v1089_v23, 19 }
 0x13d   :  { %v500_v56 = vpop.xlane.xlu0 %499  ;;  %v518_v26 = vpop.xlane.xlu1 %517 }
 0x13e   :  { %v502_v34 = vsel %vm501_vm9, %v500_v56, 0.0  ;;  %v520_v2 = vsel %vm519_vm12, %v518_v26, 0.0  ;;  %vm597_vm9 = vcmp.eq.s32.totalorder %v1089_v23, 18  ;;  %vm615_vm12 = vcmp.eq.s32.totalorder %v1089_v23, 21 }
 0x13f   :  { %v503_v1 = vadd.f32 %v502_v34, %v497_v19 }
 0x141   :  { %v512_v36 = vpop.xlane.xlu0 %511  ;;  %v509_v52 = vadd.f32 %v508_v24, %v503_v1 }
 0x142   :  { %v514_v15 = vsel %vm513_vm11, %v512_v36, 0.0  ;;  %vm609_vm11 = vcmp.eq.s32.totalorder %v1089_v23, 20 }
 0x143   :  { %v515_v38 = vadd.f32 %v514_v15, %v509_v52 }
 0x144   :  { %v530_v51 = vpop.xlane.xlu1 %529 }
 0x145   :  { %v524_v17 = vpop.xlane.xlu0 %523  ;;  %v521_v53 = vadd.f32 %v520_v2, %v515_v38  ;;  %v532_v12 = vsel %vm531_vm14, %v530_v51, 0.0 }
 0x146   :  { %v526_v20 = vsel %vm525_vm13, %v524_v17, 0.0 }
 0x147   :  { %v527_v8 = vadd.f32 %v526_v20, %v521_v53 }
 0x148   :  { %v542_v7 = vpop.xlane.xlu1 %541 }
 0x149   :  { %v536_v13 = vpop.xlane.xlu0 %535  ;;  %v533_v4 = vadd.f32 %v532_v12, %v527_v8  ;;  %v544_v54 = vsel %vm543_vm0, %v542_v7, 0.0 }
 0x14a   :  { %v538_v47 = vsel %vm537_vm15, %v536_v13, 0.0 }
 0x14b   :  { %v539_v9 = vadd.f32 %v538_v47, %v533_v4 }
 0x14c   :  { %v554_v46 = vpop.xlane.xlu1 %553 }
 0x14d   :  { %v548_v18 = vpop.xlane.xlu0 %547  ;;  %v545_v16 = vadd.f32 %v544_v54, %v539_v9  ;;  %v556_v40 = vsel %vm555_vm2, %v554_v46, 0.0 }
 0x14e   :  { %v550_v27 = vsel %vm549_vm1, %v548_v18, 0.0 }
 0x14f   :  { %v551_v28 = vadd.f32 %v550_v27, %v545_v16 }
 0x150   :  { %v566_v35 = vpop.xlane.xlu1 %565 }
 0x151   :  { %v560_v5 = vpop.xlane.xlu0 %559  ;;  %v557_v6 = vadd.f32 %v556_v40, %v551_v28  ;;  %v568_v41 = vsel %vm567_vm4, %v566_v35, 0.0 }
 0x152   :  { %v562_v21 = vsel %vm561_vm3, %v560_v5, 0.0 }
 0x153   :  { %v563_v25 = vadd.f32 %v562_v21, %v557_v6 }
 0x154   :  { %v578_v33 = vpop.xlane.xlu1 %577 }
 0x155   :  { %v572_v22 = vpop.xlane.xlu0 %571  ;;  %v569_v29 = vadd.f32 %v568_v41, %v563_v25  ;;  %v580_v39 = vsel %vm579_vm6, %v578_v33, 0.0 }
 0x156   :  { %v574_v30 = vsel %vm573_vm5, %v572_v22, 0.0 }
 0x157   :  { %v575_v49 = vadd.f32 %v574_v30, %v569_v29 }
 0x158   :  { %v590_v50 = vpop.xlane.xlu1 %589 }
 0x159   :  { %v584_v59 = vpop.xlane.xlu0 %583  ;;  %v581_v60 = vadd.f32 %v580_v39, %v575_v49  ;;  %v592_v44 = vsel %vm591_vm8, %v590_v50, 0.0 }
 0x15a   :  { %v586_v37 = vsel %vm585_vm7, %v584_v59, 0.0 }
 0x15b   :  { %v587_v58 = vadd.f32 %v586_v37, %v581_v60 }
 0x15c   :  { %v602_v61 = vpop.xlane.xlu1 %601 }
 0x15d   :  { %v596_v57 = vpop.xlane.xlu0 %595  ;;  %v593_v45 = vadd.f32 %v592_v44, %v587_v58  ;;  %v604_v32 = vsel %vm603_vm10, %v602_v61, 0.0 }
 0x15e   :  { %v598_v55 = vsel %vm597_vm9, %v596_v57, 0.0 }
 0x15f   :  { %v599_v63 = vadd.f32 %v598_v55, %v593_v45 }
 0x160   :  { %v614_v31 = vpop.xlane.xlu1 %613 }
 0x161   :  { %v608_v43 = vpop.xlane.xlu0 %607  ;;  %v605_v10 = vadd.f32 %v604_v32, %v599_v63  ;;  %v616_v62 = vsel %vm615_vm12, %v614_v31, 0.0 }
 0x162   :  { %v610_v11 = vsel %vm609_vm11, %v608_v43, 0.0 }
 0x163   :  { %v611_v3 = vadd.f32 %v610_v11, %v605_v10 }
 0x165   :  { %v617_v14 = vadd.f32 %v616_v62, %v611_v3 }
 0x167   :  { %618 = vst [vmem:[%s1121_s5] sm:$0xff] %v617_v14 }

// kernel: custom-call.16
= control target key start
LH: loop header
LB: loop body
LE: loop exit
PB: predicated region body
PF: predicated region fallthrough
CT: control target
= control target key end

     0   :  { %s653_s9 = smov 0   ;;  %s655_s10 = smov 0   ;;  %s799_s0 = inlined_call_operand.vmem [shape: f32[2,3,3], index: 0, kind: input, shape index: {}]   ;;  %s800_s1 = inlined_call_operand.vmem [shape: f32[2,3,3], index: 1, kind: output, shape index: {0}]   ;;  %s801_s2 = inlined_call_operand.vmem [shape: f32[2,3], index: 2, kind: output, shape index: {1}]  }
   0x1   :  { %s657_s11 = smov 0   ;;  %s659_s12 = smov 0  }
   0x2   :  { %s661_s13 = smov 0  }
   0x3 LB: > { %s28_s14 = sadd.s32 1, %s626_s12  ;;  %s508_s15 = sadd.s32 4294967295, %s630_s13   ;;  %s630_s13 = sphi %s661_s13, %s9_s13   ;;  %s626_s12 = sphi %s659_s12, %s808_s12   ;;  %s622_s11 = sphi %s657_s11, %s807_s11   ;;  %s618_s10 = sphi %s655_s10, %s806_s10   ;;  %s614_s9 = sphi %s653_s9, %s805_s9  }
   0x4   : > { %p30_p0 = scmp.ge.s32.totalorder %s28_s14, 2  ;;  %s33_s16 = ssub.s32 0, %s626_s12 }
   0x5   : > { %s510_s17 = smin.u32 %s626_s12, %s33_s16  ;;  %p57_p1 = scmp.ne.s32.totalorder %s618_s10, %s614_s9 }
   0x6   : > { %s810_s14 = smov (%p30_p0, %s28_s14), 0  ;;  %s35_s18 = sshrl.u32 %s510_s17, 3 }
   0x7   : > { %s39_s19 = ssub.s32 0, %s810_s14  ;;  %p58_p2 = scmp.eq.s32.totalorder %s508_s15, 1 }
   0x8   : > { %s511_s20 = smin.u32 %s39_s19, %s810_s14  ;;  %s47_s24 = sadd.s32 1, %s618_s10 }
   0x9   : > { %s41_s21 = sshrl.u32 %s511_s20, 3  ;;  %p688_p3 = por %p58_p2, %p57_p1 }
   0xa   : > { %s44_s23 = ssub.s32 %s35_s18, %s41_s21  ;;  %p513_p5 = scmp.ge.s32.totalorder %s630_s13, 2 }
   0xb   : > { %p45_p4 = scmp.eq.s32.totalorder %s44_s23, 0  ;;  %s82_s26 = sand.u32 (!%p513_p5), 1, %s630_s13  }
   0xc   : > { %80 = sbr.rel (%p513_p5) target bundleno = 19 (0x13), region = 16  ;;  %s515_s27 = sshll.u32 (!%p513_p5), %s626_s12, 2 }
   0xd   : > { %s694_s25 = scalar_select %p45_p4, %s618_s10, %s47_s24  }
   0xe   : > { %s514_s28 = sshll.u32 (!%p513_p5), %s82_s26, 2  ;;  %s88_s3 = scalar_lea.vmem (!%p513_p5), %s799_s0, %s515_s27 }
   0xf   : > { %v104_v0 = vld [vmem:[%s88_s3] sm:$0xf] (!%p513_p5)  ;;  %s84_s4 = scalar_lea.vmem (!%p513_p5), [#allocation1], %s514_s28 }
  0x10   : > { %105 = vst [vmem:[%s84_s4] sm:$0xf] (!%p513_p5), %v104_v0 }
  0x13 PF: > { %p516_p6 = scmp.ge.s32.totalorder %s630_s13, 1  ;;  %p121_p7 = scmp.lt.s32.totalorder %s630_s13, 3 }
  0x15   : > { %p122_p8 = pnand %p516_p6, %p121_p7 }
  0x17   : > { %125 = sbr.rel (%p122_p8) target bundleno = 346 (0x15a), region = 50 }
  0x1e   : > { %s132_s5 = sand.u32 1, %s508_s15   ;;  %s142_s6 = sand.u32 1, %s614_s9   ;;  %v636_v2 = vmov 0.0  }
  0x1f   : > { %s517_s7 = sshll.u32 %s132_s5, 2  ;;  %s705_s8 = sshll.u32 %s142_s6, 1 }
  0x20   : > { %s134_s16 = scalar_lea.vmem [#allocation1], %s517_s7  ;;  %s155_s17 = sand.u32 7, %s622_s11  }
  0x21   : > { %v147_v1 = vld [vmem:[%s134_s16] sm:$0xf]  ;;  %s708_s18 = scalar_lea.vmem [#allocation4], %s155_s17  ;;  %s711_s19 = scalar_lea.vmem [#allocation3], %s517_s7 }
  0x22   : > { %148 = vst [vmem:[#allocation0] sm:$0xf] %v147_v1  ;;  %159 = vst [vmem:[%s708_s18] sm:$0x1] %v636_v2  ;;  %s144_s15 = scalar_lea.vmem [#allocation5], %s705_s8  ;;  %s714_s20 = smov 0  }
  0x29   : > { %v157_v3 = vld [vmem:[#allocation0] sm:$0xff] }
  0x2a   : > { %158 = vst [vmem:[#allocation2] sm:$0xff] %v157_v3 }
  0x2b LB: >> { %v167_v4 = vlaneseq  ;;  %v723_v6 = vstv %s634_s20  ;;  %s194_s9 = scalar_lea.vmem [#allocation2], %s634_s20  ;;  %s230_s21 = smov [#allocation2]  ;;  %v637_v60 = vmov 1.0   ;;  %v265_v61 = vld [vmem:[%s708_s18] ss:$0 sm:$0xff]  ;;  %s634_s20 = sphi %s714_s20, %s165_s20  }
  0x2c   : >> { %s252_s23 = scalar_lea.vmem [#allocation6], %s634_s20  ;;  %s268_s24 = smov [#allocation2] }
  0x2d   : >> { %v720_v5 = vshrl.u32 %v167_v4, 7  ;;  %v246_v49 = vand.u32 127, %v167_v4  ;;  %s269_s26 = smov [#allocation6] }
  0x2f   : >> { %vm171_vm0 = vcmp.gt.s32.totalorder %v720_v5, %v723_v6  ;;  %vm172_vm1 = vcmp.lt.s32.totalorder %v720_v5, 3  ;;  %v233_v5 = vmov %v720_v5  ;;  %vm738_vm12 = vcmp.eq.s32.totalorder %v246_v49, %v723_v6 }
  0x30   : >> { %vm173_vm2 = vmand %vm171_vm0, %vm172_vm1  ;;  %vm237_vm9 = vcmp.gt.s32.totalorder %v233_v5, %v723_v6  ;;  %vm238_vm10 = vcmp.lt.s32.totalorder %v233_v5, 3  ;;  %v272_v5 = vmov %v720_v5  ;;  %vm298_vm15 = vcmp.gt.s32.totalorder %v246_v49, %v723_v6 }
  0x31   : >> { %v166_v7 = vld [vmem:[#allocation2] sm:$0xff]  ;;  %v195_v16 = vld [vmem:[%s194_s9] ss:$0 sm:$0xff]  ;;  %vm239_vm11 = vmand %vm237_vm9, %vm238_vm10  ;;  %vm277_vm13 = vcmp.lt.s32.totalorder %v272_v5, 3  ;;  %v289_v5 = vmov %v720_v5 }
  0x32   : >> { %v174_v8 = vsel %vm173_vm2, %v166_v7, 0.0  ;;  %v196_v17 = vand.u32 2147483647, %v195_v16  ;;  %vm221_vm8 = vcmp.lt.f32.partialorder %v195_v16, 0.0  ;;  %v234_v46 = vld [vmem:[%s230_s21] sm:$0xff]  ;;  %vm306_vm14 = vcmp.ge.s32.totalorder %v289_v5, %v723_v6 }
  0x33   : >> { %v175_v9 = vmul.f32 %v174_v8, %v174_v8  ;;  %v240_v50 = vsel %vm239_vm11, %v234_v46, 0.0  ;;  %v275_v0 = vld [vmem:[%s268_s24] sm:$0xff]  ;;  %s285_s24 = smov %s268_s24  ;;  %vm307_vm0 = vmand %vm738_vm12, %vm306_vm14 }
  0x34   : >> { %v197_v22 = vmax.f32 %v196_v17, 0.0  ;;  %s310_s27 = scalar_lea.vmem %s285_s24, %s634_s20  ;;  %s165_s20 = sadd.s32 1, %s634_s20  }
  0x35   : >> { %v176_v10 = vrot.slane %v175_v9, 4  ;;  %p162_p9 = scmp.ge.s32.totalorder %s165_s20, 3  }
  0x36   : > { %s523_s28 = sshll.u32 (%p162_p9), %s622_s11, 2 }
  0x37   : >> { %v177_v11 = vadd.f32 %v176_v10, %v175_v9  ;;  %s341_s3 = scalar_lea.vmem (%p162_p9), %s800_s1, %s523_s28 }
  0x39   : >> { %v178_v12 = vrot.slane %v177_v11, 2 }
  0x3b   : >> { %v179_v13 = vadd.f32 %v178_v12, %v177_v11 }
  0x3d   : >> { %v180_v14 = vrot.slane %v179_v13, 1 }
  0x3f   : >> { %v181_v15 = vadd.f32 %v180_v14, %v179_v13  ;;  %v296_v14 = vld [vmem:[%s285_s24] sm:$0xff] }
  0x41   : >> { %578 = vrsqrt.f32 %v181_v15  ;;  %vm184_vm3 = vcmp.eq.f32.partialorder %v181_v15, inf  ;;  %v187_v19 = vand.u32 2147483648, %v181_v15  ;;  %vm186_vm4 = vcmp.eq.f32.partialorder %v181_v15, 0.0 }
  0x4b   : >> { %v579_v18 = vpop.eup %578 }
  0x4c   : >> { %v183_v20 = vmul.f32 %v579_v18, %v181_v15 }
  0x4e   : >> { %v185_v21 = vsel %vm184_vm3, %v181_v15, %v183_v20 }
  0x4f   : >> { %v188_v23 = vsel %vm186_vm4, %v187_v19, %v185_v21 }
  0x50   : >> { %v198_v24 = vand.u32 2147483647, %v188_v23 }
  0x52   : >> { %v199_v25 = vmax.f32 %v197_v22, %v198_v24 }
  0x54   : >> { %580 = vrcp.f32 %v199_v25  ;;  %vm211_vm7 = vcmp.eq.f32.partialorder %v199_v25, 0.0 }
  0x5e   : >> { %v581_v26 = vpop.eup %580 }
  0x5f   : >> { %v201_v27 = vmul.f32 %v581_v26, %v196_v17  ;;  %v204_v28 = vmul.f32 0.0, %v581_v26  ;;  %v208_v29 = vmul.f32 %v581_v26, %v198_v24 }
  0x61   : >> { %v202_v30 = vmul.f32 %v201_v27, %v201_v27  ;;  %v205_v31 = vmul.f32 %v204_v28, %v204_v28  ;;  %v209_v32 = vmul.f32 %v208_v29, %v208_v29 }
  0x63   : >> { %v206_v33 = vadd.f32 %v205_v31, %v202_v30 }
  0x65   : >> { %v210_v34 = vadd.f32 %v209_v32, %v206_v33 }
  0x67   : >> { %582 = vrsqrt.f32 %v210_v34  ;;  %vm214_vm5 = vcmp.eq.f32.partialorder %v210_v34, inf  ;;  %v217_v36 = vand.u32 2147483648, %v210_v34  ;;  %vm216_vm6 = vcmp.eq.f32.partialorder %v210_v34, 0.0 }
  0x71   : >> { %v583_v35 = vpop.eup %582 }
  0x72   : >> { %v213_v37 = vmul.f32 %v583_v35, %v210_v34 }
  0x74   : >> { %v215_v38 = vsel %vm214_vm5, %v210_v34, %v213_v37 }
  0x75   : >> { %v218_v39 = vsel %vm216_vm6, %v217_v36, %v215_v38 }
  0x76   : >> { %v219_v40 = vmul.f32 %v218_v39, %v199_v25 }
  0x78   : >> { %v220_v41 = vsel %vm211_vm7, 0.0, %v219_v40 }
  0x79   : >> { %v222_v42 = vxor.u32 2147483648, %v220_v41 }
  0x7b   : >> { %v223_v43 = vsel %vm221_vm8, %v220_v41, %v222_v42 }
  0x7c   : >> { %v731_v44 = vsel %vm186_vm4, %v195_v16, %v223_v43  ;;  %584 = vrcp.f32 %v223_v43  ;;  %v224_v47 = vsub.f32 %v223_v43, %v195_v16 }
  0x7d   : >> { %v229_v45 = vsub.f32 %v195_v16, %v731_v44 }
  0x7f   : >> { %586 = vrcp.f32 %v229_v45 }
  0x86   : >> { %v585_v48 = vpop.eup %584 }
  0x87   : >> { %v226_v51 = vmul.f32 %v585_v48, %v224_v47 }
  0x89   : >> { %v587_v52 = vpop.eup %586  ;;  %v228_v56 = vsel %vm186_vm4, 0.0, %v226_v51 }
  0x8a   : >> { %v242_v53 = vmul.f32 %v587_v52, %v240_v50  ;;  %v258_v58 = vsel %vm738_vm12, %v228_v56, 0.0 }
  0x8c   : >> { %v243_v55 = vsel %vm186_vm4, 0.0, %v242_v53 }
  0x8d   : >> { %v248_v57 = vsel %vm738_vm12, %v243_v55, 0.0 }
  0x8e   : >> { %249 = vadd.xlane.f32.xlu0 %v248_v57 }
  0x92   : >> { %259 = vadd.xlane.f32.xlu0 %v258_v58 }
 0x11b   : >> { %v250_v59 = vpop.xlane.xlu0 %249 }
 0x11c   : >> { %251 = vst [vmem:[#allocation6] sm:$0xff] %v250_v59 }
 0x11d   : >> { %253 = vst [vmem:[%s252_s23] sm:$0x1] %v637_v60 }
 0x11f   : >> { %v260_v62 = vpop.xlane.xlu0 %259 }
 0x120   : >> { %v266_v63 = vsel %vm738_vm12, %v260_v62, %v265_v61 }
 0x121   : >> { %267 = vst [vmem:[%s708_s18] sm:$0x1] %v266_v63 }
 0x124   : >> { %v274_v1 = vld [vmem:[%s269_s26] sm:$0xff]  ;;  %s286_s26 = smov %s269_s26 }
 0x125   : >> { %v276_v2 = vmul.f32 %v275_v0, %v274_v1  ;;  %v294_v13 = vld [vmem:[%s286_s26] sm:$0xff] }
 0x127   : >> { %v278_v3 = vsel %vm277_vm13, %v276_v2, 0.0 }
 0x128   : >> { %v279_v4 = vrot.slane %v278_v3, 4  ;;  %v327_v6 = vld [vmem:[#allocation4] sm:$0x3] (%p162_p9) }
 0x129   : > { %329 = vst [vmem:[%s144_s15] sm:$0x3] (%p162_p9), %v327_v6 }
 0x12a   : >> { %v280_v7 = vadd.f32 %v279_v4, %v278_v3 }
 0x12c   : >> { %v281_v8 = vrot.slane %v280_v7, 2 }
 0x12e   : >> { %v282_v9 = vadd.f32 %v281_v8, %v280_v7 }
 0x130   : >> { %v283_v10 = vrot.slane %v282_v9, 1 }
 0x132   : >> { %v284_v11 = vadd.f32 %v283_v10, %v282_v9 }
 0x134   : >> { %v290_v12 = vmul.f32 %v284_v11, %v260_v62 }
 0x136   : >> { %v295_v15 = vmul.f32 %v294_v13, %v290_v12 }
 0x138   : >> { %v299_v16 = vsub.f32 %v296_v14, %v295_v15 }
 0x13a   : >> { %v300_v17 = vsel %vm298_vm15, %v299_v16, %v296_v14 }
 0x13b   : >> { %v308_v18 = vsel %vm307_vm0, %v294_v13, %v300_v17 }
 0x13c   : >> { %309 = vst [vmem:[%s285_s24] sm:$0xff] %v308_v18 }
 0x13f   : > { %164 = sbr.rel (!%p162_p9) target bundleno = 43 (0x2b), region = 167 }
 0x143   : >> { %v311_v19 = vld [vmem:[%s310_s27] ss:$0 sm:$0xff] }
 0x144   : >> { %v316_v20 = vsel %vm738_vm12, %v731_v44, %v311_v19 }
 0x145   : >> { %317 = vst [vmem:[%s310_s27] sm:$0x1] %v316_v20 }
 0x146   : > { %p376_p10 = scmp.lt.s32.totalorder (%p688_p3), %s622_s11, 0  ;;  %s377_s4 = ssub.s32 (%p688_p3), 0, %s622_s11  ;;  %v399_v22 = vld [vmem:[%s144_s15] sm:$0x3] (%p688_p3) }
 0x147   : > { %s524_s5 = smin.u32 (%p688_p3), %s622_s11, %s377_s4 }
 0x148   : > { %s379_s6 = sshrl.u32 (%p688_p3), %s524_s5, 3 }
 0x149   : > { %s380_s7 = ssub.s32 (%p688_p3), 0, %s379_s6 }
 0x14c   : > { %v321_v5 = vld [vmem:[#allocation2] sm:$0xf] }
 0x14d   : > { %323 = vst [vmem:[%s711_s19] sm:$0xf] %v321_v5 }
 0x14f   : > { %375 = sbr.rel (!%p688_p3) target bundleno = 346 (0x15a), region = 91 }
 0x154   : > { %v357_v21 = vld [vmem:[%s711_s19] sm:$0xf] }
 0x155   : > { %358 = vst [vmem:[%s341_s3] sm:$0xf] %v357_v21 }
 0x156   : > { %s812_s7 = smov (!%p376_p10, %s380_s7), %s379_s6 }
 0x157   : > { %s525_s16 = sshll.u32 %s812_s7, 1 }
 0x158   : > { %s383_s19 = scalar_lea.vmem %s801_s2, %s525_s16 }
 0x159   : > { %400 = vst [vmem:[%s383_s19] sm:$0x3] %v399_v22 }
 0x15a PF: > { %s9_s13 = sadd.s32 1, %s630_s13   ;;  %s805_s9 = smov %s618_s10 }
 0x15b   : > { %p6_p11 = scmp.ge.s32.totalorder %s9_s13, 4   ;;  %s806_s10 = smov %s694_s25 }
 0x15c   : > { %s807_s11 = smov %s626_s12  ;;  %s808_s12 = smov %s810_s14 }
 0x15d   :  { %8 = sbr.rel (!%p6_p11) target bundleno = 3 (0x3), region = 178 }

</bundles_post_ra>
